<compile_context>
chip_gen: v7x
topology: tpu7x:2x2x1
jax: 0.10.0
libtpu: 0.0.40
codegen_flags: <defaults>
</compile_context>

<pallas_src>
import jax
import jax.numpy as jnp
from jax.experimental import pallas as pl
from jax.experimental.pallas import tpu as pltpu


def _round_up(x, m):
    return ((x + m - 1) // m) * m


def _make_nerf_kernel(num_hidden, out_features, op_store, compute_dtype):
    """Fused positional-encoding + MLP kernel for a fixed depth.

    refs order: x, rep2, phase, w1, b1, (w_i, b_i) * num_hidden, wo, bo, out
    """

    def kernel(*refs):
        x_ref, rep_ref, ph_ref, w1_ref, b1_ref = refs[:5]
        idx = 5
        hidden = []
        for _ in range(num_hidden):
            hidden.append((refs[idx], refs[idx + 1]))
            idx += 2
        wo_ref, bo_ref = refs[idx], refs[idx + 1]
        out_ref = refs[idx + 2]

        # Positional encoding (f32 for accuracy):
        #   xp2 = x @ [rep | rep] + [0 | pi/2]   so   sin(xp2) == [sin(xp) | cos(xp)]
        xp = jnp.dot(x_ref[...], rep_ref[...],
                     preferred_element_type=jnp.float32) + ph_ref[...]
        s = jnp.sin(xp).astype(compute_dtype)                    # (TM, 2*F*C)

        # First layer (unsplit W1) + ReLU; carry activations in bf16.
        h = jnp.dot(s, w1_ref[...],
                    preferred_element_type=jnp.float32) + b1_ref[...]
        h = jnp.maximum(h, 0.0).astype(compute_dtype)

        # Hidden layers (bf16 activations, f32 accumulation).
        for w_ref, b_ref in hidden:
            a = jnp.dot(h, w_ref[...],
                        preferred_element_type=jnp.float32) + b_ref[...]
            h = jnp.maximum(a, 0.0).astype(compute_dtype)

        # Output layer, zero-padded to 128 lanes (MXU pads to 128 anyway).
        out = jnp.dot(h, wo_ref[...],
                      preferred_element_type=jnp.float32) + bo_ref[...]   # (TM, 128)

        # Lane-dense store: tile-aligned (TM,128)->(128,TM) transpose, keep the
        # first op_store rows, then sigmoid (rgb rows) / softplus (sigma row).
        out_t = jnp.transpose(out)[:op_store, :]                  # (op_store, TM)
        row = jax.lax.broadcasted_iota(jnp.int32, out_t.shape, 0)
        is_sigma = row == (out_features - 1)
        # softplus matching torch.nn.functional.softplus (beta=1, threshold=20)
        sp = jnp.where(out_t > 20.0, out_t,
                       jnp.log1p(jnp.exp(jnp.minimum(out_t, 20.0))))
        out_ref[...] = jnp.where(is_sigma, sp, jax.nn.sigmoid(out_t))

    return kernel


def simple_nerf_forward(x, params, freqs, *, tile_m=2048,
                        compute_dtype=jnp.bfloat16):
    """
    x:      (num_rays, num_samples, in_features) float32
    params: {'layers': [(W, b), ...]} with W in (in, out) layout
    freqs:  (num_freqs,) float32
    Returns (rgb, sigma): (R, S, out_features-1), (R, S)
    """
    num_rays, num_samples, in_feat = x.shape
    n = num_rays * num_samples
    num_freqs = int(freqs.shape[0])
    fc = num_freqs * in_feat

    layers = params["layers"]
    w1, b1 = layers[0]
    hidden = layers[1:-1]
    wo, bo = layers[-1]
    out_features = int(wo.shape[1])
    assert w1.shape[0] == 2 * fc

    # --- tiling: tiles are multiples of 128 rows (output is stored transposed
    # so rows land on lanes); force >= 2 grid steps when the data allows it so
    # both v7x TensorCores get work; pad N up to a tile multiple.
    n128 = _round_up(max(n, 1), 128)
    tile_m = min(_round_up(max(int(tile_m), 128), 128), n128)
    if n128 // tile_m < 2 and n128 >= 256:
        tile_m = _round_up(n128 // 2, 128)
    n_pad = _round_up(n, tile_m)
    grid = n_pad // tile_m
    # TODO(synk): a remainder-tile path would avoid running the MLP on up to
    # tile_m-1 zero-padded rows when tile_m does not divide N.

    x_flat = x.reshape(n, in_feat).astype(jnp.float32)
    if n_pad != n:
        x_flat = jnp.pad(x_flat, ((0, n_pad - n), (0, 0)))

    # Replication matrix rep[c, f*C + c] = freqs[f] (torch layout: freq-major,
    # channel-minor); doubled + phase row so sin(x @ rep2 + phase) = [sin|cos].
    col = jnp.arange(fc)
    rep = ((jnp.arange(in_feat)[:, None] == (col % in_feat)[None, :])
           .astype(jnp.float32) * freqs[col // in_feat][None, :])
    rep2 = jnp.concatenate([rep, rep], axis=1)                        # (C, 2FC)
    phase = jnp.concatenate(
        [jnp.zeros((1, fc), jnp.float32),
         jnp.full((1, fc), jnp.pi / 2, jnp.float32)], axis=1)         # (1, 2FC)

    cd = compute_dtype

    # Output-layer weights zero-padded to 128 lanes: keeps the in-kernel
    # transpose fully tile-aligned; MXU pads output lanes to 128 anyway.
    op_pad = _round_up(max(out_features, 1), 128)
    op_store = _round_up(out_features, 8)
    wo_pad = jnp.zeros((wo.shape[0], op_pad), jnp.float32)
    wo_pad = wo_pad.at[:, :out_features].set(wo.astype(jnp.float32))
    bo_pad = jnp.zeros((1, op_pad), jnp.float32)
    bo_pad = bo_pad.at[:, :out_features].set(bo.reshape(1, -1).astype(jnp.float32))

    inputs = [x_flat, rep2, phase, w1.astype(cd),
              b1.reshape(1, -1).astype(jnp.float32)]
    for w, b in hidden:
        inputs += [w.astype(cd), b.reshape(1, -1).astype(jnp.float32)]
    inputs += [wo_pad.astype(cd), bo_pad]

    def const_spec(a):
        return pl.BlockSpec(a.shape, lambda i: (0, 0))

    in_specs = [pl.BlockSpec((tile_m, in_feat), lambda i: (i, 0))]
    in_specs += [const_spec(a) for a in inputs[1:]]
    out_specs = pl.BlockSpec((op_store, tile_m), lambda i: (0, i))

    kernel = _make_nerf_kernel(len(hidden), out_features, op_store, cd)
    out_t = pl.pallas_call(
        kernel,
        grid=(grid,),
        in_specs=in_specs,
        out_specs=out_specs,
        out_shape=jax.ShapeDtypeStruct((op_store, n_pad), jnp.float32),
        compiler_params=pltpu.CompilerParams(
            dimension_semantics=("parallel",),
            vmem_limit_bytes=48 * 1024 * 1024,
        ),
    )(*inputs)

    rgb = out_t[: out_features - 1, :n].T.reshape(
        num_rays, num_samples, out_features - 1)
    sigma = out_t[out_features - 1, :n].reshape(num_rays, num_samples)
    return rgb, sigma


def simple_nerf_reference(x, params, freqs, compute_dtype=jnp.bfloat16):
    """Pure-JAX reference mirroring the torch module (same bf16 dot casts)."""
    xp = (x[..., None, :] * freqs[:, None]).reshape(*x.shape[:-1], -1)
    h = jnp.concatenate([jnp.sin(xp), jnp.cos(xp)], axis=-1).astype(jnp.float32)
    layers = params["layers"]
    for i, (w, b) in enumerate(layers):
        h = jnp.dot(h.astype(compute_dtype), w.astype(compute_dtype),
                    preferred_element_type=jnp.float32) + b
        if i < len(layers) - 1:
            h = jnp.maximum(h, 0.0)
    rgb = jax.nn.sigmoid(h[..., :-1])
    sigma = jax.nn.softplus(h[..., -1])
    return rgb, sigma


def init_simple_nerf(key, in_features, max_freq, num_freqs, hidden_features,
                     hidden_layers, out_features):
    """Deterministic parameter init (PyTorch-style uniform fan-in bounds)."""
    enc_dim = 2 * num_freqs * in_features
    dims = [enc_dim] + [hidden_features] * hidden_layers + [out_features]
    layers = []
    for d_in, d_out in zip(dims[:-1], dims[1:]):
        key, wk, bk = jax.random.split(key, 3)
        bound = 1.0 / (d_in ** 0.5)
        w = jax.random.uniform(wk, (d_in, d_out), jnp.float32, -bound, bound)
        b = jax.random.uniform(bk, (d_out,), jnp.float32, -bound, bound)
        layers.append((w, b))
    freqs = (2.0 ** jnp.linspace(0.0, float(max_freq), num_freqs)).astype(
        jnp.float32
    )
    return {"layers": layers}, freqs


if __name__ == "__main__":
    in_features = 3
    max_freq = 3
    num_freqs = 4
    hidden_features = 32
    hidden_layers = 3
    out_features = 4            # rgb (3) + sigma (1)
    num_rays, num_samples = 8, 30   # N = 240 points (exercises pad + 2-step grid)

    key = jax.random.PRNGKey(0)
    pkey, xkey = jax.random.split(key)
    params, freqs = init_simple_nerf(
        pkey, in_features, max_freq, num_freqs,
        hidden_features, hidden_layers, out_features,
    )
    x = jax.random.normal(xkey, (num_rays, num_samples, in_features),
                          dtype=jnp.float32)

    # Small tile for the tiny demo (grid of 2); production default is 2048.
    rgb, sigma = simple_nerf_forward(x, params, freqs, tile_m=128)
    jax.block_until_ready((rgb, sigma))

    assert rgb.shape == (num_rays, num_samples, out_features - 1)
    assert sigma.shape == (num_rays, num_samples)

    rgb_ref, sigma_ref = simple_nerf_reference(x, params, freqs)
    assert bool(jnp.all(jnp.isfinite(rgb))) and bool(jnp.all(jnp.isfinite(sigma)))
    assert float(jnp.max(jnp.abs(rgb - rgb_ref))) < 5e-2
    assert float(jnp.max(jnp.abs(sigma - sigma_ref))) < 1e-1

    print("KERNEL_OK")
</pallas_src>

<mosaic_0001>
module attributes {stable_mosaic.version = 11 : i64} {
  func.func @kernel(%arg0: i32, %arg1: memref<128x3xf32, #tpu.memory_space<vmem>>, %arg2: memref<3x24xf32, #tpu.memory_space<vmem>>, %arg3: memref<1x24xf32, #tpu.memory_space<vmem>>, %arg4: memref<24x32xbf16, #tpu.memory_space<vmem>>, %arg5: memref<1x32xf32, #tpu.memory_space<vmem>>, %arg6: memref<32x32xbf16, #tpu.memory_space<vmem>>, %arg7: memref<1x32xf32, #tpu.memory_space<vmem>>, %arg8: memref<32x32xbf16, #tpu.memory_space<vmem>>, %arg9: memref<1x32xf32, #tpu.memory_space<vmem>>, %arg10: memref<32x128xbf16, #tpu.memory_space<vmem>>, %arg11: memref<1x128xf32, #tpu.memory_space<vmem>>, %arg12: memref<8x128xf32, #tpu.memory_space<vmem>>) attributes {dimension_semantics = [#tpu.dimension_semantics<parallel>], iteration_bounds = array<i64: 2>, scalar_prefetch = 0 : i64, scratch_operands = 0 : i64, tpu.core_type = #tpu.core_type<tc>, window_params = [{transform_indices = @transform_0, window_bounds = array<i64: 128, 3>}, {pipeline_mode = #tpu.pipeline_mode<synchronous>, transform_indices = @transform_1, window_bounds = array<i64: 3, 24>}, {pipeline_mode = #tpu.pipeline_mode<synchronous>, transform_indices = @transform_2, window_bounds = array<i64: 1, 24>}, {pipeline_mode = #tpu.pipeline_mode<synchronous>, transform_indices = @transform_3, window_bounds = array<i64: 24, 32>}, {pipeline_mode = #tpu.pipeline_mode<synchronous>, transform_indices = @transform_4, window_bounds = array<i64: 1, 32>}, {pipeline_mode = #tpu.pipeline_mode<synchronous>, transform_indices = @transform_5, window_bounds = array<i64: 32, 32>}, {pipeline_mode = #tpu.pipeline_mode<synchronous>, transform_indices = @transform_6, window_bounds = array<i64: 1, 32>}, {pipeline_mode = #tpu.pipeline_mode<synchronous>, transform_indices = @transform_7, window_bounds = array<i64: 32, 32>}, {pipeline_mode = #tpu.pipeline_mode<synchronous>, transform_indices = @transform_8, window_bounds = array<i64: 1, 32>}, {pipeline_mode = #tpu.pipeline_mode<synchronous>, transform_indices = @transform_9, window_bounds = array<i64: 32, 128>}, {pipeline_mode = #tpu.pipeline_mode<synchronous>, transform_indices = @transform_10, window_bounds = array<i64: 1, 128>}, {transform_indices = @transform_11, window_bounds = array<i64: 8, 128>}]} {
    %c0 = arith.constant 0 : index
    %c0_0 = arith.constant 0 : index
    %0 = vector.load %arg1[%c0, %c0_0] : memref<128x3xf32, #tpu.memory_space<vmem>>, vector<128x3xf32>
    %c0_1 = arith.constant 0 : index
    %c0_2 = arith.constant 0 : index
    %1 = vector.load %arg2[%c0_1, %c0_2] : memref<3x24xf32, #tpu.memory_space<vmem>>, vector<3x24xf32>
    %cst = arith.constant dense<0.000000e+00> : vector<128x24xf32>
    %2 = tpu.matmul %0, %1, %cst {dimension_numbers = #tpu.dot_dimension_numbers<[1], [0], [0], [1], [0, 0, 1, 1], [], []>} : vector<128x3xf32>, vector<3x24xf32>, vector<128x24xf32> -> vector<128x24xf32>
    %c0_3 = arith.constant 0 : index
    %c0_4 = arith.constant 0 : index
    %3 = vector.load %arg3[%c0_3, %c0_4] : memref<1x24xf32, #tpu.memory_space<vmem>>, vector<1x24xf32>
    %4 = vector.broadcast %3 : vector<1x24xf32> to vector<128x24xf32>
    %5 = arith.addf %2, %4 : vector<128x24xf32>
    %6 = math.sin %5 : vector<128x24xf32>
    %7 = arith.truncf %6 : vector<128x24xf32> to vector<128x24xbf16>
    %c0_5 = arith.constant 0 : index
    %c0_6 = arith.constant 0 : index
    %8 = vector.load %arg4[%c0_5, %c0_6] : memref<24x32xbf16, #tpu.memory_space<vmem>>, vector<24x32xbf16>
    %cst_7 = arith.constant dense<0.000000e+00> : vector<128x32xf32>
    %9 = tpu.matmul %7, %8, %cst_7 {dimension_numbers = #tpu.dot_dimension_numbers<[1], [0], [0], [1], [0, 0, 1, 1], [], []>} : vector<128x24xbf16>, vector<24x32xbf16>, vector<128x32xf32> -> vector<128x32xf32>
    %c0_8 = arith.constant 0 : index
    %c0_9 = arith.constant 0 : index
    %10 = vector.load %arg5[%c0_8, %c0_9] : memref<1x32xf32, #tpu.memory_space<vmem>>, vector<1x32xf32>
    %11 = vector.broadcast %10 : vector<1x32xf32> to vector<128x32xf32>
    %12 = arith.addf %9, %11 : vector<128x32xf32>
    %cst_10 = arith.constant 0.000000e+00 : f32
    %13 = vector.broadcast %cst_10 : f32 to vector<128x32xf32>
    %14 = arith.maximumf %12, %13 : vector<128x32xf32>
    %15 = arith.truncf %14 : vector<128x32xf32> to vector<128x32xbf16>
    %c0_11 = arith.constant 0 : index
    %c0_12 = arith.constant 0 : index
    %16 = vector.load %arg6[%c0_11, %c0_12] : memref<32x32xbf16, #tpu.memory_space<vmem>>, vector<32x32xbf16>
    %cst_13 = arith.constant dense<0.000000e+00> : vector<128x32xf32>
    %17 = tpu.matmul %15, %16, %cst_13 {dimension_numbers = #tpu.dot_dimension_numbers<[1], [0], [0], [1], [0, 0, 1, 1], [], []>} : vector<128x32xbf16>, vector<32x32xbf16>, vector<128x32xf32> -> vector<128x32xf32>
    %c0_14 = arith.constant 0 : index
    %c0_15 = arith.constant 0 : index
    %18 = vector.load %arg7[%c0_14, %c0_15] : memref<1x32xf32, #tpu.memory_space<vmem>>, vector<1x32xf32>
    %19 = vector.broadcast %18 : vector<1x32xf32> to vector<128x32xf32>
    %20 = arith.addf %17, %19 : vector<128x32xf32>
    %cst_16 = arith.constant 0.000000e+00 : f32
    %21 = vector.broadcast %cst_16 : f32 to vector<128x32xf32>
    %22 = arith.maximumf %20, %21 : vector<128x32xf32>
    %23 = arith.truncf %22 : vector<128x32xf32> to vector<128x32xbf16>
    %c0_17 = arith.constant 0 : index
    %c0_18 = arith.constant 0 : index
    %24 = vector.load %arg8[%c0_17, %c0_18] : memref<32x32xbf16, #tpu.memory_space<vmem>>, vector<32x32xbf16>
    %cst_19 = arith.constant dense<0.000000e+00> : vector<128x32xf32>
    %25 = tpu.matmul %23, %24, %cst_19 {dimension_numbers = #tpu.dot_dimension_numbers<[1], [0], [0], [1], [0, 0, 1, 1], [], []>} : vector<128x32xbf16>, vector<32x32xbf16>, vector<128x32xf32> -> vector<128x32xf32>
    %c0_20 = arith.constant 0 : index
    %c0_21 = arith.constant 0 : index
    %26 = vector.load %arg9[%c0_20, %c0_21] : memref<1x32xf32, #tpu.memory_space<vmem>>, vector<1x32xf32>
    %27 = vector.broadcast %26 : vector<1x32xf32> to vector<128x32xf32>
    %28 = arith.addf %25, %27 : vector<128x32xf32>
    %cst_22 = arith.constant 0.000000e+00 : f32
    %29 = vector.broadcast %cst_22 : f32 to vector<128x32xf32>
    %30 = arith.maximumf %28, %29 : vector<128x32xf32>
    %31 = arith.truncf %30 : vector<128x32xf32> to vector<128x32xbf16>
    %c0_23 = arith.constant 0 : index
    %c0_24 = arith.constant 0 : index
    %32 = vector.load %arg10[%c0_23, %c0_24] : memref<32x128xbf16, #tpu.memory_space<vmem>>, vector<32x128xbf16>
    %cst_25 = arith.constant dense<0.000000e+00> : vector<128x128xf32>
    %33 = tpu.matmul %31, %32, %cst_25 {dimension_numbers = #tpu.dot_dimension_numbers<[1], [0], [0], [1], [0, 0, 1, 1], [], []>} : vector<128x32xbf16>, vector<32x128xbf16>, vector<128x128xf32> -> vector<128x128xf32>
    %c0_26 = arith.constant 0 : index
    %c0_27 = arith.constant 0 : index
    %34 = vector.load %arg11[%c0_26, %c0_27] : memref<1x128xf32, #tpu.memory_space<vmem>>, vector<1x128xf32>
    %35 = vector.broadcast %34 : vector<1x128xf32> to vector<128x128xf32>
    %36 = arith.addf %33, %35 : vector<128x128xf32>
    %37 = tpu.transpose %36, [1, 0] : vector<128x128xf32> -> vector<128x128xf32>
    %38 = vector.extract_strided_slice %37 {offsets = [0, 0], sizes = [8, 128], strides = [1, 1]} : vector<128x128xf32> to vector<8x128xf32>
    %39 = tpu.iota {dimensions = array<i32: 0>} : vector<8x128xi32>
    %c3_i32 = arith.constant 3 : i32
    %40 = vector.broadcast %c3_i32 : i32 to vector<8x128xi32>
    %41 = arith.cmpi eq, %39, %40 : vector<8x128xi32>
    %cst_28 = arith.constant 2.000000e+01 : f32
    %42 = vector.broadcast %cst_28 : f32 to vector<8x128xf32>
    %43 = arith.cmpf ogt, %38, %42 : vector<8x128xf32>
    %cst_29 = arith.constant 2.000000e+01 : f32
    %44 = vector.broadcast %cst_29 : f32 to vector<8x128xf32>
    %45 = arith.minimumf %38, %44 : vector<8x128xf32>
    %46 = math.exp %45 : vector<8x128xf32>
    %47 = math.log1p %46 : vector<8x128xf32>
    %48 = arith.select %43, %38, %47 : vector<8x128xi1>, vector<8x128xf32>
    %49 = arith.negf %38 : vector<8x128xf32>
    %50 = math.exp %49 : vector<8x128xf32>
    %cst_30 = arith.constant 1.000000e+00 : f32
    %51 = vector.broadcast %cst_30 : f32 to vector<8x128xf32>
    %52 = arith.addf %51, %50 : vector<8x128xf32>
    %53 = arith.divf %51, %52 : vector<8x128xf32>
    %54 = arith.select %41, %48, %53 : vector<8x128xi1>, vector<8x128xf32>
    %c0_31 = arith.constant 0 : index
    %c0_32 = arith.constant 0 : index
    %55 = vector.load %arg12[%c0_31, %c0_32] : memref<8x128xf32, #tpu.memory_space<vmem>>, vector<8x128xf32>
    tpu.vector_store %arg12[%c0_31, %c0_32], %54 {strides = array<i32>} : memref<8x128xf32, #tpu.memory_space<vmem>>, vector<8x128xf32>,
    return
  }
  func.func @transform_0(%arg0: i32) -> (i32, i32) {
    %c0_i32 = arith.constant 0 : i32
    %c0_i32_0 = arith.constant 0 : i32
    return %arg0, %c0_i32 : i32, i32
  }
  func.func @transform_1(%arg0: i32) -> (i32, i32) {
    %c0_i32 = arith.constant 0 : i32
    %c0_i32_0 = arith.constant 0 : i32
    %c0_i32_1 = arith.constant 0 : i32
    return %c0_i32, %c0_i32_0 : i32, i32
  }
  func.func @transform_2(%arg0: i32) -> (i32, i32) {
    %c0_i32 = arith.constant 0 : i32
    %c0_i32_0 = arith.constant 0 : i32
    %c0_i32_1 = arith.constant 0 : i32
    return %c0_i32, %c0_i32_0 : i32, i32
  }
  func.func @transform_3(%arg0: i32) -> (i32, i32) {
    %c0_i32 = arith.constant 0 : i32
    %c0_i32_0 = arith.constant 0 : i32
    %c0_i32_1 = arith.constant 0 : i32
    return %c0_i32, %c0_i32_0 : i32, i32
  }
  func.func @transform_4(%arg0: i32) -> (i32, i32) {
    %c0_i32 = arith.constant 0 : i32
    %c0_i32_0 = arith.constant 0 : i32
    %c0_i32_1 = arith.constant 0 : i32
    return %c0_i32, %c0_i32_0 : i32, i32
  }
  func.func @transform_5(%arg0: i32) -> (i32, i32) {
    %c0_i32 = arith.constant 0 : i32
    %c0_i32_0 = arith.constant 0 : i32
    %c0_i32_1 = arith.constant 0 : i32
    return %c0_i32, %c0_i32_0 : i32, i32
  }
  func.func @transform_6(%arg0: i32) -> (i32, i32) {
    %c0_i32 = arith.constant 0 : i32
    %c0_i32_0 = arith.constant 0 : i32
    %c0_i32_1 = arith.constant 0 : i32
    return %c0_i32, %c0_i32_0 : i32, i32
  }
  func.func @transform_7(%arg0: i32) -> (i32, i32) {
    %c0_i32 = arith.constant 0 : i32
    %c0_i32_0 = arith.constant 0 : i32
    %c0_i32_1 = arith.constant 0 : i32
    return %c0_i32, %c0_i32_0 : i32, i32
  }
  func.func @transform_8(%arg0: i32) -> (i32, i32) {
    %c0_i32 = arith.constant 0 : i32
    %c0_i32_0 = arith.constant 0 : i32
    %c0_i32_1 = arith.constant 0 : i32
    return %c0_i32, %c0_i32_0 : i32, i32
  }
  func.func @transform_9(%arg0: i32) -> (i32, i32) {
    %c0_i32 = arith.constant 0 : i32
    %c0_i32_0 = arith.constant 0 : i32
    %c0_i32_1 = arith.constant 0 : i32
    return %c0_i32, %c0_i32_0 : i32, i32
  }
  func.func @transform_10(%arg0: i32) -> (i32, i32) {
    %c0_i32 = arith.constant 0 : i32
    %c0_i32_0 = arith.constant 0 : i32
    %c0_i32_1 = arith.constant 0 : i32
    return %c0_i32, %c0_i32_0 : i32, i32
  }
  func.func @transform_11(%arg0: i32) -> (i32, i32) {
    %c0_i32 = arith.constant 0 : i32
    %c0_i32_0 = arith.constant 0 : i32
    return %c0_i32, %arg0 : i32, i32
  }
}

</mosaic_0001>

<bundles_post_ra>
// kernel: tpu_custom_call.1
= control target key start
LH: loop header
LB: loop body
LE: loop exit
PB: predicated region body
PF: predicated region fallthrough
CT: control target
= control target key end

     0   :  { %s5432_s0 = inlined_call_operand.vmem [shape: f32[256,3], index: 0, kind: input, shape index: {}]   ;;  %s5433_s1 = inlined_call_operand.vmem [shape: f32[3,24], index: 1, kind: input, shape index: {}]   ;;  %s5434_s2 = inlined_call_operand.vmem [shape: f32[1,24], index: 2, kind: input, shape index: {}]   ;;  %s5435_s3 = inlined_call_operand.vmem [shape: bf16[24,32], index: 3, kind: input, shape index: {}]   ;;  %s5436_s4 = inlined_call_operand.vmem [shape: f32[1,32], index: 4, kind: input, shape index: {}]   ;;  %s5437_s5 = inlined_call_operand.vmem [shape: bf16[32,32], index: 5, kind: input, shape index: {}]   ;;  %s5438_s6 = inlined_call_operand.vmem [shape: f32[1,32], index: 6, kind: input, shape index: {}]   ;;  %s5439_s7 = inlined_call_operand.vmem [shape: bf16[32,32], index: 7, kind: input, shape index: {}]   ;;  %s5440_s8 = inlined_call_operand.vmem [shape: f32[1,32], index: 8, kind: input, shape index: {}]   ;;  %s5441_s9 = inlined_call_operand.vmem [shape: bf16[32,128], index: 9, kind: input, shape index: {}]   ;;  %s5442_s10 = inlined_call_operand.vmem [shape: f32[1,128], index: 10, kind: input, shape index: {}]   ;;  %s5443_s11 = inlined_call_operand.hbm [shape: f32[8,256], index: 11, kind: output, shape index: {}]  }
   0x1   :  { %5487 = sst [smem:[#allocation28_spill]] %s5432_s0 }
   0x2   :  { %16 = vsyncpa [#allocation3], 0 }
   0x3   :  { %18 = vsyncpa [#allocation3 + $0x1], 0  ;;  %s3688_s17 = smov 0   ;;  %s3690_s18 = smov 0  }
   0x4   :  { %s3692_s19 = smov 0   ;;  %s3694_s20 = smov 0  }
   0x5 LB: > { %s3709_s21 = sadd.s32 4294967295, %s3619_s20   ;;  %s3062_s22 = sadd.s32 4294967294, %s3619_s20   ;;  %s3619_s20 = sphi %s3694_s20, %s5599_s20   ;;  %s3615_s19 = sphi %s3692_s19, %s5598_s19   ;;  %s3611_s18 = sphi %s3690_s18, %s5597_s18   ;;  %s3607_s17 = sphi %s3688_s17, %s5596_s17  }
   0x6   : > { %s3713_s23 = sadd.s32 1, %s3619_s20   ;;  %s267_s24 = sadd.s32 1, %s3615_s19 }
   0x7   : > { %s264_s25 = ssub.s32 %s3619_s20, %s3713_s23  ;;  %p277_p0 = scmp.ne.s32.totalorder %s3615_s19, %s3611_s18 }
   0x8   : > { %p265_p1 = scmp.eq.s32.totalorder %s264_s25, 0  ;;  %p278_p2 = scmp.eq.s32.totalorder %s3709_s21, 1 }
   0x9   : > { %p283_p3 = scmp.ne.s32.totalorder %s3611_s18, %s3607_s17  ;;  %p284_p4 = scmp.eq.s32.totalorder %s3062_s22, 1 }
   0xa   : > { %s3724_s26 = scalar_select %p265_p1, %s3615_s19, %s267_s24  }
   0xb   : > { %p3726_p5 = por %p278_p2, %p277_p0  ;;  %p3730_p6 = por %p284_p4, %p283_p3 }
   0xc   : > { %p3065_p7 = scmp.ge.s32.totalorder %s3619_s20, 1  ;;  %p341_p8 = scmp.lt.s32.totalorder %s3619_s20, 3 }
   0xe   : > { %p342_p9 = pnand %p3065_p7, %p341_p8 }
  0x10   : > { %345 = sbr.rel (%p342_p9) target bundleno = 1678 (0x68e), region = 64 }
  0x17   : > { %v404_v0 = vld [vmem:[%s5433_s1] sm:$0x7]  ;;  %vm461_vm0 = vcmask 1042432   ;;  %s3067_s12 = sshll.u32 %s3709_s21, 4  ;;  %vm412_vm1 = vcmask 23552   ;;  %s5490_s0 = sld [smem:[#allocation28_spill]] }
  0x18   : > { %3257 = vmatprep.subr.msk.mxu0 %vm461_vm0, %v404_v0  ;;  %3363 = vmatprep.subr.msk.mxu1 %vm461_vm0, %v404_v0  ;;  %p382_p10 = scmp.lt.s32.totalorder %s3067_s12, 31  ;;  %v3762_v17 = vld [vmem:[%s5434_s2] ss:$0 sm:$0xff]  ;;  %v5458_v57 = vmov 683565275   ;;  %s378_s22 = sand.u32 1, %s3611_s18  }
  0x19   : > { %3258 = vmatpush3.msk.msra.mxu0 %vm461_vm0, %v404_v0  ;;  %3364 = vmatpush3.msk.msra.mxu1 %vm461_vm0, %v404_v0  ;;  %v5456_v59 = vmov 2475754826   ;;  %v5454_v62 = vmov 2131351028   ;;  %v5452_v0 = vmov 2102212464  }
  0x1a   : > { %s5601_s12 = smov (!%p382_p10, %s3067_s12), 31  ;;  %s3066_s24 = sshll.u32 %s378_s22, 3 }
  0x1b   : > { %s3068_s13 = sshll.u32 %s5601_s12, 3  ;;  %s3197_s25 = sshll.u32 %s3709_s21, 7 }
  0x1c   : > { %s380_s29 = scalar_lea.vmem [#allocation2], %s3066_s24  ;;  %s5390_s14 = scalar_lea.hbm %s5443_s11, %s3197_s25 }
  0x1d   : > { %s385_s16 = scalar_lea.vmem %s5490_s0, %s3068_s13  ;;  %s3003_s30 = sshll.u32 %s380_s29, 4  ;;  %s5392_s30 = int_to_ptr.vmem [resolvable:$true] %s3003_s30 }
  0x1e   : > { %v388_v1 = vld [vmem:[%s385_s16] sm:$0xff]  ;;  %v389_v3 = vld [vmem:[%s385_s16 + $0x8] sm:$0xff]  ;;  %v390_v5 = vld [vmem:[%s385_s16 + $0x10] sm:$0xff]  ;;  %s2990_s21 = scalar_lea.sflag [#allocation3], %s378_s22  ;;  %s3557_s15 = scalar_lea.vmem %s5392_s30, 128 }
  0x1f   : > { %v396_v2 = vld [vmem:[%s385_s16 + $0x40] sm:$0xff]  ;;  %3259 = vmatprep.mubr.msk.f32.mxu0 %vm412_vm1, %v388_v1  ;;  %v397_v4 = vld [vmem:[%s385_s16 + $0x48] sm:$0xff]  ;;  %v398_v6 = vld [vmem:[%s385_s16 + $0x50] sm:$0xff]  ;;  %p3558_p11 = scmp.ne.s32.totalorder %s5392_s30, %s3557_s15 }
  0x20   : > { %3271 = vmatprep.mubr.msk.f32.mxu1 %vm412_vm1, %v396_v2  ;;  %3260 = vmatmul.mubr.msk.f32.vlgmr.msra.gmra.mrb[0].mxu0 %vm412_vm1, %v389_v3  ;;  %v391_v7 = vld [vmem:[%s385_s16 + $0x18] sm:$0xff]  ;;  %v392_v9 = vld [vmem:[%s385_s16 + $0x20] sm:$0xff]  ;;  %v393_v11 = vld [vmem:[%s385_s16 + $0x28] sm:$0xff]  ;;  %v5449_v2 = vmov 920167782  }
  0x21   : > { %3272 = vmatmul.mubr.msk.f32.vlgmr.msra.gmra.mrb[0].mxu1 %vm412_vm1, %v397_v4  ;;  %3262 = vmatprep.mubr.msk.f32.mxu0 %vm412_vm1, %v390_v5  ;;  %v399_v8 = vld [vmem:[%s385_s16 + $0x58] sm:$0xff]  ;;  %v400_v10 = vld [vmem:[%s385_s16 + $0x60] sm:$0xff]  ;;  %v401_v12 = vld [vmem:[%s385_s16 + $0x68] sm:$0xff]  ;;  %p3559_p12 = pnand %p3558_p11, %p3726_p5 }
  0x22   : > { %3274 = vmatprep.mubr.msk.f32.mxu1 %vm412_vm1, %v398_v6  ;;  %v394_v13 = vld [vmem:[%s385_s16 + $0x30] sm:$0xff]  ;;  %v395_v15 = vld [vmem:[%s385_s16 + $0x38] sm:$0xff] }
  0x23   : > { %v402_v14 = vld [vmem:[%s385_s16 + $0x70] sm:$0xff]  ;;  %v403_v16 = vld [vmem:[%s385_s16 + $0x78] sm:$0xff]  ;;  %p3560_p13 = pneg %p3559_p12  ;;  %s3627_s16 = smov [#allocation2]  }
  0x24   : > { %3263 = vmatmul.mubr.msk.f32.gmra.mrb[2].mxu0 %vm412_vm1, %v391_v7  ;;  %s3561_s24 = sshll.u32 %s3627_s16, 4  ;;  %s3562_s24 = int_to_ptr.vmem [resolvable:$false] %s3561_s24 }
  0x25   : > { %3275 = vmatmul.mubr.msk.f32.gmra.mrb[2].mxu1 %vm412_vm1, %v399_v8  ;;  %3265 = vmatprep.mubr.msk.f32.mxu0 %vm412_vm1, %v392_v9  ;;  %v5447_v9 = vmov 1326507024   ;;  %s3563_s0 = scalar_lea.vmem %s3562_s24, 256  ;;  %p3564_p0 = scmp.lt.s32.totalorder %s5392_s30, %s3562_s24 }
  0x26   : > { %3277 = vmatprep.mubr.msk.f32.mxu1 %vm412_vm1, %v400_v10  ;;  %p3565_p1 = scmp.lt.s32.totalorder %s3563_s0, %s3557_s15 }
  0x28   : > { %3266 = vmatmul.mubr.msk.f32.gmra.mrb[4].mxu0 %vm412_vm1, %v393_v11  ;;  %p3566_p2 = por %p3565_p1, %p3564_p0 }
  0x29   : > { %3278 = vmatmul.mubr.msk.f32.gmra.mrb[4].mxu1 %vm412_vm1, %v401_v12  ;;  %3268 = vmatprep.mubr.msk.f32.mxu0 %vm412_vm1, %v394_v13 }
  0x2a   : > { %3280 = vmatprep.mubr.msk.f32.mxu1 %vm412_vm1, %v402_v14  ;;  %p3567_p3 = pnand %p3566_p2, %p3560_p13 }
  0x2c   : > { %3269 = vmatmul.mubr.msk.f32.gmra.mrb[6].mxu0 %vm412_vm1, %v395_v15 }
  0x2d   : > { %3281 = vmatmul.mubr.msk.f32.gmra.mrb[6].mxu1 %vm412_vm1, %v403_v16 }
  0xf3   : > { %v3261_v18 = vpop.f32.mrb[0].mxu0 }
  0xf4   : > { %v3273_v19 = vpop.f32.mrb[0].mxu1  ;;  %v3765_v20 = vadd.f32 %v3261_v18, %v3762_v17  ;;  %v531_v22 = vpop.f32.mrb[1].mxu0 }
  0xf5   : > { %v3768_v21 = vadd.f32 %v3273_v19, %v3762_v17  ;;  %v571_v23 = vpop.f32.mrb[1].mxu1  ;;  %v3771_v24 = vadd.f32 %v3762_v17, %v531_v22 }
  0xf6   : > { %v714_v25 = vand.u32 2147483647, %v3765_v20  ;;  %v717_v26 = vand.u32 2139095040, %v3765_v20  ;;  %v3791_v48 = vadd.f32 %v3762_v17, %v571_v23 }
  0xf7   : > { %5491 = vst [vmem:[#allocation5_spill] sm:$0xff] %v3768_v21  ;;  %v1546_v27 = vand.u32 2147483647, %v3768_v21  ;;  %v1549_v28 = vand.u32 2139095040, %v3768_v21  ;;  %v3777_v29 = vpop.f32.mrb[2].mxu0  ;;  %v613_v31 = vand.u32 2139095040, %v3771_v24 }
  0xf8   : > { %v718_v30 = vshrl.u32 %v717_v26, 23  ;;  %v721_v32 = vand.u32 8388607, %v714_v25  ;;  %v3784_v37 = vpop.f32.mrb[2].mxu1  ;;  %v3786_v41 = vpop.f32.mrb[3].mxu0  ;;  %5492 = vst [vmem:[#allocation6_spill] sm:$0xff] %v3791_v48 }
  0xf9   : > { %v1550_v33 = vshrl.u32 %v1549_v28, 23  ;;  %v1553_v34 = vand.u32 8388607, %v1546_v27  ;;  %v614_v36 = vshrl.u32 %v613_v31, 23  ;;  %v3788_v42 = vpop.f32.mrb[3].mxu1 }
  0xfa   : > { %v3091_v35 = vadd.s32 4294967169, %v718_v30  ;;  %v722_v43 = vor.u32 8388608, %v721_v32 }
  0xfb   : > { %v3123_v38 = vadd.s32 4294967169, %v1550_v33  ;;  %v3087_v40 = vadd.s32 4294967169, %v614_v36  ;;  %v1554_v44 = vor.u32 8388608, %v1553_v34  ;;  %v3818_v33 = vpop.f32.mrb[4].mxu0 }
  0xfc   : > { %v724_v39 = vadd.s32 1, %v3091_v35  ;;  %v3793_v52 = vshll.u32 %v722_v43, 8 }
  0xfd   : > { %v1556_v45 = vadd.s32 1, %v3123_v38  ;;  %v620_v46 = vadd.s32 1, %v3087_v40  ;;  %v3797_v55 = vshll.u32 %v1554_v44, 8 }
  0xfe   : > { %vm725_vm2 = vcmp.gt.s32.totalorder %v724_v39, 0 }
  0xff   : > { %v726_v47 = vsel %vm725_vm2, %v724_v39, 0  ;;  %vm1557_vm3 = vcmp.gt.s32.totalorder %v1556_v45, 0  ;;  %vm621_vm4 = vcmp.gt.s32.totalorder %v620_v46, 0 }
 0x100   : > { %v727_v49 = vshrl.u32 %v726_v47, 5  ;;  %v728_v50 = vand.u32 31, %v726_v47  ;;  %v1558_v51 = vsel %vm1557_vm3, %v1556_v45, 0  ;;  %v3801_v61 = vsel %vm621_vm4, %v620_v46, 0 }
 0x101   : > { %v3795_v53 = vshrl.u32 %v1558_v51, 5  ;;  %v1560_v54 = vand.u32 31, %v1558_v51 }
 0x102   : > { %v729_v56 = vsub.s32 32, %v728_v50  ;;  %v731_v58 = vshll.u32 %v5458_v57, %v728_v50  ;;  %v734_v60 = vshll.u32 %v5456_v59, %v728_v50  ;;  %v737_v63 = vshll.u32 %v5454_v62, %v728_v50 }
 0x103   : > { %v740_v1 = vshll.u32 %v5452_v0, %v728_v50  ;;  %v743_v3 = vshll.u32 %v5449_v2, %v728_v50  ;;  %vm746_vm5 = vcmp.lt.s32.totalorder %v727_v49, 1  ;;  %vm747_vm6 = vcmp.lt.s32.totalorder %v727_v49, 2 }
 0x104   : > { %v732_v4 = vshrl.u32 %v5456_v59, %v729_v56  ;;  %v735_v5 = vshrl.u32 %v5454_v62, %v729_v56  ;;  %v738_v6 = vshrl.u32 %v5452_v0, %v729_v56  ;;  %v730_v7 = vshrl.u32 %v5458_v57, %v729_v56 }
 0x105   : > { %v741_v8 = vshrl.u32 %v5449_v2, %v729_v56  ;;  %v744_v10 = vshrl.u32 %v5447_v9, %v729_v56  ;;  %vm748_vm7 = vcmp.lt.s32.totalorder %v727_v49, 3  ;;  %v1561_v14 = vsub.s32 32, %v1560_v54 }
 0x106   : > { %v733_v11 = vor.u32 %v732_v4, %v731_v58  ;;  %v736_v12 = vor.u32 %v735_v5, %v734_v60  ;;  %v739_v13 = vor.u32 %v738_v6, %v737_v63  ;;  %vm749_vm8 = vcmp.lt.s32.totalorder %v727_v49, 4 }
 0x107   : > { %v742_v15 = vor.u32 %v741_v8, %v740_v1  ;;  %v745_v16 = vor.u32 %v744_v10, %v743_v3  ;;  %v1563_v18 = vshll.u32 %v5458_v57, %v1560_v54  ;;  %v1566_v32 = vshll.u32 %v5456_v59, %v1560_v54 }
 0x108   : > { %v750_v19 = vsel %vm746_vm5, %v730_v7, %v733_v11  ;;  %v751_v22 = vsel %vm749_vm8, %v739_v13, 2102212464  ;;  %v754_v23 = vsel %vm746_vm5, %v733_v11, %v736_v12  ;;  %v758_v26 = vsel %vm746_vm5, %v736_v12, %v739_v13 }
 0x109   : > { %v752_v28 = vsel %vm748_vm7, %v736_v12, %v751_v22  ;;  %v755_v30 = vsel %vm749_vm8, %v742_v15, 920167782  ;;  %v759_v31 = vsel %vm749_vm8, %v745_v16, 1326507024  ;;  %v1562_v36 = vshrl.u32 %v5458_v57, %v1561_v14 }
 0x10a   : > { %v756_v34 = vsel %vm748_vm7, %v739_v13, %v755_v30  ;;  %v760_v35 = vsel %vm748_vm7, %v742_v15, %v759_v31  ;;  %v1564_v38 = vshrl.u32 %v5456_v59, %v1561_v14  ;;  %v753_v39 = vsel %vm747_vm6, %v750_v19, %v752_v28 }
 0x10b   : > { %v757_v40 = vsel %vm747_vm6, %v754_v23, %v756_v34  ;;  %v761_v43 = vsel %vm747_vm6, %v758_v26, %v760_v35  ;;  %v1567_v44 = vshrl.u32 %v5454_v62, %v1561_v14  ;;  %v1569_v58 = vshll.u32 %v5454_v62, %v1560_v54 }
 0x10c   : > { %v3829_v45 = vmul.u32.u64.low %v3793_v52, %v761_v43  ;;  %v3830_v46 = vmul.u32.u64.high %v3793_v52, %v761_v43, %v3829_v45  ;;  %v3833_v47 = vmul.u32.u64.low %v3793_v52, %v757_v40  ;;  %v3834_v50 = vmul.u32.u64.high %v3793_v52, %v757_v40, %v3833_v47 }
 0x10d   : > { %v1565_v51 = vor.u32 %v1564_v38, %v1563_v18  ;;  %v1568_v56 = vor.u32 %v1567_v44, %v1566_v32  ;;  %v1570_v60 = vshrl.u32 %v5452_v0, %v1561_v14  ;;  %v1572_v49 = vshll.u32 %v5452_v0, %v1560_v54 }
 0x10e   : > { %v1573_v63 = vshrl.u32 %v5449_v2, %v1561_v14  ;;  %v1575_v1 = vshll.u32 %v5449_v2, %v1560_v54  ;;  %v1576_v3 = vshrl.u32 %v5447_v9, %v1561_v14  ;;  %v769_v4 = vmul.u32 %v3793_v52, %v753_v39 }
 0x10f   : > { %v1571_v5 = vor.u32 %v1570_v60, %v1569_v58  ;;  %vm1578_vm9 = vcmp.lt.s32.totalorder %v3795_v53, 1  ;;  %vm1579_vm10 = vcmp.lt.s32.totalorder %v3795_v53, 2  ;;  %vm771_vm11 = vc.u32 %v3830_v46, %v3833_v47 }
 0x110   : > { %v772_v6 = vadd.s32 1, %v3834_v50  ;;  %v1574_v7 = vor.u32 %v1573_v63, %v1572_v49  ;;  %vm1580_vm12 = vcmp.lt.s32.totalorder %v3795_v53, 3  ;;  %v1577_v8 = vor.u32 %v1576_v3, %v1575_v1 }
 0x111   : > { %vm1581_vm13 = vcmp.lt.s32.totalorder %v3795_v53, 4  ;;  %v1582_v54 = vsel %vm1578_vm9, %v1562_v36, %v1565_v51  ;;  %v1586_v10 = vsel %vm1578_vm9, %v1565_v51, %v1568_v56  ;;  %v1590_v13 = vsel %vm1578_vm9, %v1568_v56, %v1571_v5 }
 0x112   : > { %v773_v52 = vsel %vm771_vm11, %v772_v6, %v3834_v50  ;;  %v1583_v11 = vsel %vm1581_vm13, %v1571_v5, 2102212464  ;;  %v1587_v12 = vsel %vm1581_vm13, %v1574_v7, 920167782  ;;  %v1591_v18 = vsel %vm1581_vm13, %v1577_v8, 1326507024 }
 0x113   : > { %v774_v14 = vadd.s32 %v773_v52, %v769_v4  ;;  %v1584_v15 = vsel %vm1580_vm12, %v1568_v56, %v1583_v11  ;;  %v1588_v16 = vsel %vm1580_vm12, %v1571_v5, %v1587_v12  ;;  %v1592_v23 = vsel %vm1580_vm12, %v1574_v7, %v1591_v18  ;;  %v3896_v11 = vpop.f32.mrb[4].mxu1 }
 0x114   : > { %v1585_v19 = vsel %vm1579_vm10, %v1582_v54, %v1584_v15  ;;  %v1589_v22 = vsel %vm1579_vm10, %v1586_v10, %v1588_v16  ;;  %v610_v26 = vand.u32 2147483647, %v3771_v24  ;;  %v1593_v30 = vsel %vm1579_vm10, %v1590_v13, %v1592_v23 }
 0x115   : > { %v775_v28 = vadd.s32 536870912, %v774_v14  ;;  %v3860_v31 = vmul.u32.u64.low %v3797_v55, %v1589_v22  ;;  %v3861_v32 = vmul.u32.u64.high %v3797_v55, %v1589_v22, %v3860_v31  ;;  %v624_v36 = vand.u32 31, %v3801_v61 }
 0x116   : > { %v3865_v34 = vmul.u32.u64.low %v3797_v55, %v1593_v30  ;;  %v3866_v35 = vmul.u32.u64.high %v3797_v55, %v1593_v30, %v3865_v34  ;;  %v1445_v38 = vand.u32 2139095040, %v3791_v48  ;;  %v1601_v40 = vmul.u32 %v3797_v55, %v1585_v19 }
 0x117   : > { %v3870_v39 = vshrl.u32 %v775_v28, 30  ;;  %v625_v43 = vsub.s32 32, %v624_v36  ;;  %v1604_v44 = vadd.s32 1, %v3861_v32  ;;  %v617_v45 = vand.u32 8388607, %v610_v26 }
 0x118   : > { %vm1603_vm14 = vc.u32 %v3866_v35, %v3860_v31  ;;  %v3880_v50 = vshrl.u32 %v3801_v61, 5  ;;  %v630_v51 = vshll.u32 %v5456_v59, %v624_v36  ;;  %v1446_v56 = vshrl.u32 %v1445_v38, 23 }
 0x119   : > { %v777_v53 = vshll.u32 %v3870_v39, 30  ;;  %v1605_v55 = vsel %vm1603_vm14, %v1604_v44, %v3861_v32  ;;  %v628_v60 = vshrl.u32 %v5456_v59, %v625_v43  ;;  %v631_v49 = vshrl.u32 %v5454_v62, %v625_v43 }
 0x11a   : > { %v1606_v63 = vadd.s32 %v1605_v55, %v1601_v40  ;;  %v627_v1 = vshll.u32 %v5458_v57, %v624_v36  ;;  %v633_v3 = vshll.u32 %v5454_v62, %v624_v36  ;;  %v634_v4 = vshrl.u32 %v5452_v0, %v625_v43 }
 0x11b   : > { %v3883_v58 = vsub.s32 %v774_v14, %v777_v53  ;;  %v632_v5 = vor.u32 %v631_v49, %v630_v51  ;;  %v636_v6 = vshll.u32 %v5452_v0, %v624_v36  ;;  %v637_v7 = vshrl.u32 %v5449_v2, %v625_v43 }
 0x11c   : > { %v1607_v8 = vadd.s32 536870912, %v1606_v63  ;;  %v635_v54 = vor.u32 %v634_v4, %v633_v3  ;;  %v639_v10 = vshll.u32 %v5449_v2, %v624_v36  ;;  %v640_v52 = vshrl.u32 %v5447_v9, %v625_v43 }
 0x11d   : > { %v780_v61 = vsub.s32 0, %v3883_v58  ;;  %v629_v13 = vor.u32 %v628_v60, %v627_v1  ;;  %v638_v14 = vor.u32 %v637_v7, %v636_v6  ;;  %vm645_vm15 = vcmp.lt.s32.totalorder %v3880_v50, 4 }
 0x11e   : > { %v3899_v15 = vshrl.u32 %v1607_v8, 30  ;;  %v641_v16 = vor.u32 %v640_v52, %v639_v10  ;;  %vm642_vm0 = vcmp.lt.s32.totalorder %v3880_v50, 1  ;;  %v3119_v22 = vadd.s32 4294967169, %v1446_v56 }
 0x11f   : > { %v3092_v12 = vmin.u32 %v780_v61, %v3883_v58  ;;  %v651_v19 = vsel %vm645_vm15, %v638_v14, 920167782  ;;  %v618_v28 = vor.u32 8388608, %v617_v45  ;;  %vm644_vm1 = vcmp.lt.s32.totalorder %v3880_v50, 3 }
 0x120   : > { %v1609_v23 = vshll.u32 %v3899_v15, 30  ;;  %v654_v30 = vsel %vm642_vm0, %v632_v5, %v635_v54  ;;  %v650_v34 = vsel %vm642_vm0, %v629_v13, %v632_v5  ;;  %v652_v36 = vsel %vm644_vm1, %v635_v54, %v651_v19 }
 0x121   : > { %v782_v18 = vclz %v3092_v12  ;;  %v655_v38 = vsel %vm645_vm15, %v641_v16, 1326507024  ;;  %vm643_vm2 = vcmp.lt.s32.totalorder %v3880_v50, 2  ;;  %v647_v53 = vsel %vm645_vm15, %v635_v54, 2102212464 }
 0x122   : > { %v3911_v40 = vsub.s32 %v1606_v63, %v1609_v23  ;;  %v656_v44 = vsel %vm644_vm1, %v638_v14, %v655_v38  ;;  %v626_v45 = vshrl.u32 %v5458_v57, %v625_v43  ;;  %v1452_v56 = vadd.s32 1, %v3119_v22 }
 0x123   : > { %v3093_v32 = vadd.s32 4294967294, %v782_v18  ;;  %v657_v51 = vsel %vm643_vm2, %v654_v30, %v656_v44  ;;  %v653_v49 = vsel %vm643_vm2, %v650_v34, %v652_v36  ;;  %v658_v63 = vshll.u32 %v618_v28, 8 }
 0x124   : > { %v1612_v60 = vsub.s32 0, %v3911_v40  ;;  %v646_v1 = vsel %vm642_vm0, %v626_v45, %v629_v13  ;;  %v648_v3 = vsel %vm644_vm1, %v632_v5, %v647_v53  ;;  %vm1453_vm4 = vcmp.gt.s32.totalorder %v1452_v56, 0 }
 0x125   : > { %vm3094_vm3 = vcmp.lt.s32.totalorder %v3093_v32, 0  ;;  %v3927_v4 = vmul.u32.u64.low %v658_v63, %v657_v51  ;;  %v3928_v61 = vmul.u32.u64.high %v658_v63, %v657_v51, %v3927_v4  ;;  %v1454_v6 = vsel %vm1453_vm4, %v1452_v56, 0 }
 0x126   : > { %v785_v55 = vsel %vm3094_vm3, 0, %v3093_v32  ;;  %v3124_v43 = vmin.u32 %v1612_v60, %v3911_v40  ;;  %v3930_v8 = vmul.u32.u64.low %v658_v63, %v653_v49  ;;  %v3931_v54 = vmul.u32.u64.high %v658_v63, %v653_v49, %v3930_v8 }
 0x127   : > { %v790_v7 = vsub.s32 4294967266, %v785_v55  ;;  %v1456_v52 = vand.u32 31, %v1454_v6  ;;  %v649_v12 = vsel %vm643_vm2, %v646_v1, %v648_v3  ;;  %v5444_v5 = vand.u32 2147483647, %v3791_v48  ;;  %v3962_v3 = vpop.f32.mrb[5].mxu0 }
 0x128   : > { %v1614_v10 = vclz %v3124_v43  ;;  %vm667_vm5 = vc.u32 %v3928_v61, %v3930_v8  ;;  %v668_v16 = vadd.s32 1, %v3931_v54  ;;  %v665_v18 = vmul.u32 %v658_v63, %v649_v12 }
 0x129   : > { %v791_v14 = vadd.s32 127, %v790_v7  ;;  %v1457_v19 = vsub.s32 32, %v1456_v52  ;;  %v786_v22 = vsub.s32 32, %v785_v55  ;;  %v1449_v50 = vand.u32 8388607, %v5444_v5 }
 0x12a   : > { %v3125_v13 = vadd.s32 4294967294, %v1614_v10  ;;  %v669_v23 = vsel %vm667_vm5, %v668_v16, %v3931_v54  ;;  %v3945_v30 = vadd.f32 %v3777_v29, %v3762_v17  ;;  %v770_v32 = vadd.s32 %v3833_v47, %v3830_v46 }
 0x12b   : > { %v670_v28 = vadd.s32 %v669_v23, %v665_v18  ;;  %v792_v34 = vshll.u32 %v791_v14, 23  ;;  %v1459_v38 = vshll.u32 %v5458_v57, %v1456_v52  ;;  %v1460_v44 = vshrl.u32 %v5456_v59, %v1457_v19 }
 0x12c   : > { %vm3126_vm6 = vcmp.lt.s32.totalorder %v3125_v13, 0  ;;  %v1462_v45 = vshll.u32 %v5456_v59, %v1456_v52  ;;  %v1463_v51 = vshrl.u32 %v5454_v62, %v1457_v19  ;;  %v788_v56 = vshrl.u32 %v770_v32, %v786_v22 }
 0x12d   : > { %v3949_v36 = vsel %vm3126_vm6, 0, %v3125_v13  ;;  %v671_v53 = vadd.s32 536870912, %v670_v28  ;;  %v1455_v60 = vshrl.u32 %v1454_v6, 5  ;;  %v1468_v29 = vshll.u32 %v5452_v0, %v1456_v52 }
 0x12e   : > { %v1469_v49 = vshrl.u32 %v5449_v2, %v1457_v19  ;;  %v1622_v46 = vsub.s32 4294967266, %v3949_v36  ;;  %v1465_v63 = vshll.u32 %v5454_v62, %v1456_v52  ;;  %v1466_v1 = vshrl.u32 %v5452_v0, %v1457_v19 }
 0x12f   : > { %v3958_v47 = vshrl.u32 %v671_v53, 30  ;;  %v787_v43 = vshll.u32 %v3883_v58, %v785_v55  ;;  %v793_v4 = vor.u32 4788187, %v792_v34  ;;  %v1471_v7 = vshll.u32 %v5449_v2, %v1456_v52 }
 0x130   : > { %v1472_v6 = vshrl.u32 %v5447_v9, %v1457_v19  ;;  %v1450_v10 = vor.u32 8388608, %v1449_v50  ;;  %v1461_v12 = vor.u32 %v1460_v44, %v1459_v38  ;;  %v1464_v13 = vor.u32 %v1463_v51, %v1462_v45 }
 0x131   : > { %v673_v54 = vshll.u32 %v3958_v47, 30  ;;  %v789_v14 = vor.u32 %v788_v56, %v787_v43  ;;  %v1470_v16 = vor.u32 %v1469_v49, %v1468_v29  ;;  %vm1474_vm7 = vcmp.lt.s32.totalorder %v1455_v60, 1 }
 0x132   : > { %v925_v18 = vand.u32 2139095040, %v3945_v30  ;;  %v1623_v22 = vadd.s32 127, %v1622_v46  ;;  %v1458_v58 = vshrl.u32 %v5458_v57, %v1457_v19  ;;  %v1467_v55 = vor.u32 %v1466_v1, %v1465_v63 }
 0x133   : > { %v3969_v23 = vsub.s32 %v670_v28, %v673_v54  ;;  %v794_v32 = vand.u32 2147483647, %v793_v4  ;;  %v1473_v52 = vor.u32 %v1472_v6, %v1471_v7  ;;  %vm1476_vm8 = vcmp.lt.s32.totalorder %v1455_v60, 3 }
 0x134   : > { %vm1477_vm9 = vcmp.lt.s32.totalorder %v1455_v60, 4  ;;  %vm1475_vm10 = vcmp.lt.s32.totalorder %v1455_v60, 2  ;;  %v1482_v38 = vsel %vm1474_vm7, %v1461_v12, %v1464_v13  ;;  %v1602_v53 = vadd.s32 %v3860_v31, %v3866_v35 }
 0x135   : > { %v676_v34 = vsub.s32 0, %v3969_v23  ;;  %v1479_v50 = vsel %vm1477_vm9, %v1467_v55, 2102212464  ;;  %v1618_v28 = vsub.s32 32, %v3949_v36  ;;  %v1483_v44 = vsel %vm1477_vm9, %v1470_v16, 920167782 }
 0x136   : > { %v1490_v19 = vshll.u32 %v1450_v10, 8  ;;  %v796_v45 = vcvt.s32.f32 %v789_v14  ;;  %v1624_v51 = vshll.u32 %v1623_v22, 23  ;;  %v1484_v56 = vsel %vm1476_vm8, %v1467_v55, %v1483_v44 }
 0x137   : > { %v1486_v29 = vsel %vm1474_vm7, %v1464_v13, %v1467_v55  ;;  %v1478_v49 = vsel %vm1474_vm7, %v1458_v58, %v1461_v12  ;;  %v1480_v46 = vsel %vm1476_vm8, %v1464_v13, %v1479_v50  ;;  %v1485_v63 = vsel %vm1475_vm10, %v1482_v38, %v1484_v56 }
 0x138   : > { %v1487_v1 = vsel %vm1477_vm9, %v1473_v52, 1326507024  ;;  %v797_v31 = vmul.f32 %v796_v45, %v794_v32  ;;  %v3088_v35 = vmin.u32 %v676_v34, %v3969_v23  ;;  %v926_v4 = vshrl.u32 %v925_v18, 23 }
 0x139   : > { %v1488_v43 = vsel %vm1476_vm8, %v1470_v16, %v1487_v1  ;;  %v1620_v7 = vshrl.u32 %v1602_v53, %v1618_v28  ;;  %v3988_v54 = vmul.u32.u64.low %v1490_v19, %v1485_v63  ;;  %v3989_v10 = vmul.u32.u64.high %v1490_v19, %v1485_v63, %v3988_v54 }
 0x13a   : > { %v1489_v6 = vsel %vm1475_vm10, %v1486_v29, %v1488_v43  ;;  %v800_v12 = vsub.s32 4, %v3870_v39  ;;  %v1481_v13 = vsel %vm1475_vm10, %v1478_v49, %v1480_v46  ;;  %v1619_v58 = vshll.u32 %v3911_v40, %v3949_v36 }
 0x13b   : > { %v3994_v14 = vmul.u32.u64.low %v1490_v19, %v1489_v6  ;;  %v3995_v22 = vmul.u32.u64.high %v1490_v19, %v1489_v6, %v3994_v14  ;;  %v1625_v55 = vor.u32 4788187, %v1624_v51  ;;  %v3099_v16 = vadd.s32 4294967169, %v926_v4 }
 0x13c   : > { %vm716_vm11 = vcmp.lt.s32.totalorder %v3765_v20, 0  ;;  %v798_v18 = vxor.u32 2147483648, %v797_v31  ;;  %v678_v32 = vclz %v3088_v35  ;;  %v1621_v52 = vor.u32 %v1620_v7, %v1619_v58  ;;  %v4047_v58 = vpop.f32.mrb[5].mxu1 }
 0x13d   : > { %v1497_v34 = vmul.u32 %v1490_v19, %v1481_v13  ;;  %v1500_v50 = vadd.s32 1, %v3989_v10  ;;  %v932_v38 = vadd.s32 1, %v3099_v16  ;;  %v4002_v60 = vsel %vm716_vm11, %v800_v12, %v3870_v39 }
 0x13e   : > { %vm1548_vm12 = vcmp.lt.s32.totalorder %v3768_v21, 0  ;;  %v1632_v53 = vsub.s32 4, %v3899_v15  ;;  %v1626_v28 = vand.u32 2147483647, %v1625_v55  ;;  %vm1499_vm13 = vc.u32 %v3995_v22, %v3988_v54 }
 0x13f   : > { %v922_v40 = vand.u32 2147483647, %v3945_v30  ;;  %vm933_vm14 = vcmp.gt.s32.totalorder %v932_v38, 0  ;;  %v799_v36 = vsel %vm716_vm11, %v798_v18, %v797_v31  ;;  %v3089_v44 = vadd.s32 4294967294, %v678_v32 }
 0x140   : > { %v1501_v19 = vsel %vm1499_vm13, %v1500_v50, %v3989_v10  ;;  %v934_v45 = vsel %vm933_vm14, %v932_v38, 0  ;;  %vm4012_vm15 = vcmp.le.f32.partialorder %v714_v25, 0.7853982  ;;  %v1628_v51 = vcvt.s32.f32 %v1621_v52 }
 0x141   : > { %v1502_v56 = vadd.s32 %v1501_v19, %v1497_v34  ;;  %v936_v29 = vand.u32 31, %v934_v45  ;;  %v803_v49 = vsel %vm4012_vm15, 0, %v4002_v60  ;;  %v4022_v46 = vsel %vm1548_vm12, %v1632_v53, %v3899_v15 }
 0x142   : > { %v666_v63 = vadd.s32 %v3930_v8, %v3928_v61  ;;  %v4029_v25 = vsel %vm4012_vm15, %v3765_v20, %v799_v36  ;;  %v1629_v1 = vmul.f32 %v1628_v51, %v1626_v28  ;;  %vm3090_vm0 = vcmp.lt.s32.totalorder %v3089_v44, 0 }
 0x143   : > { %v1503_v31 = vadd.s32 536870912, %v1502_v56  ;;  %v937_v35 = vsub.s32 32, %v936_v29  ;;  %v929_v43 = vand.u32 8388607, %v922_v40  ;;  %v939_v4 = vshll.u32 %v5458_v57, %v936_v29 }
 0x144   : > { %v4036_v15 = vadd.f32 %v3784_v37, %v3762_v17  ;;  %v942_v8 = vshll.u32 %v5456_v59, %v936_v29  ;;  %v945_v10 = vshll.u32 %v5454_v62, %v936_v29  ;;  %v948_v13 = vshll.u32 %v5452_v0, %v936_v29 }
 0x145   : > { %v4038_v7 = vshrl.u32 %v1503_v31, 30  ;;  %v940_v61 = vshrl.u32 %v5456_v59, %v937_v35  ;;  %v943_v6 = vshrl.u32 %v5454_v62, %v937_v35  ;;  %v946_v12 = vshrl.u32 %v5452_v0, %v937_v35 }
 0x146   : > { %5495 = vst [vmem:[#allocation7_spill] sm:$0xff] %v4036_v15  ;;  %v949_v14 = vshrl.u32 %v5449_v2, %v937_v35  ;;  %v681_v37 = vsel %vm3090_vm0, 0, %v3089_v44  ;;  %v935_v16 = vshrl.u32 %v934_v45, 5  ;;  %v952_v50 = vshrl.u32 %v5447_v9, %v937_v35 }
 0x147   : > { %v1505_v55 = vshll.u32 %v4038_v7, 30  ;;  %v941_v18 = vor.u32 %v940_v61, %v939_v4  ;;  %v944_v32 = vor.u32 %v943_v6, %v942_v8  ;;  %v947_v52 = vor.u32 %v946_v12, %v945_v10 }
 0x148   : > { %v950_v34 = vor.u32 %v949_v14, %v948_v13  ;;  %v1630_v38 = vxor.u32 2147483648, %v1629_v1  ;;  %v696_v53 = vsub.s32 4, %v3958_v47  ;;  %v951_v36 = vshll.u32 %v5449_v2, %v936_v29 }
 0x149   : > { %v4052_v28 = vsub.s32 %v1502_v56, %v1505_v55  ;;  %vm4057_vm1 = vcmp.le.f32.partialorder %v1546_v27, 0.7853982  ;;  %v682_v19 = vsub.s32 32, %v681_v37  ;;  %v686_v45 = vsub.s32 4294967266, %v681_v37 }
 0x14a   : > { %v930_v51 = vor.u32 8388608, %v929_v43  ;;  %v1757_v31 = vand.u32 2139095040, %v4036_v15  ;;  %vm612_vm2 = vcmp.lt.s32.totalorder %v3771_v24, 0  ;;  %v953_v61 = vor.u32 %v952_v50, %v951_v36 }
 0x14b   : > { %v1508_v4 = vsub.s32 0, %v4052_v28  ;;  %vm954_vm3 = vcmp.lt.s32.totalorder %v935_v16, 1  ;;  %vm957_vm4 = vcmp.lt.s32.totalorder %v935_v16, 4  ;;  %vm956_vm5 = vcmp.lt.s32.totalorder %v935_v16, 3 }
 0x14c   : > { %v959_v56 = vsel %vm957_vm4, %v947_v52, 2102212464  ;;  %v962_v29 = vsel %vm954_vm3, %v941_v18, %v944_v32  ;;  %v963_v27 = vsel %vm957_vm4, %v950_v34, 920167782  ;;  %v938_v6 = vshrl.u32 %v5458_v57, %v937_v35 }
 0x14d   : > { %v3120_v8 = vmin.u32 %v1508_v4, %v4052_v28  ;;  %vm955_vm6 = vcmp.lt.s32.totalorder %v935_v16, 2  ;;  %v964_v43 = vsel %vm956_vm5, %v947_v52, %v963_v27  ;;  %v687_v10 = vadd.s32 127, %v686_v45 }
 0x14e   : > { %v965_v12 = vsel %vm955_vm6, %v962_v29, %v964_v43  ;;  %v966_v13 = vsel %vm954_vm3, %v944_v32, %v947_v52  ;;  %v970_v14 = vshll.u32 %v930_v51, 8  ;;  %v958_v50 = vsel %vm954_vm3, %v938_v6, %v941_v18 }
 0x14f   : > { %v1510_v55 = vclz %v3120_v8  ;;  %v960_v36 = vsel %vm956_vm5, %v944_v32, %v959_v56  ;;  %v967_v5 = vsel %vm957_vm4, %v953_v61, 1326507024  ;;  %vm4074_vm7 = vcmp.le.f32.partialorder %v610_v26, 0.7853982 }
 0x150   : > { %v968_v35 = vsel %vm956_vm5, %v950_v34, %v967_v5  ;;  %v4079_v27 = vmul.u32.u64.low %v970_v14, %v965_v12  ;;  %v4080_v45 = vmul.u32.u64.high %v970_v14, %v965_v12, %v4079_v27  ;;  %v1758_v52 = vshrl.u32 %v1757_v31, 23 }
 0x151   : > { %v1631_v18 = vsel %vm1548_vm12, %v1630_v38, %v1629_v1  ;;  %v684_v51 = vshrl.u32 %v666_v63, %v682_v19  ;;  %v3121_v32 = vadd.s32 4294967294, %v1510_v55  ;;  %v969_v61 = vsel %vm955_vm6, %v966_v13, %v968_v35 }
 0x152   : > { %v688_v56 = vshll.u32 %v687_v10, 23  ;;  %v4086_v29 = vmul.u32.u64.low %v970_v14, %v969_v61  ;;  %v4087_v26 = vmul.u32.u64.high %v970_v14, %v969_v61, %v4086_v29  ;;  %v3131_v8 = vadd.s32 4294967169, %v1758_v52 }
 0x153   : > { %v4093_v5 = vadd.s32 3, %v803_v49  ;;  %v1635_v34 = vsel %vm4057_vm1, 0, %v4022_v46  ;;  %v683_v63 = vshll.u32 %v3969_v23, %v681_v37  ;;  %v961_v1 = vsel %vm955_vm6, %v958_v50, %v960_v36 }
 0x154   : > { %3483 = vcosq.f32 %v4029_v25  ;;  %v4104_v38 = vsel %vm612_vm2, %v696_v53, %v3958_v47  ;;  %v980_v39 = vadd.s32 1, %v4080_v45  ;;  %v1764_v60 = vadd.s32 1, %v3131_v8 }
 0x155   : > { %v1634_v49 = vsel %vm4057_vm1, %v3768_v21, %v1631_v18  ;;  %v685_v19 = vor.u32 %v684_v51, %v683_v63  ;;  %vm3122_vm8 = vcmp.lt.s32.totalorder %v3121_v32, 0  ;;  %v5445_v23 = vand.u32 2147483647, %v4036_v15 }
 0x156   : > { %v689_v46 = vor.u32 4788187, %v688_v56  ;;  %v977_v37 = vmul.u32 %v970_v14, %v961_v1  ;;  %vm979_vm9 = vc.u32 %v4087_v26, %v4079_v27  ;;  %vm1765_vm10 = vcmp.gt.s32.totalorder %v1764_v60, 0 }
 0x157   : > { %3485 = vsinq.f32 %v4029_v25  ;;  %v981_v47 = vsel %vm979_vm9, %v980_v39, %v4080_v45  ;;  %v1766_v16 = vsel %vm1765_vm10, %v1764_v60, 0  ;;  %v4117_v53 = vadd.f32 %v3762_v17, %v3786_v41 }
 0x158   : > { %3487 = vcosq.f32 %v1634_v49  ;;  %v4119_v44 = vsel %vm3122_vm8, 0, %v3121_v32  ;;  %v982_v31 = vadd.s32 %v981_v47, %v977_v37  ;;  %v1768_v6 = vand.u32 31, %v1766_v16  ;;  %v4137_v32 = vpop.f32.mrb[6].mxu0 }
 0x159   : > { %3489 = vsinq.f32 %v1634_v49  ;;  %v4121_v43 = vadd.s32 3, %v1635_v34  ;;  %v692_v10 = vcvt.s32.f32 %v685_v19  ;;  %v690_v12 = vand.u32 2147483647, %v689_v46 }
 0x15a   : > { %v983_v13 = vadd.s32 536870912, %v982_v31  ;;  %v1761_v14 = vand.u32 8388607, %v5445_v23  ;;  %v1769_v41 = vsub.s32 32, %v1768_v6  ;;  %v1518_v55 = vsub.s32 4294967266, %v4119_v44 }
 0x15b   : > { %5500 = vst [vmem:[#allocation8_spill] sm:$0xff] %v4121_v43  ;;  %v1771_v50 = vshll.u32 %v5458_v57, %v1768_v6  ;;  %v1780_v36 = vshll.u32 %v5452_v0, %v1768_v6  ;;  %v821_v35 = vand.u32 2139095040, %v4117_v53  ;;  %v1774_v18 = vshll.u32 %v5456_v59, %v1768_v6 }
 0x15c   : > { %v4132_v45 = vshrl.u32 %v983_v13, 30  ;;  %v1772_v52 = vshrl.u32 %v5456_v59, %v1769_v41  ;;  %v1775_v51 = vshrl.u32 %v5454_v62, %v1769_v41  ;;  %v1767_v61 = vshrl.u32 %v1766_v16, 5 }
 0x15d   : > { %v1777_v56 = vshll.u32 %v5454_v62, %v1768_v6  ;;  %v1778_v29 = vshrl.u32 %v5452_v0, %v1769_v41  ;;  %v1781_v8 = vshrl.u32 %v5449_v2, %v1769_v41  ;;  %v4144_v63 = vmul.f32 %v692_v10, %v690_v12 }
 0x15e   : > { %v4142_v34 = vpop.eup %3483  ;;  %v1498_v1 = vadd.s32 %v3988_v54, %v3995_v22  ;;  %v985_v39 = vshll.u32 %v4132_v45, 30  ;;  %v4151_v60 = vadd.f32 %v3762_v17, %v3788_v42  ;;  %v1519_v49 = vadd.s32 127, %v1518_v55 }
 0x15f   : > { %v1782_v19 = vor.u32 %v1781_v8, %v1780_v36  ;;  %v1783_v46 = vshll.u32 %v5449_v2, %v1768_v6  ;;  %v1784_v37 = vshrl.u32 %v5447_v9, %v1769_v41  ;;  %v1762_v16 = vor.u32 8388608, %v1761_v14 }
 0x160   : > { %5501 = vst [vmem:[#allocation9_spill] sm:$0xff] %v4151_v60  ;;  %v4155_v47 = vsub.s32 %v982_v31, %v985_v39  ;;  %v1773_v10 = vor.u32 %v1772_v52, %v1771_v50  ;;  %v1776_v12 = vor.u32 %v1775_v51, %v1774_v18  ;;  %v1514_v54 = vsub.s32 32, %v4119_v44 }
 0x161   : > { %v4157_v13 = vpop.eup %3485  ;;  %v1779_v22 = vor.u32 %v1778_v29, %v1777_v56  ;;  %vm1786_vm11 = vcmp.lt.s32.totalorder %v1767_v61, 1  ;;  %v822_v23 = vshrl.u32 %v821_v35, 23  ;;  %v1770_v6 = vshrl.u32 %v5458_v57, %v1769_v41 }
 0x162   : > { %v4160_v17 = vpop.eup %3487  ;;  %v988_v42 = vsub.s32 0, %v4155_v47  ;;  %vm1788_vm12 = vcmp.lt.s32.totalorder %v1767_v61, 3  ;;  %vm1789_vm13 = vcmp.lt.s32.totalorder %v1767_v61, 4  ;;  %v1520_v14 = vshll.u32 %v1519_v49, 23 }
 0x163   : > { %5502 = vst [vmem:[#allocation10_spill] sm:$0xff] %v4160_v17  ;;  %v4164_v31 = vpop.eup %3489  ;;  %v1785_v55 = vor.u32 %v1784_v37, %v1783_v46  ;;  %v1791_v50 = vsel %vm1789_vm13, %v1779_v22, 2102212464  ;;  %v1795_v36 = vsel %vm1789_vm13, %v1782_v19, 920167782  ;;  %vm1444_vm14 = vcmp.lt.s32.totalorder %v3791_v48, 0 }
 0x164   : > { %5503 = vst [vmem:[#allocation11_spill] sm:$0xff] %v4164_v31  ;;  %v3100_v35 = vmin.u32 %v988_v42, %v4155_v47  ;;  %vm1787_vm15 = vcmp.lt.s32.totalorder %v1767_v61, 2  ;;  %v1794_v52 = vsel %vm1786_vm11, %v1773_v10, %v1776_v12  ;;  %v1802_v18 = vshll.u32 %v1762_v16, 8 }
 0x165   : > { %v1516_v51 = vshrl.u32 %v1498_v1, %v1514_v54  ;;  %v1796_v41 = vsel %vm1788_vm12, %v1779_v22, %v1795_v36  ;;  %v5446_v56 = vand.u32 2147483647, %v4117_v53  ;;  %v3095_v29 = vadd.s32 4294967169, %v822_v23 }
 0x166   : > { %v990_v8 = vclz %v3100_v35  ;;  %v1790_v39 = vsel %vm1786_vm11, %v1770_v6, %v1773_v10  ;;  %v1792_v49 = vsel %vm1788_vm12, %v1776_v12, %v1791_v50  ;;  %v1798_v46 = vsel %vm1786_vm11, %v1776_v12, %v1779_v22 }
 0x167   : > { %v1515_v37 = vshll.u32 %v4052_v28, %v4119_v44  ;;  %v1521_v42 = vor.u32 4788187, %v1520_v14  ;;  %v1797_v25 = vsel %vm1787_vm15, %v1794_v52, %v1796_v41  ;;  %v1799_v1 = vsel %vm1789_vm13, %v1785_v55, 1326507024 }
 0x168   : > { %vm924_vm0 = vcmp.lt.s32.totalorder %v3945_v30, 0  ;;  %v3101_v16 = vadd.s32 4294967294, %v990_v8  ;;  %v1800_v23 = vsel %vm1788_vm12, %v1782_v19, %v1799_v1  ;;  %v1528_v10 = vsub.s32 4, %v4038_v7 }
 0x169   : > { %v4182_v54 = vmul.u32.u64.low %v1802_v18, %v1797_v25  ;;  %v4183_v36 = vmul.u32.u64.high %v1802_v18, %v1797_v25, %v4182_v54  ;;  %v1793_v12 = vsel %vm1787_vm15, %v1790_v39, %v1792_v49  ;;  %v1801_v28 = vsel %vm1787_vm15, %v1798_v46, %v1800_v23 }
 0x16a   : > { %v828_v44 = vadd.s32 1, %v3095_v29  ;;  %v1517_v22 = vor.u32 %v1516_v51, %v1515_v37  ;;  %vm3102_vm1 = vcmp.lt.s32.totalorder %v3101_v16, 0  ;;  %v694_v55 = vxor.u32 2147483648, %v4144_v63 }
 0x16b   : > { %v4189_v6 = vmul.u32.u64.low %v1802_v18, %v1801_v28  ;;  %v4190_v14 = vmul.u32.u64.high %v1802_v18, %v1801_v28, %v4189_v6  ;;  %v993_v50 = vsel %vm3102_vm1, 0, %v3101_v16  ;;  %v825_v25 = vand.u32 8388607, %v5446_v56  ;;  %v4219_v28 = vpop.f32.mrb[6].mxu1 }
 0x16c   : > { %vm829_vm3 = vcmp.gt.s32.totalorder %v828_v44, 0  ;;  %v1522_v19 = vand.u32 2147483647, %v1521_v42  ;;  %v998_v35 = vsub.s32 4294967266, %v993_v50  ;;  %v1809_v52 = vmul.u32 %v1802_v18, %v1793_v12 }
 0x16d   : > { %v1812_v41 = vadd.s32 1, %v4183_v36  ;;  %v4199_v61 = vsel %vm1444_vm14, %v1528_v10, %v4038_v7  ;;  %v994_v51 = vsub.s32 32, %v993_v50  ;;  %v1008_v29 = vsub.s32 4, %v4132_v45  ;;  %v4330_v7 = vld [vmem:[%s5434_s2] ss:$0 sm:$0xff] }
 0x16e   : > { %v830_v8 = vsel %vm829_vm3, %v828_v44, 0  ;;  %v1524_v39 = vcvt.s32.f32 %v1517_v22  ;;  %v999_v49 = vadd.s32 127, %v998_v35  ;;  %vm1811_vm4 = vc.u32 %v4190_v14, %v4182_v54 }
 0x16f   : > { %v1653_v46 = vand.u32 2139095040, %v4151_v60  ;;  %v695_v18 = vsel %vm612_vm2, %v694_v55, %v4144_v63  ;;  %vm4210_vm5 = vcmp.le.f32.partialorder %v922_v40, 0.7853982  ;;  %v978_v37 = vadd.s32 %v4079_v27, %v4087_v26 }
 0x170   : > { %v1813_v42 = vsel %vm1811_vm4, %v1812_v41, %v4183_v36  ;;  %v832_v1 = vand.u32 31, %v830_v8  ;;  %v4217_v16 = vmul.f32 %v1524_v39, %v1522_v19  ;;  %v1000_v23 = vshll.u32 %v999_v49, 23 }
 0x171   : > { %v1814_v10 = vadd.s32 %v1813_v42, %v1809_v52  ;;  %v826_v12 = vor.u32 8388608, %v825_v25  ;;  %v995_v63 = vshll.u32 %v4155_v47, %v993_v50  ;;  %v996_v44 = vshrl.u32 %v978_v37, %v994_v51 }
 0x172   : > { %v4225_v40 = vsel %vm924_vm0, %v1008_v29, %v4132_v45  ;;  %v833_v22 = vsub.s32 32, %v832_v1  ;;  %v831_v26 = vshrl.u32 %v830_v8, 5  ;;  %v835_v36 = vshll.u32 %v5458_v57, %v832_v1 }
 0x173   : > { %v1815_v27 = vadd.s32 536870912, %v1814_v10  ;;  %v1654_v6 = vshrl.u32 %v1653_v46, 23  ;;  %v1001_v55 = vor.u32 4788187, %v1000_v23  ;;  %v838_v50 = vshll.u32 %v5456_v59, %v832_v1 }
 0x174   : > { %v836_v19 = vshrl.u32 %v5456_v59, %v833_v22  ;;  %v839_v25 = vshrl.u32 %v5454_v62, %v833_v22  ;;  %v842_v35 = vshrl.u32 %v5452_v0, %v833_v22  ;;  %v841_v45 = vshll.u32 %v5454_v62, %v832_v1 }
 0x175   : > { %v4231_v47 = vshrl.u32 %v1815_v27, 30  ;;  %v845_v52 = vshrl.u32 %v5449_v2, %v833_v22  ;;  %v997_v41 = vor.u32 %v996_v44, %v995_v63  ;;  %v844_v51 = vshll.u32 %v5452_v0, %v832_v1 }
 0x176   : > { %v847_v29 = vshll.u32 %v5449_v2, %v832_v1  ;;  %v848_v8 = vshrl.u32 %v5447_v9, %v833_v22  ;;  %v837_v49 = vor.u32 %v836_v19, %v835_v36  ;;  %v840_v46 = vor.u32 %v839_v25, %v838_v50 }
 0x177   : > { %v1817_v39 = vshll.u32 %v4231_v47, 30  ;;  %v843_v37 = vor.u32 %v842_v35, %v841_v45  ;;  %v698_v42 = vsel %vm4074_vm7, %v3771_v24, %v695_v18  ;;  %v5506_v23 = vand.u32 2147483647, %v3791_v48 }
 0x178   : > { %v1526_v63 = vxor.u32 2147483648, %v4217_v16  ;;  %v1002_v1 = vand.u32 2147483647, %v1001_v55  ;;  %v846_v44 = vor.u32 %v845_v52, %v844_v51  ;;  %v1011_v36 = vsel %vm4210_vm5, 0, %v4225_v40 }
 0x179   : > { %vm4245_vm2 = vcmp.le.f32.partialorder %v5506_v23, 0.7853982  ;;  %v4253_v19 = vsub.s32 %v1814_v10, %v1817_v39  ;;  %v849_v25 = vor.u32 %v848_v8, %v847_v29  ;;  %v866_v35 = vshll.u32 %v826_v12, 8 }
 0x17a   : > { %v1004_v50 = vcvt.s32.f32 %v997_v41  ;;  %vm850_vm6 = vcmp.lt.s32.totalorder %v831_v26, 1  ;;  %vm853_vm8 = vcmp.lt.s32.totalorder %v831_v26, 4  ;;  %v3127_v18 = vadd.s32 4294967169, %v1654_v6 }
 0x17b   : > { %v1820_v45 = vsub.s32 0, %v4253_v19  ;;  %v834_v23 = vshrl.u32 %v5458_v57, %v833_v22  ;;  %v855_v56 = vsel %vm853_vm8, %v843_v37, 2102212464  ;;  %v858_v55 = vsel %vm850_vm6, %v837_v49, %v840_v46 }
 0x17c   : > { %v1005_v52 = vmul.f32 %v1004_v50, %v1002_v1  ;;  %vm1756_vm9 = vcmp.lt.s32.totalorder %v4036_v15, 0  ;;  %vm852_vm10 = vcmp.lt.s32.totalorder %v831_v26, 3  ;;  %v859_v40 = vsel %vm853_vm8, %v846_v44, 920167782 }
 0x17d   : > { %v862_v10 = vsel %vm850_vm6, %v840_v46, %v843_v37  ;;  %v3132_v12 = vmin.u32 %v1820_v45, %v4253_v19  ;;  %vm851_vm11 = vcmp.lt.s32.totalorder %v831_v26, 2  ;;  %v860_v41 = vsel %vm852_vm10, %v843_v37, %v859_v40 }
 0x17e   : > { %v863_v51 = vsel %vm853_vm8, %v849_v25, 1326507024  ;;  %v854_v6 = vsel %vm850_vm6, %v834_v23, %v837_v49  ;;  %v856_v29 = vsel %vm852_vm10, %v840_v46, %v855_v56  ;;  %v861_v22 = vsel %vm851_vm11, %v858_v55, %v860_v41 }
 0x17f   : > { %v864_v8 = vsel %vm852_vm10, %v846_v44, %v863_v51  ;;  %v1822_v39 = vclz %v3132_v12  ;;  %v4264_v50 = vmul.u32.u64.low %v866_v35, %v861_v22  ;;  %v4265_v9 = vmul.u32.u64.high %v866_v35, %v861_v22, %v4264_v50 }
 0x180   : > { %v865_v1 = vsel %vm851_vm11, %v862_v10, %v864_v8  ;;  %v1527_v45 = vsel %vm1444_vm14, %v1526_v63, %v4217_v16  ;;  %v1660_v25 = vadd.s32 1, %v3127_v18  ;;  %v1531_v56 = vsel %vm4245_vm2, 0, %v4199_v61 }
 0x181   : > { %v4271_v2 = vmul.u32.u64.low %v866_v35, %v865_v1  ;;  %v4272_v37 = vmul.u32.u64.high %v866_v35, %v865_v1, %v4271_v2  ;;  %v3133_v49 = vadd.s32 4294967294, %v1822_v39  ;;  %v1840_v46 = vsub.s32 4, %v4231_v47  ;;  %v4321_v1 = vpop.f32.mrb[7].mxu0 }
 0x182   : > { %v857_v44 = vsel %vm851_vm11, %v854_v6, %v856_v29  ;;  %3491 = vcosq.f32 %v698_v42  ;;  %v1006_v23 = vxor.u32 2147483648, %v1005_v52  ;;  %v1015_v55 = vadd.s32 3, %v1011_v36 }
 0x183   : > { %vm1661_vm12 = vcmp.gt.s32.totalorder %v1660_v25, 0  ;;  %v1530_v16 = vsel %vm4245_vm2, %v3791_v48, %v1527_v45  ;;  %vm3134_vm13 = vcmp.lt.s32.totalorder %v3133_v49, 0  ;;  %v876_v2 = vadd.s32 1, %v4265_v9 }
 0x184   : > { %v1662_v63 = vsel %vm1661_vm12, %v1660_v25, 0  ;;  %v4283_v18 = vsel %vm3134_vm13, 0, %v3133_v49  ;;  %v873_v61 = vmul.u32 %v866_v35, %v857_v44  ;;  %vm875_vm14 = vc.u32 %v4272_v37, %v4264_v50 }
 0x185   : > { %v5451_v26 = vand.u32 2147483647, %v4151_v60  ;;  %3493 = vsinq.f32 %v698_v42  ;;  %v5509_v36 = vsel %vm4074_vm7, 0, %v4104_v38  ;;  %v1841_v27 = vsel %vm1756_vm9, %v1840_v46, %v4231_v47 }
 0x186   : > { %v4292_v40 = vadd.s32 3, %v5509_v36  ;;  %v877_v10 = vsel %vm875_vm14, %v876_v2, %v4265_v9  ;;  %v1007_v35 = vsel %vm924_vm0, %v1006_v23, %v1005_v52  ;;  %v1830_v12 = vsub.s32 4294967266, %v4283_v18 }
 0x187   : > { %v878_v41 = vadd.s32 %v877_v10, %v873_v61  ;;  %v1664_v51 = vand.u32 31, %v1662_v63  ;;  %3495 = vcosq.f32 %v1530_v16  ;;  %v4301_v42 = vadd.s32 3, %v1531_v56 }
 0x188   : > { %v4303_v4 = vand.u32 3, %v1015_v55  ;;  %v5511_v38 = vand.u32 2147483647, %v4036_v15  ;;  %3497 = vsinq.f32 %v1530_v16  ;;  %v1657_v47 = vand.u32 8388607, %v5451_v26 }
 0x189   : > { %5510 = vst [vmem:[#allocation12_spill] sm:$0xff] %v4301_v42  ;;  %v879_v9 = vadd.s32 536870912, %v878_v41  ;;  %v1665_v52 = vsub.s32 32, %v1664_v51  ;;  %v1010_v29 = vsel %vm4210_vm5, %v3945_v30, %v1007_v35  ;;  %v1826_v22 = vsub.s32 32, %v4283_v18 }
 0x18a   : > { %vm4307_vm7 = vcmp.le.f32.partialorder %v5511_v38, 0.7853982  ;;  %v4319_v39 = vshrl.u32 %v1662_v63, 5  ;;  %v1810_v45 = vadd.s32 %v4182_v54, %v4190_v14  ;;  %v1831_v25 = vadd.s32 127, %v1830_v12 }
 0x18b   : > { %v1843_v8 = vsel %vm4307_vm7, 0, %v1841_v27  ;;  %v4325_v56 = vshrl.u32 %v879_v9, 30  ;;  %v4334_v49 = vadd.f32 %v4330_v7, %v3818_v33  ;;  %v1667_v46 = vshll.u32 %v5458_v57, %v1664_v51 }
 0x18c   : > { %v1668_v44 = vshrl.u32 %v5456_v59, %v1665_v52  ;;  %v1670_v23 = vshll.u32 %v5456_v59, %v1664_v51  ;;  %v1671_v54 = vshrl.u32 %v5454_v62, %v1665_v52  ;;  %v4340_v14 = vpop.eup %3491  ;;  %3499 = vcosq.f32 %v1010_v29 }
 0x18d   : > { %5514 = vst [vmem:[#allocation13_spill] sm:$0xff] %v4334_v49  ;;  %v4342_v55 = vadd.s32 3, %v1843_v8  ;;  %v881_v16 = vshll.u32 %v4325_v56, 30  ;;  %v1658_v2 = vor.u32 8388608, %v1657_v47  ;;  %3501 = vsinq.f32 %v1010_v29 }
 0x18e   : > { %v1828_v63 = vshrl.u32 %v1810_v45, %v1826_v22  ;;  %v1673_v33 = vshll.u32 %v5454_v62, %v1664_v51  ;;  %vm1682_vm15 = vcmp.lt.s32.totalorder %v4319_v39, 1  ;;  %v1832_v61 = vshll.u32 %v1831_v25, 23 }
 0x18f   : > { %5515 = vst [vmem:[#allocation14_spill] sm:$0xff] %v4342_v55  ;;  %v4347_v36 = vsub.s32 %v878_v41, %v881_v16  ;;  %v1674_v27 = vshrl.u32 %v5452_v0, %v1665_v52  ;;  %v1676_v10 = vshll.u32 %v5452_v0, %v1664_v51  ;;  %v4351_v35 = vpop.eup %3493  ;;  %v1669_v12 = vor.u32 %v1668_v44, %v1667_v46 }
 0x190   : > { %v1672_v38 = vor.u32 %v1671_v54, %v1670_v23  ;;  %v5516_v9 = vmov 920167782   ;;  %v5517_v45 = vmov 1326507024   ;;  %vm1685_vm0 = vcmp.lt.s32.totalorder %v4319_v39, 4 }
 0x191   : > { %v1677_v8 = vshrl.u32 %v5516_v9, %v1665_v52  ;;  %v1679_v47 = vshll.u32 %v5516_v9, %v1664_v51  ;;  %v884_v29 = vsub.s32 0, %v4347_v36  ;;  %v1675_v22 = vor.u32 %v1674_v27, %v1673_v33  ;;  %v4358_v41 = vpop.eup %3495 }
 0x192   : > { %v1680_v26 = vshrl.u32 %v5517_v45, %v1665_v52  ;;  %5518 = vst [vmem:[#allocation15_spill] sm:$0xff] %v4358_v41  ;;  %v1827_v25 = vshll.u32 %v4253_v19, %v4283_v18  ;;  %vm820_vm1 = vcmp.lt.s32.totalorder %v4117_v53, 0  ;;  %v1666_v46 = vshrl.u32 %v5458_v57, %v1665_v52  ;;  %v4364_v54 = vpop.eup %3497 }
 0x193   : > { %v1678_v44 = vor.u32 %v1677_v8, %v1676_v10  ;;  %v1698_v23 = vshll.u32 %v1658_v2, 8  ;;  %5519 = vst [vmem:[#allocation16_spill] sm:$0xff] %v4364_v54  ;;  %v3096_v51 = vmin.u32 %v884_v29, %v4347_v36  ;;  %vm1684_vm3 = vcmp.lt.s32.totalorder %v4319_v39, 3 }
 0x194   : > { %v1681_v16 = vor.u32 %v1680_v26, %v1679_v47  ;;  %v1687_v33 = vsel %vm1685_vm0, %v1675_v22, 2102212464  ;;  %v1833_v27 = vor.u32 4788187, %v1832_v61  ;;  %vm1683_vm4 = vcmp.lt.s32.totalorder %v4319_v39, 2 }
 0x195   : > { %v1690_v19 = vsel %vm1682_vm15, %v1669_v12, %v1672_v38  ;;  %v1691_v18 = vsel %vm1685_vm0, %v1678_v44, 920167782  ;;  %v1829_v52 = vor.u32 %v1828_v63, %v1827_v25  ;;  %v5520_v2 = vand.u32 2147483647, %v4117_v53 }
 0x196   : > { %v874_v26 = vadd.s32 %v4264_v50, %v4272_v37  ;;  %v886_v8 = vclz %v3096_v51  ;;  %v1133_v61 = vand.u32 2139095040, %v4334_v49  ;;  %v1686_v47 = vsel %vm1682_vm15, %v1666_v46, %v1669_v12 }
 0x197   : > { %vm4377_vm5 = vcmp.le.f32.partialorder %v5520_v2, 0.7853982  ;;  %v1688_v29 = vsel %vm1684_vm3, %v1672_v38, %v1687_v33  ;;  %v1692_v63 = vsel %vm1684_vm3, %v1675_v22, %v1691_v18  ;;  %v1694_v25 = vsel %vm1682_vm15, %v1672_v38, %v1675_v22  ;;  %v4392_v2 = vpop.eup %3499 }
 0x198   : > { %v3097_v0 = vadd.s32 4294967294, %v886_v8  ;;  %v904_v50 = vsub.s32 4, %v4325_v56  ;;  %v1693_v37 = vsel %vm1683_vm4, %v1690_v19, %v1692_v63  ;;  %v1695_v12 = vsel %vm1685_vm0, %v1681_v16, 1326507024  ;;  %v4399_v46 = vpop.eup %3501 }
 0x199   : > { %v1834_v51 = vand.u32 2147483647, %v1833_v27  ;;  %v1696_v33 = vsel %vm1684_vm3, %v1678_v44, %v1695_v12  ;;  %v4403_v18 = vmul.u32.u64.low %v1698_v23, %v1693_v37  ;;  %v4404_v62 = vmul.u32.u64.high %v1698_v23, %v1693_v37, %v4403_v18 }
 0x19a   : > { %vm3098_vm2 = vcmp.lt.s32.totalorder %v3097_v0, 0  ;;  %v1689_v38 = vsel %vm1683_vm4, %v1686_v47, %v1688_v29  ;;  %v1697_v22 = vsel %vm1683_vm4, %v1694_v25, %v1696_v33  ;;  %v1134_v19 = vshrl.u32 %v1133_v61, 23  ;;  %v4421_v61 = vpop.f32.mrb[7].mxu1 }
 0x19b   : > { %v1836_v8 = vcvt.s32.f32 %v1829_v52  ;;  %v889_v16 = vsel %vm3098_vm2, 0, %v3097_v0  ;;  %v4411_v63 = vmul.u32.u64.low %v1698_v23, %v1697_v22  ;;  %v4412_v59 = vmul.u32.u64.high %v1698_v23, %v1697_v22, %v4411_v63 }
 0x19c   : > { %v890_v27 = vsub.s32 32, %v889_v16  ;;  %v894_v57 = vsub.s32 4294967266, %v889_v16  ;;  %v905_v44 = vsel %vm820_vm1, %v904_v50, %v4325_v56  ;;  %v3107_v37 = vadd.s32 4294967169, %v1134_v19 }
 0x19d   : > { %v4417_v12 = vmul.f32 %v1836_v8, %v1834_v51  ;;  %v1705_v55 = vmul.u32 %v1698_v23, %v1689_v38  ;;  %v1708_v47 = vadd.s32 1, %v4404_v62  ;;  %v5460_v39 = vand.u32 2147483647, %v4334_v49 }
 0x19e   : > { %v891_v0 = vshll.u32 %v4347_v36, %v889_v16  ;;  %v892_v52 = vshrl.u32 %v874_v26, %v890_v27  ;;  %v895_v29 = vadd.s32 127, %v894_v57  ;;  %v1140_v25 = vadd.s32 1, %v3107_v37 }
 0x19f   : > { %v907_v33 = vsel %vm4377_vm5, 0, %v905_v44  ;;  %vm1707_vm6 = vc.u32 %v4412_v59, %v4403_v18  ;;  %v4430_v56 = vadd.f32 %v4330_v7, %v3896_v11  ;;  %v4434_v23 = vadd.f32 %v4330_v7, %v3962_v3 }
 0x1a0   : > { %v893_v50 = vor.u32 %v892_v52, %v891_v0  ;;  %v896_v51 = vshll.u32 %v895_v29, 23  ;;  %v1709_v36 = vsel %vm1707_vm6, %v1708_v47, %v4404_v62  ;;  %vm1141_vm8 = vcmp.gt.s32.totalorder %v1140_v25, 0 }
 0x1a1   : > { %5523 = vst [vmem:[#allocation17_spill] sm:$0xff] %v4430_v56  ;;  %5524 = vst [vmem:[#allocation18_spill] sm:$0xff] %v4434_v23  ;;  %v1710_v38 = vadd.s32 %v1709_v36, %v1705_v55  ;;  %v1142_v22 = vsel %vm1141_vm8, %v1140_v25, 0  ;;  %v4440_v11 = vadd.s32 3, %v907_v33  ;;  %v1137_v27 = vand.u32 8388607, %v5460_v39 }
 0x1a2   : > { %v897_v8 = vor.u32 4788187, %v896_v51  ;;  %v1144_v16 = vand.u32 31, %v1142_v22  ;;  %v900_v63 = vcvt.s32.f32 %v893_v50  ;;  %v1965_v62 = vand.u32 2139095040, %v4430_v56 }
 0x1a3   : > { %v1711_v3 = vadd.s32 536870912, %v1710_v38  ;;  %v4445_v37 = vshrl.u32 %v1142_v22, 5  ;;  %v5525_v0 = vmov 683565275   ;;  %v5526_v29 = vmov 2475754826  }
 0x1a4   : > { %v898_v44 = vand.u32 2147483647, %v897_v8  ;;  %v1145_v47 = vsub.s32 32, %v1144_v16  ;;  %v1147_v55 = vshll.u32 %v5525_v0, %v1144_v16  ;;  %v1150_v25 = vshll.u32 %v5526_v29, %v1144_v16 }
 0x1a5   : > { %v4448_v52 = vshrl.u32 %v1711_v3, 30  ;;  %v5527_v33 = vmov 2131351028   ;;  %v5528_v36 = vmov 2102212464   ;;  %v1159_v8 = vshll.u32 %v5516_v9, %v1144_v16 }
 0x1a6   : > { %v1153_v51 = vshll.u32 %v5527_v33, %v1144_v16  ;;  %v1156_v50 = vshll.u32 %v5528_v36, %v1144_v16  ;;  %v901_v26 = vmul.f32 %v900_v63, %v898_v44  ;;  %v1148_v57 = vshrl.u32 %v5526_v29, %v1145_v47 }
 0x1a7   : > { %v1151_v39 = vshrl.u32 %v5527_v33, %v1145_v47  ;;  %v1713_v22 = vshll.u32 %v4448_v52, 30  ;;  %v1138_v19 = vor.u32 8388608, %v1137_v27  ;;  %v1154_v17 = vshrl.u32 %v5528_v36, %v1145_v47 }
 0x1a8   : > { %v1157_v3 = vshrl.u32 %v5516_v9, %v1145_v47  ;;  %v902_v31 = vxor.u32 2147483648, %v901_v26  ;;  %v1160_v43 = vshrl.u32 %v5517_v45, %v1145_v47  ;;  %v5469_v21 = vand.u32 2147483647, %v4430_v56 }
 0x1a9   : > { %v1966_v48 = vshrl.u32 %v1965_v62, 23  ;;  %v4461_v63 = vsub.s32 %v1710_v38, %v1713_v22  ;;  %v1149_v44 = vor.u32 %v1148_v57, %v1147_v55  ;;  %v1152_v41 = vor.u32 %v1151_v39, %v1150_v25 }
 0x1aa   : > { %v1155_v54 = vor.u32 %v1154_v17, %v1153_v51  ;;  %vm1018_vm10 = vcmp.eq.s32.totalorder %v4303_v4, 0  ;;  %vm1021_vm11 = vcmp.eq.s32.totalorder %v4303_v4, 2  ;;  %v903_v16 = vsel %vm820_vm1, %v902_v31, %v901_v26 }
 0x1ab   : > { %v1158_v27 = vor.u32 %v1157_v3, %v1156_v50  ;;  %v1161_v42 = vor.u32 %v1160_v43, %v1159_v8  ;;  %vm1162_vm12 = vcmp.lt.s32.totalorder %v4445_v37, 1  ;;  %v906_v62 = vsel %vm4377_vm5, %v4117_v53, %v903_v16 }
 0x1ac   : > { %v1716_v38 = vsub.s32 0, %v4461_v63  ;;  %v1146_v39 = vshrl.u32 %v5525_v0, %v1145_v47  ;;  %v1178_v17 = vshll.u32 %v1138_v19, 8  ;;  %vm1164_vm13 = vcmp.lt.s32.totalorder %v4445_v37, 3 }
 0x1ad   : > { %vm1165_vm14 = vcmp.lt.s32.totalorder %v4445_v37, 4  ;;  %v3139_v57 = vadd.s32 4294967169, %v1966_v48  ;;  %v1969_v31 = vand.u32 8388607, %v5469_v21  ;;  %3503 = vcosq.f32 %v906_v62 }
 0x1ae   : > { %v3128_v43 = vmin.u32 %v1716_v38, %v4461_v63  ;;  %vm1163_vm15 = vcmp.lt.s32.totalorder %v4445_v37, 2  ;;  %v1170_v10 = vsel %vm1162_vm12, %v1149_v44, %v1152_v41  ;;  %vm1017_vm0 = vcmp.lt.s32.totalorder %v4303_v4, 2 }
 0x1af   : > { %v1167_v26 = vsel %vm1165_vm14, %v1155_v54, 2102212464  ;;  %v1171_v19 = vsel %vm1165_vm14, %v1158_v27, 920167782  ;;  %v1174_v47 = vsel %vm1162_vm12, %v1152_v41, %v1155_v54  ;;  %v1175_v55 = vsel %vm1165_vm14, %v1161_v42, 1326507024 }
 0x1b0   : > { %v1718_v48 = vclz %v3128_v43  ;;  %v1166_v25 = vsel %vm1162_vm12, %v1146_v39, %v1149_v44  ;;  %v1172_v51 = vsel %vm1164_vm13, %v1155_v54, %v1171_v19  ;;  %v1176_v50 = vsel %vm1164_vm13, %v1158_v27, %v1175_v55 }
 0x1b1   : > { %3505 = vsinq.f32 %v906_v62  ;;  %v1173_v8 = vsel %vm1163_vm15, %v1170_v10, %v1172_v51  ;;  %v1177_v22 = vsel %vm1163_vm15, %v1174_v47, %v1176_v50  ;;  %v1972_v3 = vadd.s32 1, %v3139_v57 }
 0x1b2   : > { %v3129_v16 = vadd.s32 4294967294, %v1718_v48  ;;  %v1168_v42 = vsel %vm1164_vm13, %v1152_v41, %v1167_v26  ;;  %v4496_v38 = vmul.u32.u64.low %v1178_v17, %v1177_v22  ;;  %v4497_v44 = vmul.u32.u64.high %v1178_v17, %v1177_v22, %v4496_v38 }
 0x1b3   : > { %v5529_v54 = vxor.u32 2147483648, %v4417_v12  ;;  %v4504_v62 = vmul.u32.u64.low %v1178_v17, %v1173_v8  ;;  %v4505_v39 = vmul.u32.u64.high %v1178_v17, %v1173_v8, %v4504_v62  ;;  %vm1973_vm1 = vcmp.gt.s32.totalorder %v1972_v3, 0 }
 0x1b4   : > { %v5530_v57 = vxor.u32 2147483648, %v4399_v46  ;;  %v5531_v43 = vxor.u32 2147483648, %v4392_v2  ;;  %vm3130_vm3 = vcmp.lt.s32.totalorder %v3129_v16, 0  ;;  %v1974_v26 = vsel %vm1973_vm1, %v1972_v3, 0 }
 0x1b5   : > { %v1839_v27 = vsel %vm1756_vm9, %v5529_v54, %v4417_v12  ;;  %v1721_v12 = vsel %vm3130_vm3, 0, %v3129_v16  ;;  %v1169_v19 = vsel %vm1163_vm15, %v1166_v25, %v1168_v42  ;;  %v1970_v47 = vor.u32 8388608, %v1969_v31 }
 0x1b6   : > { %v1020_v41 = vsel %vm1018_vm10, %v4392_v2, %v5530_v57  ;;  %v1023_v10 = vsel %vm1021_vm11, %v5531_v43, %v4399_v46  ;;  %v1976_v55 = vand.u32 31, %v1974_v26  ;;  %v4523_v48 = vsel %vm4307_vm7, %v4036_v15, %v1839_v27 }
 0x1b7   : > { %v1722_v51 = vsub.s32 32, %v1721_v12  ;;  %v1726_v50 = vsub.s32 4294967266, %v1721_v12  ;;  %v4527_v2 = vadd.f32 %v4330_v7, %v4047_v58  ;;  %v4530_v46 = vand.u32 3, %v4440_v11  ;;  %v3504_v25 = vpop.eup %3503 }
 0x1b8   : > { %vm1187_vm9 = vc.u32 %v4497_v44, %v4504_v62  ;;  %v1188_v37 = vadd.s32 1, %v4505_v39  ;;  %v1977_v31 = vsub.s32 32, %v1976_v55  ;;  %v4537_v6 = vsel %vm1017_vm0, %v1020_v41, %v1023_v10 }
 0x1b9   : > { %v1706_v8 = vadd.s32 %v4403_v18, %v4412_v59  ;;  %v1727_v22 = vadd.s32 127, %v1726_v50  ;;  %v1185_v58 = vmul.u32 %v1178_v17, %v1169_v19  ;;  %3507 = vcosq.f32 %v4523_v48 }
 0x1ba   : > { %v1189_v11 = vsel %vm1187_vm9, %v1188_v37, %v4505_v39  ;;  %v4543_v3 = vshll.u32 %v1970_v47, 8  ;;  %v1736_v54 = vsub.s32 4, %v4448_v52  ;;  %vm914_vm7 = vcmp.eq.s32.totalorder %v4530_v46, 0 }
 0x1bb   : > { %v1724_v42 = vshrl.u32 %v1706_v8, %v1722_v51  ;;  %v1728_v38 = vshll.u32 %v1727_v22, 23  ;;  %v1190_v4 = vadd.s32 %v1189_v11, %v1185_v58  ;;  %v3506_v27 = vpop.eup %3505  ;;  %vm917_vm4 = vcmp.eq.s32.totalorder %v4530_v46, 2 }
 0x1bc   : > { %v1979_v59 = vshll.u32 %v5525_v0, %v1976_v55  ;;  %v1980_v18 = vshrl.u32 %v5526_v29, %v1977_v31  ;;  %v1982_v17 = vshll.u32 %v5526_v29, %v1976_v55  ;;  %v1983_v39 = vshrl.u32 %v5527_v33, %v1977_v31 }
 0x1bd   : > { %v1723_v57 = vshll.u32 %v4461_v63, %v1721_v12  ;;  %v1729_v41 = vor.u32 4788187, %v1728_v38  ;;  %v1191_v43 = vadd.s32 536870912, %v1190_v4  ;;  %v1975_v10 = vshrl.u32 %v1974_v26, 5 }
 0x1be   : > { %v918_v19 = vxor.u32 2147483648, %v3504_v25  ;;  %v1985_v47 = vshll.u32 %v5527_v33, %v1976_v55  ;;  %v1986_v51 = vshrl.u32 %v5528_v36, %v1977_v31  ;;  %v1988_v50 = vshll.u32 %v5528_v36, %v1976_v55 }
 0x1bf   : > { %v915_v37 = vxor.u32 2147483648, %v3506_v27  ;;  %vm1652_vm5 = vcmp.lt.s32.totalorder %v4151_v60, 0  ;;  %v1725_v8 = vor.u32 %v1724_v42, %v1723_v57  ;;  %v1192_v22 = vshrl.u32 %v1191_v43, 30 }
 0x1c0   : > { %v1989_v58 = vshrl.u32 %v5516_v9, %v1977_v31  ;;  %v1981_v11 = vor.u32 %v1980_v18, %v1979_v59  ;;  %v1984_v21 = vor.u32 %v1983_v39, %v1982_v17  ;;  %v1991_v63 = vshll.u32 %v5516_v9, %v1976_v55 }
 0x1c1   : > { %v1992_v26 = vshrl.u32 %v5517_v45, %v1977_v31  ;;  %vm913_vm2 = vcmp.lt.s32.totalorder %v4530_v46, 2  ;;  %v1730_v12 = vand.u32 2147483647, %v1729_v41  ;;  %v1193_v38 = vshll.u32 %v1192_v22, 30 }
 0x1c2   : > { %v1990_v16 = vor.u32 %v1989_v58, %v1988_v50  ;;  %vm1994_vm6 = vcmp.lt.s32.totalorder %v1975_v10, 1  ;;  %vm1132_vm8 = vcmp.lt.s32.totalorder %v4334_v49, 0  ;;  %v1978_v15 = vshrl.u32 %v5525_v0, %v1977_v31 }
 0x1c3   : > { %v1987_v42 = vor.u32 %v1986_v51, %v1985_v47  ;;  %vm1997_vm10 = vcmp.lt.s32.totalorder %v1975_v10, 4  ;;  %v1029_v57 = vand.u32 2139095040, %v4434_v23  ;;  %vm1014_vm11 = vweird.f32 %v3945_v30  ;;  %v4568_v17 = vpop.eup %3507 }
 0x1c4   : > { %v1732_v59 = vcvt.s32.f32 %v1725_v8  ;;  %v4566_v55 = vsub.s32 %v1190_v4, %v1193_v38  ;;  %v1993_v18 = vor.u32 %v1992_v26, %v1991_v63  ;;  %vm1996_vm12 = vcmp.lt.s32.totalorder %v1975_v10, 3  ;;  %5532 = vst [vmem:[#allocation19_spill] sm:$0xff] %v4568_v17 }
 0x1c5   : > { %v5533_v39 = vand.u32 2147483647, %v4151_v60  ;;  %vm1995_vm14 = vcmp.lt.s32.totalorder %v1975_v10, 2  ;;  %v1999_v31 = vsel %vm1997_vm10, %v1987_v42, 2102212464  ;;  %v2002_v43 = vsel %vm1994_vm6, %v1981_v11, %v1984_v21 }
 0x1c6   : > { %v2003_v47 = vsel %vm1997_vm10, %v1990_v16, 920167782  ;;  %vm910_vm15 = vweird.f32 %v4117_v53  ;;  %v916_v4 = vsel %vm914_vm7, %v3504_v25, %v915_v37  ;;  %v919_v51 = vsel %vm917_vm4, %v918_v19, %v3506_v27 }
 0x1c7   : > { %vm4572_vm13 = vcmp.le.f32.partialorder %v5533_v39, 0.7853982  ;;  %v1733_v50 = vmul.f32 %v1732_v59, %v1730_v12  ;;  %v5536_v8 = vand.u32 2147483647, %v4334_v49  ;;  %v1196_v63 = vsub.s32 0, %v4566_v55 }
 0x1c8   : > { %v1998_v26 = vsel %vm1994_vm6, %v1978_v15, %v1981_v11  ;;  %v2000_v38 = vsel %vm1996_vm12, %v1984_v21, %v1999_v31  ;;  %v2004_v39 = vsel %vm1996_vm12, %v1987_v42, %v2003_v47  ;;  %v2006_v25 = vsel %vm1994_vm6, %v1984_v21, %v1987_v42 }
 0x1c9   : > { %vm4586_vm0 = vcmp.le.f32.partialorder %v5536_v8, 0.7853982  ;;  %v3108_v37 = vmin.u32 %v1196_v63, %v4566_v55  ;;  %v1216_v27 = vsub.s32 4, %v1192_v22  ;;  %v2005_v19 = vsel %vm1995_vm14, %v2002_v43, %v2004_v39 }
 0x1ca   : > { %v2007_v12 = vsel %vm1997_vm10, %v1993_v18, 1326507024  ;;  %v1737_v59 = vsel %vm1652_vm5, %v1736_v54, %v4448_v52  ;;  %v4603_v15 = vmul.u32.u64.low %v4543_v3, %v2005_v19  ;;  %v4604_v11 = vmul.u32.u64.high %v4543_v3, %v2005_v19, %v4603_v15 }
 0x1cb   : > { %v2008_v8 = vsel %vm1996_vm12, %v1990_v16, %v2007_v12  ;;  %v1198_v31 = vclz %v3108_v37  ;;  %v2001_v21 = vsel %vm1995_vm14, %v1998_v26, %v2000_v38  ;;  %v1030_v47 = vshrl.u32 %v1029_v57, 23 }
 0x1cc   : > { %v2009_v42 = vsel %vm1995_vm14, %v2006_v25, %v2008_v8  ;;  %v920_v43 = vsel %vm913_vm2, %v916_v4, %v919_v51  ;;  %v5539_v52 = vand.u32 2147483647, %v4434_v23  ;;  %v1734_v54 = vxor.u32 2147483648, %v1733_v50 }
 0x1cd   : > { %v4611_v18 = vmul.u32.u64.low %v4543_v3, %v2009_v42  ;;  %v4612_v63 = vmul.u32.u64.high %v4543_v3, %v2009_v42, %v4611_v18  ;;  %v3109_v39 = vadd.s32 4294967294, %v1198_v31  ;;  %v1217_v37 = vsel %vm1132_vm8, %v1216_v27, %v1192_v22 }
 0x1ce   : > { %v1033_v16 = vand.u32 8388607, %v5539_v52  ;;  %v3103_v19 = vadd.s32 4294967169, %v1030_v47  ;;  %v4621_v10 = vsel %vm1014_vm11, nan, %v4537_v6  ;;  %3509 = vsinq.f32 %v4523_v48 }
 0x1cf   : > { %v2017_v46 = vmul.u32 %v4543_v3, %v2001_v21  ;;  %v2020_v57 = vadd.s32 1, %v4604_v11  ;;  %v1739_v4 = vsel %vm4572_vm13, 0, %v1737_v59  ;;  %vm3110_vm1 = vcmp.lt.s32.totalorder %v3109_v39, 0 }
 0x1d0   : > { %v1036_v51 = vadd.s32 1, %v3103_v19  ;;  %v5471_v26 = vand.u32 2147483647, %v4527_v2  ;;  %v4631_v22 = vsel %vm910_vm15, nan, %v920_v43  ;;  %v1201_v30 = vsel %vm3110_vm1, 0, %v3109_v39 }
 0x1d1   : > { %v1219_v6 = vsel %vm4586_vm0, 0, %v1217_v37  ;;  %vm2019_vm3 = vc.u32 %v4612_v63, %v4603_v15  ;;  %v1735_v48 = vsel %vm1652_vm5, %v1734_v54, %v1733_v50  ;;  %v1206_v3 = vsub.s32 4294967266, %v1201_v30 }
 0x1d2   : > { %v2021_v38 = vsel %vm2019_vm3, %v2020_v57, %v4604_v11  ;;  %v1034_v25 = vor.u32 8388608, %v1033_v16  ;;  %v4639_v27 = vadd.s32 3, %v1739_v4  ;;  %vm1037_vm9 = vcmp.gt.s32.totalorder %v1036_v51, 0 }
 0x1d3   : > { %v2022_v12 = vadd.s32 %v2021_v38, %v2017_v46  ;;  %v1861_v53 = vand.u32 2139095040, %v4527_v2  ;;  %v1186_v8 = vadd.s32 %v4504_v62, %v4497_v44  ;;  %v1202_v31 = vsub.s32 32, %v1201_v30 }
 0x1d4   : > { %5540 = vst [vmem:[#allocation20_spill] sm:$0xff] %v4639_v27  ;;  %v1038_v21 = vsel %vm1037_vm9, %v1036_v51, 0  ;;  %v4649_v50 = vsel %vm4572_vm13, %v4151_v60, %v1735_v48  ;;  %v4651_v11 = vadd.s32 3, %v1219_v6  ;;  %v1207_v43 = vadd.s32 127, %v1206_v3 }
 0x1d5   : > { %v2023_v42 = vadd.s32 536870912, %v2022_v12  ;;  %v1040_v47 = vand.u32 31, %v1038_v21  ;;  %v4653_v18 = vshll.u32 %v1034_v25, 8  ;;  %v1865_v52 = vand.u32 8388607, %v5471_v26 }
 0x1d6   : > { %v4659_v44 = vadd.f32 %v4330_v7, %v4137_v32  ;;  %v4662_v62 = vadd.s32 %v4603_v15, %v4612_v63  ;;  %v1862_v54 = vshrl.u32 %v1861_v53, 23  ;;  %v1204_v39 = vshrl.u32 %v1186_v8, %v1202_v31 }
 0x1d7   : > { %v4664_v41 = vshrl.u32 %v2023_v42, 30  ;;  %v1041_v16 = vsub.s32 32, %v1040_v47  ;;  %v1043_v37 = vshll.u32 %v5525_v0, %v1040_v47  ;;  %v1046_v19 = vshll.u32 %v5526_v29, %v1040_v47 }
 0x1d8   : > { %v1049_v46 = vshll.u32 %v5527_v33, %v1040_v47  ;;  %v4669_v57 = vpop.eup %3509  ;;  %v1039_v32 = vshrl.u32 %v1038_v21, 5  ;;  %v1052_v15 = vshll.u32 %v5528_v36, %v1040_v47  ;;  %v1208_v63 = vshll.u32 %v1207_v43, 23 }
 0x1d9   : > { %5541 = vst [vmem:[#allocation21_spill] sm:$0xff] %v4669_v57  ;;  %v2025_v4 = vshll.u32 %v4664_v41, 30  ;;  %v1044_v51 = vshrl.u32 %v5526_v29, %v1041_v16  ;;  %v1047_v6 = vshrl.u32 %v5527_v33, %v1041_v16  ;;  %v1050_v48 = vshrl.u32 %v5528_v36, %v1041_v16 }
 0x1da   : > { %v1053_v3 = vshrl.u32 %v5516_v9, %v1041_v16  ;;  %v1203_v38 = vshll.u32 %v4566_v55, %v1201_v30  ;;  %v1055_v53 = vshll.u32 %v5516_v9, %v1040_v47  ;;  %v1866_v8 = vor.u32 8388608, %v1865_v52 }
 0x1db   : > { %v4678_v25 = vsub.s32 %v2022_v12, %v2025_v4  ;;  %v1045_v31 = vor.u32 %v1044_v51, %v1043_v37  ;;  %v1048_v21 = vor.u32 %v1047_v6, %v1046_v19  ;;  %v1051_v42 = vor.u32 %v1050_v48, %v1049_v46 }
 0x1dc   : > { %v3135_v59 = vadd.s32 4294967169, %v1862_v54  ;;  %v1205_v26 = vor.u32 %v1204_v39, %v1203_v38  ;;  %v1054_v60 = vor.u32 %v1053_v3, %v1052_v15  ;;  %v1056_v17 = vshrl.u32 %v5517_v45, %v1041_v16 }
 0x1dd   : > { %v2028_v43 = vsub.s32 0, %v4678_v25  ;;  %v1209_v57 = vor.u32 4788187, %v1208_v63  ;;  %v1042_v27 = vshrl.u32 %v5525_v0, %v1041_v16  ;;  %vm1058_vm7 = vcmp.lt.s32.totalorder %v1039_v32, 1 }
 0x1de   : > { %vm1060_vm4 = vcmp.lt.s32.totalorder %v1039_v32, 3  ;;  %v1057_v30 = vor.u32 %v1056_v17, %v1055_v53  ;;  %vm1059_vm5 = vcmp.lt.s32.totalorder %v1039_v32, 2  ;;  %vm1061_vm2 = vcmp.lt.s32.totalorder %v1039_v32, 4 }
 0x1df   : > { %v3140_v55 = vmin.u32 %v2028_v43, %v4678_v25  ;;  %v1063_v12 = vsel %vm1061_vm2, %v1051_v42, 2102212464  ;;  %v1066_v47 = vsel %vm1058_vm7, %v1045_v31, %v1048_v21  ;;  %v1067_v52 = vsel %vm1061_vm2, %v1054_v60, 920167782 }
 0x1e0   : > { %v1868_v54 = vadd.s32 1, %v3135_v59  ;;  %v1212_v39 = vcvt.s32.f32 %v1205_v26  ;;  %v1068_v19 = vsel %vm1060_vm4, %v1051_v42, %v1067_v52  ;;  %v4689_v46 = vshll.u32 %v1866_v8, 8 }
 0x1e1   : > { %v2030_v37 = vclz %v3140_v55  ;;  %v1062_v16 = vsel %vm1058_vm7, %v1042_v27, %v1045_v31  ;;  %v1064_v4 = vsel %vm1060_vm4, %v1048_v21, %v1063_v12  ;;  %v1069_v17 = vsel %vm1059_vm5, %v1066_v47, %v1068_v19 }
 0x1e2   : > { %v1070_v51 = vsel %vm1058_vm7, %v1048_v21, %v1051_v42  ;;  %v1210_v15 = vand.u32 2147483647, %v1209_v57  ;;  %v2048_v6 = vsub.s32 4, %v4664_v41  ;;  %v1071_v59 = vsel %vm1061_vm2, %v1057_v30, 1326507024 }
 0x1e3   : > { %v3141_v63 = vadd.s32 4294967294, %v2030_v37  ;;  %v1072_v26 = vsel %vm1060_vm4, %v1054_v60, %v1071_v59  ;;  %v4699_v48 = vmul.u32.u64.low %v4653_v18, %v1069_v17  ;;  %v4700_v3 = vmul.u32.u64.high %v4653_v18, %v1069_v17, %v4699_v48 }
 0x1e4   : > { %vm1869_vm6 = vcmp.gt.s32.totalorder %v1868_v54, 0  ;;  %v1065_v27 = vsel %vm1059_vm5, %v1062_v16, %v1064_v4  ;;  %v1073_v38 = vsel %vm1059_vm5, %v1070_v51, %v1072_v26  ;;  %v1213_v30 = vmul.f32 %v1212_v39, %v1210_v15 }
 0x1e5   : > { %vm3142_vm10 = vcmp.lt.s32.totalorder %v3141_v63, 0  ;;  %v1870_v53 = vsel %vm1869_vm6, %v1868_v54, 0  ;;  %v4706_v8 = vmul.u32.u64.low %v4653_v18, %v1073_v38  ;;  %v4707_v31 = vmul.u32.u64.high %v4653_v18, %v1073_v38, %v4706_v8 }
 0x1e6   : > { %v2033_v57 = vsel %vm3142_vm10, 0, %v3141_v63  ;;  %v4709_v21 = vshrl.u32 %v1870_v53, 5  ;;  %v1872_v55 = vand.u32 31, %v1870_v53  ;;  %v1081_v12 = vmul.u32 %v4653_v18, %v1065_v27 }
 0x1e7   : > { %v2034_v60 = vsub.s32 32, %v2033_v57  ;;  %v2035_v42 = vshll.u32 %v4678_v25, %v2033_v57  ;;  %v2038_v43 = vsub.s32 4294967266, %v2033_v57  ;;  %v1084_v47 = vadd.s32 1, %v4700_v3 }
 0x1e8   : > { %vm1890_vm11 = vcmp.lt.s32.totalorder %v4709_v21, 1  ;;  %v1873_v54 = vsub.s32 32, %v1872_v55  ;;  %vm1892_vm12 = vcmp.lt.s32.totalorder %v4709_v21, 3  ;;  %vm1964_vm13 = vcmp.lt.s32.totalorder %v4430_v56, 0 }
 0x1e9   : > { %v2036_v32 = vshrl.u32 %v4662_v62, %v2034_v60  ;;  %v2039_v52 = vadd.s32 127, %v2038_v43  ;;  %vm1083_vm14 = vc.u32 %v4707_v31, %v4699_v48  ;;  %v1875_v25 = vshll.u32 %v5525_v0, %v1872_v55 }
 0x1ea   : > { %v1878_v39 = vshll.u32 %v5526_v29, %v1872_v55  ;;  %v1881_v18 = vshll.u32 %v5527_v33, %v1872_v55  ;;  %v1085_v16 = vsel %vm1083_vm14, %v1084_v47, %v4700_v3  ;;  %v1874_v62 = vshrl.u32 %v5525_v0, %v1873_v54 }
 0x1eb   : > { %v2037_v37 = vor.u32 %v2036_v32, %v2035_v42  ;;  %v2040_v19 = vshll.u32 %v2039_v52, 23  ;;  %v1086_v4 = vadd.s32 %v1085_v16, %v1081_v12  ;;  %v1876_v17 = vshrl.u32 %v5526_v29, %v1873_v54 }
 0x1ec   : > { %v1879_v51 = vshrl.u32 %v5527_v33, %v1873_v54  ;;  %v1882_v15 = vshrl.u32 %v5528_v36, %v1873_v54  ;;  %v1884_v26 = vshll.u32 %v5528_v36, %v1872_v55  ;;  %v1885_v27 = vshrl.u32 %v5516_v9, %v1873_v54 }
 0x1ed   : > { %v2041_v63 = vor.u32 4788187, %v2040_v19  ;;  %v2044_v59 = vcvt.s32.f32 %v2037_v37  ;;  %vm1028_vm15 = vcmp.lt.s32.totalorder %v4434_v23, 0  ;;  %v1087_v38 = vadd.s32 536870912, %v1086_v4 }
 0x1ee   : > { %v1877_v53 = vor.u32 %v1876_v17, %v1875_v25  ;;  %v1880_v3 = vor.u32 %v1879_v51, %v1878_v39  ;;  %v1883_v57 = vor.u32 %v1882_v15, %v1881_v18  ;;  %v5542_v8 = vand.u32 2147483647, %v4430_v56 }
 0x1ef   : > { %v2042_v42 = vand.u32 2147483647, %v2041_v63  ;;  %v1886_v43 = vor.u32 %v1885_v27, %v1884_v26  ;;  %v1887_v12 = vshll.u32 %v5516_v9, %v1872_v55  ;;  %v1888_v47 = vshrl.u32 %v5517_v45, %v1873_v54 }
 0x1f0   : > { %vm4733_vm1 = vcmp.le.f32.partialorder %v5542_v8, 0.7853982  ;;  %v1214_v32 = vxor.u32 2147483648, %v1213_v30  ;;  %v1088_v52 = vshrl.u32 %v1087_v38, 30  ;;  %vm1893_vm3 = vcmp.lt.s32.totalorder %v4709_v21, 4 }
 0x1f1   : > { %v1341_v25 = vand.u32 2139095040, %v4659_v44  ;;  %v2045_v39 = vmul.f32 %v2044_v59, %v2042_v42  ;;  %v1889_v18 = vor.u32 %v1888_v47, %v1887_v12  ;;  %v1895_v37 = vsel %vm1893_vm3, %v1883_v57, 2102212464 }
 0x1f2   : > { %v1899_v19 = vsel %vm1893_vm3, %v1886_v43, 920167782  ;;  %v5545_v16 = vand.u32 2147483647, %v4434_v23  ;;  %v1089_v54 = vshll.u32 %v1088_v52, 30  ;;  %vm1891_vm7 = vcmp.lt.s32.totalorder %v4709_v21, 2 }
 0x1f3   : > { %v1898_v17 = vsel %vm1890_vm11, %v1877_v53, %v1880_v3  ;;  %v1900_v51 = vsel %vm1892_vm12, %v1883_v57, %v1899_v19  ;;  %v1112_v15 = vsub.s32 4, %v1088_v52  ;;  %v1894_v63 = vsel %vm1890_vm11, %v1874_v62, %v1877_v53 }
 0x1f4   : > { %vm4747_vm9 = vcmp.le.f32.partialorder %v5545_v16, 0.7853982  ;;  %v1896_v59 = vsel %vm1892_vm12, %v1880_v3, %v1895_v37  ;;  %v1902_v26 = vsel %vm1890_vm11, %v1880_v3, %v1883_v57  ;;  %3511 = vcosq.f32 %v4649_v50 }
 0x1f5   : > { %v2046_v27 = vxor.u32 2147483648, %v2045_v39  ;;  %v4763_v38 = vsub.s32 %v1086_v4, %v1089_v54  ;;  %v1903_v8 = vsel %vm1893_vm3, %v1889_v18, 1326507024  ;;  %v2049_v62 = vsel %vm1964_vm13, %v2048_v6, %v4664_v41 }
 0x1f6   : > { %v1901_v53 = vsel %vm1891_vm7, %v1898_v17, %v1900_v51  ;;  %v1904_v3 = vsel %vm1892_vm12, %v1886_v43, %v1903_v8  ;;  %v1342_v57 = vshrl.u32 %v1341_v25, 23  ;;  %v1215_v4 = vsel %vm1132_vm8, %v1214_v32, %v1213_v30 }
 0x1f7   : > { %v1092_v42 = vsub.s32 0, %v4763_v38  ;;  %v1897_v12 = vsel %vm1891_vm7, %v1894_v63, %v1896_v59  ;;  %v1905_v47 = vsel %vm1891_vm7, %v1902_v26, %v1904_v3  ;;  %v1113_v41 = vsel %vm1028_vm15, %v1112_v15, %v1088_v52 }
 0x1f8   : > { %v4786_v6 = vmul.u32.u64.low %v4689_v46, %v1905_v47  ;;  %v4787_v18 = vmul.u32.u64.high %v4689_v46, %v1905_v47, %v4786_v6  ;;  %v3115_v43 = vadd.s32 4294967169, %v1342_v57  ;;  %v2047_v25 = vsel %vm1964_vm13, %v2046_v27, %v2045_v39 }
 0x1f9   : > { %v3104_v30 = vmin.u32 %v1092_v42, %v4763_v38  ;;  %v4793_v32 = vmul.u32.u64.low %v4689_v46, %v1901_v53  ;;  %v4794_v37 = vmul.u32.u64.high %v4689_v46, %v1901_v53, %v4793_v32  ;;  %3513 = vsinq.f32 %v4649_v50 }
 0x1fa   : > { %v1218_v21 = vsel %vm4586_vm0, %v4334_v49, %v1215_v4  ;;  %v1348_v52 = vadd.s32 1, %v3115_v43  ;;  %v4803_v19 = vadd.f32 %v4330_v7, %v4219_v28  ;;  %v2051_v39 = vsel %vm4733_vm1, 0, %v2049_v62 }
 0x1fb   : > { %v1094_v16 = vclz %v3104_v30  ;;  %v1913_v54 = vmul.u32 %v4689_v46, %v1897_v12  ;;  %v5477_v17 = vand.u32 2147483647, %v4659_v44  ;;  %v2050_v50 = vsel %vm4733_vm1, %v4430_v56, %v2047_v25  ;;  %v3475_v46 = vld [vmem:[%s5435_s3] sm:$0xff]  }
 0x1fc   : > { %v1115_v58 = vsel %vm4747_vm9, 0, %v1113_v41  ;;  %vm1915_vm8 = vc.u32 %v4787_v18, %v4793_v32  ;;  %vm1349_vm0 = vcmp.gt.s32.totalorder %v1348_v52, 0  ;;  %3515 = vcosq.f32 %v1218_v21  ;;  %3283 = vmatprep.subr.bf16.mxu1 %v3475_v46 }
 0x1fd   : > { %v3105_v28 = vadd.s32 4294967294, %v1094_v16  ;;  %v1916_v7 = vadd.s32 1, %v4794_v37  ;;  %v1350_v51 = vsel %vm1349_vm0, %v1348_v52, 0  ;;  %3517 = vsinq.f32 %v1218_v21  ;;  %3284 = vmatpush3.bf16.msra.mxu1 %v3475_v46 }
 0x1fe   : > { %v4820_v15 = vadd.s32 3, %v2051_v39  ;;  %v1082_v60 = vadd.s32 %v4699_v48, %v4707_v31  ;;  %v1352_v63 = vand.u32 31, %v1350_v51  ;;  %v4824_v59 = vpop.eup %3511  ;;  %3519 = vcosq.f32 %v2050_v50 }
 0x1ff   : > { %5549 = vst [vmem:[#allocation23_spill] sm:$0xff] %v4824_v59  ;;  %vm3106_vm4 = vcmp.lt.s32.totalorder %v3105_v28, 0  ;;  %v4826_v26 = vadd.s32 3, %v1115_v58  ;;  %v1917_v27 = vsel %vm1915_vm8, %v1916_v7, %v4794_v37  ;;  %3521 = vsinq.f32 %v2050_v50 }
 0x200   : > { %5548 = vst [vmem:[#allocation22_spill] sm:$0xff] %v4820_v15  ;;  %v1097_v8 = vsel %vm3106_vm4, 0, %v3105_v28  ;;  %v1918_v62 = vadd.s32 %v1917_v27, %v1913_v54  ;;  %v1353_v53 = vsub.s32 32, %v1352_v63  ;;  %v1345_v48 = vand.u32 8388607, %v5477_v17 }
 0x201   : > { %v1098_v3 = vsub.s32 32, %v1097_v8  ;;  %v1102_v57 = vsub.s32 4294967266, %v1097_v8  ;;  %v4831_v31 = vshrl.u32 %v1350_v51, 5  ;;  %v1099_v4 = vshll.u32 %v4763_v38, %v1097_v8 }
 0x202   : > { %v1919_v42 = vadd.s32 536870912, %v1918_v62  ;;  %v1355_v12 = vshll.u32 %v5525_v0, %v1352_v63  ;;  %v1358_v47 = vshll.u32 %v5526_v29, %v1352_v63  ;;  %v1356_v43 = vshrl.u32 %v5526_v29, %v1353_v53 }
 0x203   : > { %v1100_v41 = vshrl.u32 %v1082_v60, %v1098_v3  ;;  %v1103_v6 = vadd.s32 127, %v1102_v57  ;;  %v1359_v25 = vshrl.u32 %v5527_v33, %v1353_v53  ;;  %v4838_v30 = vpop.eup %3513  ;;  %v1361_v21 = vshll.u32 %v5527_v33, %v1352_v63 }
 0x204   : > { %5550 = vst [vmem:[#allocation24_spill] sm:$0xff] %v4838_v30  ;;  %v4840_v37 = vshrl.u32 %v1919_v42, 30  ;;  %v1362_v52 = vshrl.u32 %v5528_v36, %v1353_v53  ;;  %v1364_v38 = vshll.u32 %v5528_v36, %v1352_v63  ;;  %v1365_v54 = vshrl.u32 %v5516_v9, %v1353_v53 }
 0x205   : > { %v1101_v39 = vor.u32 %v1100_v41, %v1099_v4  ;;  %v1104_v16 = vshll.u32 %v1103_v6, 23  ;;  %v2173_v50 = vand.u32 2139095040, %v4803_v19  ;;  %v1346_v28 = vor.u32 8388608, %v1345_v48 }
 0x206   : > { %v1921_v58 = vshll.u32 %v4840_v37, 30  ;;  %v1367_v7 = vshll.u32 %v5516_v9, %v1352_v63  ;;  %v1368_v51 = vshrl.u32 %v5517_v45, %v1353_v53  ;;  %v4850_v46 = vpop.eup %3515  ;;  %v1357_v27 = vor.u32 %v1356_v43, %v1355_v12 }
 0x207   : > { %v1105_v60 = vor.u32 4788187, %v1104_v16  ;;  %v1360_v8 = vor.u32 %v1359_v25, %v1358_v47  ;;  %v1366_v3 = vor.u32 %v1365_v54, %v1364_v38  ;;  %v4852_v57 = vpop.eup %3517  ;;  %v1108_v4 = vcvt.s32.f32 %v1101_v39 }
 0x208   : > { %v4854_v42 = vsub.s32 %v1918_v62, %v1921_v58  ;;  %v1363_v41 = vor.u32 %v1362_v52, %v1361_v21  ;;  %vm1370_vm5 = vcmp.lt.s32.totalorder %v4831_v31, 1  ;;  %v4857_v6 = vpop.eup %3519  ;;  %vm1860_vm2 = vcmp.lt.s32.totalorder %v4527_v2, 0 }
 0x209   : > { %5551 = vst [vmem:[#allocation25_spill] sm:$0xff] %v4857_v6  ;;  %v1106_v48 = vand.u32 2147483647, %v1105_v60  ;;  %v1369_v63 = vor.u32 %v1368_v51, %v1367_v7  ;;  %vm1372_vm6 = vcmp.lt.s32.totalorder %v4831_v31, 3  ;;  %vm1373_vm10 = vcmp.lt.s32.totalorder %v4831_v31, 4  ;;  %v4862_v12 = vpop.eup %3521 }
 0x20a   : > { %5552 = vst [vmem:[#allocation26_spill] sm:$0xff] %v4862_v12  ;;  %v1924_v47 = vsub.s32 0, %v4854_v42  ;;  %vm1371_vm11 = vcmp.lt.s32.totalorder %v4831_v31, 2  ;;  %v1386_v62 = vshll.u32 %v1346_v28, 8  ;;  %v2174_v43 = vshrl.u32 %v2173_v50, 23 }
 0x20b   : > { %v1109_v25 = vmul.f32 %v1108_v4, %v1106_v48  ;;  %v1354_v21 = vshrl.u32 %v5525_v0, %v1353_v53  ;;  %v1378_v52 = vsel %vm1370_vm5, %v1357_v27, %v1360_v8  ;;  %v1379_v38 = vsel %vm1373_vm10, %v1366_v3, 920167782 }
 0x20c   : > { %v5553_v39 = vand.u32 2147483647, %v4527_v2  ;;  %v3136_v54 = vmin.u32 %v1924_v47, %v4854_v42  ;;  %v1375_v50 = vsel %vm1373_vm10, %v1363_v41, 2102212464  ;;  %v1380_v53 = vsel %vm1372_vm6, %v1363_v41, %v1379_v38 }
 0x20d   : > { %v1382_v58 = vsel %vm1370_vm5, %v1360_v8, %v1363_v41  ;;  %v1110_v28 = vxor.u32 2147483648, %v1109_v25  ;;  %v1381_v7 = vsel %vm1371_vm11, %v1378_v52, %v1380_v53  ;;  %v1383_v51 = vsel %vm1373_vm10, %v1369_v63, 1326507024 }
 0x20e   : > { %vm4873_vm12 = vcmp.le.f32.partialorder %v5553_v39, 0.7853982  ;;  %v5476_v60 = vand.u32 2147483647, %v4803_v19  ;;  %v1926_v4 = vclz %v3136_v54  ;;  %v1384_v48 = vsel %vm1372_vm6, %v1366_v3, %v1383_v51  ;;  %v3477_v54 = vld [vmem:[%s5437_s5] sm:$0xff]  }
 0x20f   : > { %v4891_v47 = vmul.u32.u64.low %v1386_v62, %v1381_v7  ;;  %v4892_v39 = vmul.u32.u64.high %v1386_v62, %v1381_v7, %v4891_v47  ;;  %v1374_v41 = vsel %vm1370_vm5, %v1354_v21, %v1357_v27  ;;  %v1376_v38 = vsel %vm1372_vm6, %v1360_v8, %v1375_v50  ;;  %v3556_v8 = vld [vmem:[%s5434_s2] ss:$0 sm:$0xff]  ;;  %3303 = vmatprep.subr.bf16.mxu0 %v3477_v54 }
 0x210   : > { %v1385_v52 = vsel %vm1371_vm11, %v1382_v58, %v1384_v48  ;;  %v3147_v63 = vadd.s32 4294967169, %v2174_v43  ;;  %v3137_v53 = vadd.s32 4294967294, %v1926_v4  ;;  %v1944_v3 = vsub.s32 4, %v4840_v37  ;;  %3304 = vmatpush3.bf16.msra.mxu0 %v3477_v54 }
 0x211   : > { %v4905_v7 = vmul.u32.u64.low %v1386_v62, %v1385_v52  ;;  %v4906_v51 = vmul.u32.u64.high %v1386_v62, %v1385_v52, %v4905_v7  ;;  %v1914_v27 = vadd.s32 %v4793_v32, %v4787_v18  ;;  %v4914_v43 = vadd.f32 %v3556_v8, %v4321_v1 }
 0x212   : > { %v2180_v21 = vadd.s32 1, %v3147_v63  ;;  %v4917_v50 = vadd.f32 %v3556_v8, %v4421_v61  ;;  %v1111_v58 = vsel %vm1028_vm15, %v1110_v28, %v1109_v25  ;;  %vm3138_vm13 = vcmp.lt.s32.totalorder %v3137_v53, 0 }
 0x213   : > { %v1377_v4 = vsel %vm1371_vm11, %v1374_v41, %v1376_v38  ;;  %v1396_v18 = vadd.s32 1, %v4892_v39  ;;  %v1929_v32 = vsel %vm3138_vm13, 0, %v3137_v53  ;;  %v4926_v48 = vand.u32 8388607, %v5476_v60 }
 0x214   : > { %vm2181_vm14 = vcmp.gt.s32.totalorder %v2180_v21, 0  ;;  %v5475_v1 = vand.u32 2147483647, %v4914_v43  ;;  %v1930_v61 = vsub.s32 32, %v1929_v32  ;;  %v1931_v52 = vshll.u32 %v4854_v42, %v1929_v32 }
 0x215   : > { %v1934_v63 = vsub.s32 4294967266, %v1929_v32  ;;  %v4933_v31 = vsel %vm1860_vm2, %v1944_v3, %v4840_v37  ;;  %v1114_v25 = vsel %vm4747_vm9, %v4434_v23, %v1111_v58  ;;  %v1393_v28 = vmul.u32 %v1386_v62, %v1377_v4 }
 0x216   : > { %5556 = vst [vmem:[#allocation27_spill] sm:$0xff] %v4933_v31  ;;  %vm1395_vm15 = vc.u32 %v4906_v51, %v4891_v47  ;;  %v2182_v41 = vsel %vm2181_vm14, %v2180_v21, 0  ;;  %v1932_v38 = vshrl.u32 %v1914_v27, %v1930_v61  ;;  %v1237_v42 = vand.u32 2139095040, %v4914_v43 }
 0x217   : > { %v1935_v54 = vadd.s32 127, %v1934_v63  ;;  %v1397_v53 = vsel %vm1395_vm15, %v1396_v18, %v4892_v39  ;;  %v2178_v7 = vor.u32 8388608, %v4926_v48  ;;  %v2184_v55 = vand.u32 31, %v2182_v41 }
 0x218   : > { %v1398_v3 = vadd.s32 %v1397_v53, %v1393_v28  ;;  %3523 = vcosq.f32 %v1114_v25  ;;  %v1933_v62 = vor.u32 %v1932_v38, %v1931_v52  ;;  %v4948_v21 = vand.u32 8388607, %v5475_v1 }
 0x219   : > { %v1936_v8 = vshll.u32 %v1935_v54, 23  ;;  %v2185_v58 = vsub.s32 32, %v2184_v55  ;;  %v2187_v39 = vshll.u32 %v5525_v0, %v2184_v55  ;;  %v2190_v4 = vshll.u32 %v5526_v29, %v2184_v55 }
 0x21a   : > { %v1399_v27 = vadd.s32 536870912, %v1398_v3  ;;  %v2183_v32 = vshrl.u32 %v2182_v41, 5  ;;  %v2196_v61 = vshll.u32 %v5528_v36, %v2184_v55  ;;  %v1238_v63 = vshrl.u32 %v1237_v42, 23 }
 0x21b   : > { %v1937_v18 = vor.u32 4788187, %v1936_v8  ;;  %vm1340_vm1 = vcmp.lt.s32.totalorder %v4659_v44, 0  ;;  %v2188_v52 = vshrl.u32 %v5526_v29, %v2185_v58  ;;  %v2191_v28 = vshrl.u32 %v5527_v33, %v2185_v58 }
 0x21c   : > { %v1400_v48 = vshrl.u32 %v1399_v27, 30  ;;  %v2193_v38 = vshll.u32 %v5527_v33, %v2184_v55  ;;  %v1940_v54 = vcvt.s32.f32 %v1933_v62  ;;  %v2194_v53 = vshrl.u32 %v5528_v36, %v2185_v58 }
 0x21d   : > { %v2197_v37 = vshrl.u32 %v5516_v9, %v2185_v58  ;;  %v2199_v8 = vshll.u32 %v5516_v9, %v2184_v55  ;;  %v1938_v41 = vand.u32 2147483647, %v1937_v18  ;;  %v2189_v60 = vor.u32 %v2188_v52, %v2187_v39 }
 0x21e   : > { %v1401_v1 = vshll.u32 %v1400_v48, 30  ;;  %v2192_v42 = vor.u32 %v2191_v28, %v2190_v4  ;;  %v2186_v17 = vshrl.u32 %v5525_v0, %v2185_v58  ;;  %v2200_v56 = vshrl.u32 %v5517_v45, %v2185_v58 }
 0x21f   : > { %v2198_v27 = vor.u32 %v2197_v37, %v2196_v61  ;;  %vm2202_vm3 = vcmp.lt.s32.totalorder %v2183_v32, 1  ;;  %v5557_v6 = vand.u32 2147483647, %v4659_v44  ;;  %v2195_v15 = vor.u32 %v2194_v53, %v2193_v38 }
 0x220   : > { %v4968_v12 = vsub.s32 %v1398_v3, %v1401_v1  ;;  %vm2205_vm7 = vcmp.lt.s32.totalorder %v2183_v32, 4  ;;  %v3111_v55 = vadd.s32 4294967169, %v1238_v63  ;;  %v1424_v18 = vsub.s32 4, %v1400_v48 }
 0x221   : > { %vm4964_vm9 = vcmp.le.f32.partialorder %v5557_v6, 0.7853982  ;;  %v2201_v39 = vor.u32 %v2200_v56, %v2199_v8  ;;  %vm2203_vm8 = vcmp.lt.s32.totalorder %v2183_v32, 2  ;;  %vm2204_vm0 = vcmp.lt.s32.totalorder %v2183_v32, 3 }
 0x222   : > { %v1941_v4 = vmul.f32 %v1940_v54, %v1938_v41  ;;  %v1404_v37 = vsub.s32 0, %v4968_v12  ;;  %v2207_v58 = vsel %vm2205_vm7, %v2195_v15, 2102212464  ;;  %v2210_v61 = vsel %vm2202_vm3, %v2189_v60, %v2192_v42  ;;  %v4973_v6 = vpop.eup %3523 }
 0x223   : > { %3525 = vsinq.f32 %v1114_v25  ;;  %v2206_v1 = vsel %vm2202_vm3, %v2186_v17, %v2189_v60  ;;  %v2211_v3 = vsel %vm2205_vm7, %v2198_v27, 920167782  ;;  %v2218_v52 = vshll.u32 %v2178_v7, 8 }
 0x224   : > { %v3116_v63 = vmin.u32 %v1404_v37, %v4968_v12  ;;  %v2208_v56 = vsel %vm2204_vm0, %v2192_v42, %v2207_v58  ;;  %v2212_v28 = vsel %vm2204_vm0, %v2195_v15, %v2211_v3  ;;  %v2214_v38 = vsel %vm2202_vm3, %v2192_v42, %v2195_v15 }
 0x225   : > { %v4983_v54 = vsel %vm1340_vm1, %v1424_v18, %v1400_v48  ;;  %v2213_v53 = vsel %vm2203_vm8, %v2210_v61, %v2212_v28  ;;  %v2215_v25 = vsel %vm2205_vm7, %v2201_v39, 1326507024  ;;  %v1242_v17 = vor.u32 8388608, %v4948_v21  ;;  %v5001_v21 = vld [vmem:[%s5435_s3 + $0x8] ss:$0 sps:$4 sm:$0xff]  }
 0x226   : > { %v1942_v60 = vxor.u32 2147483648, %v1941_v4  ;;  %v1406_v7 = vclz %v3116_v63  ;;  %v2216_v8 = vsel %vm2204_vm0, %v2198_v27, %v2215_v25  ;;  %v1244_v41 = vadd.s32 1, %v3111_v55 }
 0x227   : > { %v2209_v37 = vsel %vm2203_vm8, %v2206_v1, %v2208_v56  ;;  %v2217_v58 = vsel %vm2203_vm8, %v2214_v38, %v2216_v8  ;;  %v4991_v15 = vmul.u32.u64.low %v2218_v52, %v2213_v53  ;;  %v4992_v42 = vmul.u32.u64.high %v2218_v52, %v2213_v53, %v4991_v15 }
 0x228   : > { %v3117_v48 = vadd.s32 4294967294, %v1406_v7  ;;  %v4995_v18 = vmul.u32.u64.low %v2218_v52, %v2217_v58  ;;  %v4996_v61 = vmul.u32.u64.high %v2218_v52, %v2217_v58, %v4995_v18  ;;  %vm1245_vm4 = vcmp.gt.s32.totalorder %v1244_v41, 0 }
 0x229   : > { %v1394_v27 = vadd.s32 %v4891_v47, %v4906_v51  ;;  %v1246_v55 = vsel %vm1245_vm4, %v1244_v41, 0  ;;  %v5008_v39 = vshll.u32 %v1242_v17, 8  ;;  %v1943_v1 = vsel %vm1860_vm2, %v1942_v60, %v1941_v4 }
 0x22a   : > { %vm3118_vm5 = vcmp.lt.s32.totalorder %v3117_v48, 0  ;;  %v2225_v3 = vmul.u32 %v2218_v52, %v2209_v37  ;;  %v1248_v63 = vand.u32 31, %v1246_v55  ;;  %v2228_v28 = vadd.s32 1, %v4992_v42 }
 0x22b   : > { %v1409_v56 = vsel %vm3118_vm5, 0, %v3117_v48  ;;  %vm2326_vm6 = vcmask 1043456   ;;  %v2069_v25 = vand.u32 2139095040, %v4917_v50  ;;  %vm2227_vm2 = vc.u32 %v4996_v61, %v4991_v15 }
 0x22c   : > { %v1410_v47 = vsub.s32 32, %v1409_v56  ;;  %v1411_v51 = vshll.u32 %v4968_v12, %v1409_v56  ;;  %v1414_v53 = vsub.s32 4294967266, %v1409_v56  ;;  %3365 = vmatprep.subr.msk.bf16.mxu1 %vm2326_vm6, %v5001_v21  ;;  %v1249_v4 = vsub.s32 32, %v1248_v63 }
 0x22d   : > { %v5018_v17 = vpop.eup %3525  ;;  %v1251_v52 = vshll.u32 %v5525_v0, %v1248_v63  ;;  %v1254_v60 = vshll.u32 %v5526_v29, %v1248_v63  ;;  %v2229_v12 = vsel %vm2227_vm2, %v2228_v28, %v4992_v42  ;;  %v1257_v41 = vshll.u32 %v5527_v33, %v1248_v63 }
 0x22e   : > { %v1412_v7 = vshrl.u32 %v1394_v27, %v1410_v47  ;;  %v1415_v8 = vadd.s32 127, %v1414_v53  ;;  %v2230_v37 = vadd.s32 %v2229_v12, %v2225_v3  ;;  %v1247_v58 = vshrl.u32 %v1246_v55, 5 }
 0x22f   : > { %v1252_v48 = vshrl.u32 %v5526_v29, %v1249_v4  ;;  %v1255_v18 = vshrl.u32 %v5527_v33, %v1249_v4  ;;  %vm2172_vm10 = vcmp.lt.s32.totalorder %v4803_v19, 0  ;;  %v1258_v38 = vshrl.u32 %v5528_v36, %v1249_v4 }
 0x230   : > { %v1413_v56 = vor.u32 %v1412_v7, %v1411_v51  ;;  %v1416_v32 = vshll.u32 %v1415_v8, 23  ;;  %v1260_v59 = vshll.u32 %v5528_v36, %v1248_v63  ;;  %v2231_v27 = vadd.s32 536870912, %v2230_v37 }
 0x231   : > { %v1250_v47 = vshrl.u32 %v5525_v0, %v1249_v4  ;;  %v1253_v42 = vor.u32 %v1252_v48, %v1251_v52  ;;  %v1261_v28 = vshrl.u32 %v5516_v9, %v1249_v4  ;;  %v1256_v55 = vor.u32 %v1255_v18, %v1254_v60 }
 0x232   : > { %v1417_v3 = vor.u32 4788187, %v1416_v32  ;;  %v1259_v53 = vor.u32 %v1258_v38, %v1257_v41  ;;  %v1263_v12 = vshll.u32 %v5516_v9, %v1248_v63  ;;  %v2232_v30 = vshrl.u32 %v2231_v27, 30 }
 0x233   : > { %v1262_v51 = vor.u32 %v1261_v28, %v1260_v59  ;;  %v1264_v7 = vshrl.u32 %v5517_v45, %v1249_v4  ;;  %vm1266_vm11 = vcmp.lt.s32.totalorder %v1247_v58, 1  ;;  %v1420_v31 = vcvt.s32.f32 %v1413_v56 }
 0x234   : > { %v1418_v8 = vand.u32 2147483647, %v1417_v3  ;;  %v5560_v49 = vand.u32 2147483647, %v4803_v19  ;;  %vm1268_vm14 = vcmp.lt.s32.totalorder %v1247_v58, 3  ;;  %vm1269_vm15 = vcmp.lt.s32.totalorder %v1247_v58, 4 }
 0x235   : > { %v1946_v32 = vsel %vm4873_vm12, %v4527_v2, %v1943_v1  ;;  %v2233_v63 = vshll.u32 %v2232_v30, 30  ;;  %v1265_v38 = vor.u32 %v1264_v7, %v1263_v12  ;;  %vm1267_vm3 = vcmp.lt.s32.totalorder %v1247_v58, 2 }
 0x236   : > { %vm5037_vm13 = vcmp.le.f32.partialorder %v5560_v49, 0.7853982  ;;  %v1421_v59 = vmul.f32 %v1420_v31, %v1418_v8  ;;  %v1271_v4 = vsel %vm1269_vm15, %v1259_v53, 2102212464  ;;  %v1274_v52 = vsel %vm1266_vm11, %v1253_v42, %v1256_v55 }
 0x237   : > { %v1275_v60 = vsel %vm1269_vm15, %v1262_v51, 920167782  ;;  %v5047_v49 = vsub.s32 %v2230_v37, %v2233_v63  ;;  %v2256_v41 = vsub.s32 4, %v2232_v30  ;;  %v5563_v18 = vand.u32 2147483647, %v4917_v50 }
 0x238   : > { %v1276_v48 = vsel %vm1268_vm14, %v1259_v53, %v1275_v60  ;;  %v1422_v27 = vxor.u32 2147483648, %v1421_v59  ;;  %v1270_v1 = vsel %vm1266_vm11, %v1250_v47, %v1253_v42  ;;  %v2070_v31 = vshrl.u32 %v2069_v25, 23 }
 0x239   : > { %v2073_v56 = vand.u32 8388607, %v5563_v18  ;;  %v1277_v28 = vsel %vm1267_vm3, %v1274_v52, %v1276_v48  ;;  %v2236_v3 = vsub.s32 0, %v5047_v49  ;;  %v1272_v12 = vsel %vm1268_vm14, %v1256_v55, %v1271_v4 }
 0x23a   : > { %v1278_v7 = vsel %vm1266_vm11, %v1256_v55, %v1259_v53  ;;  %v1279_v37 = vsel %vm1269_vm15, %v1265_v38, 1326507024  ;;  %v1423_v8 = vsel %vm1340_vm1, %v1422_v27, %v1421_v59  ;;  %v5564_v25 = vsel %vm4964_vm9, 0, %v4983_v54 }
 0x23b   : > { %v1280_v63 = vsel %vm1268_vm14, %v1262_v51, %v1279_v37  ;;  %v5062_v60 = vmul.u32.u64.low %v5008_v39, %v1277_v28  ;;  %v5063_v18 = vmul.u32.u64.high %v5008_v39, %v1277_v28, %v5062_v60  ;;  %v5070_v47 = vadd.s32 3, %v5564_v25 }
 0x23c   : > { %v3148_v42 = vmin.u32 %v2236_v3, %v5047_v49  ;;  %v5075_v55 = vsel %vm2172_vm10, %v2256_v41, %v2232_v30  ;;  %v1281_v53 = vsel %vm1267_vm3, %v1278_v7, %v1280_v63  ;;  %v1426_v51 = vsel %vm4964_vm9, %v4659_v44, %v1423_v8 }
 0x23d   : > { %v5082_v38 = vmul.u32.u64.low %v5008_v39, %v1281_v53  ;;  %v5083_v59 = vmul.u32.u64.high %v5008_v39, %v1281_v53, %v5082_v38  ;;  %v3143_v4 = vadd.s32 4294967169, %v2070_v31  ;;  %3527 = vcosq.f32 %v1946_v32 }
 0x23e   : > { %v2238_v54 = vclz %v3148_v42  ;;  %v1273_v52 = vsel %vm1267_vm3, %v1270_v1, %v1272_v12  ;;  %v2328_v48 = vsel %vm2326_vm6, %v5001_v21, 0  ;;  %3529 = vsinq.f32 %v1946_v32 }
 0x23f   : > { %v1292_v30 = vadd.s32 1, %v5063_v18  ;;  %v2074_v41 = vor.u32 8388608, %v2073_v56  ;;  %v2076_v27 = vadd.s32 1, %v3143_v4  ;;  %3286 = vmatpush3.bf16.msra.mxu1 %v2328_v48  ;;  %3531 = vcosq.f32 %v1426_v51 }
 0x240   : > { %v2226_v62 = vadd.s32 %v4991_v15, %v4996_v61  ;;  %v3149_v28 = vadd.s32 4294967294, %v2238_v54  ;;  %v2259_v31 = vsel %vm5037_vm13, 0, %v5075_v55  ;;  %3533 = vsinq.f32 %v1426_v51  ;;  %v5576_v55 = vld [vmem:[#allocation12_spill] sm:$0xff] }
 0x241   : > { %v1289_v58 = vmul.u32 %v5008_v39, %v1273_v52  ;;  %vm1291_vm1 = vc.u32 %v5083_v59, %v5062_v60  ;;  %vm2077_vm9 = vcmp.gt.s32.totalorder %v2076_v27, 0  ;;  %v5099_v56 = vand.u32 3, %v4292_v40 }
 0x242   : > { %vm3150_vm7 = vcmp.lt.s32.totalorder %v3149_v28, 0  ;;  %v1293_v21 = vsel %vm1291_vm1, %v1292_v30, %v5063_v18  ;;  %v2078_v32 = vsel %vm2077_vm9, %v2076_v27, 0  ;;  %v5101_v3 = vshll.u32 %v2074_v41, 8 }
 0x243   : > { %v2241_v15 = vsel %vm3150_vm7, 0, %v3149_v28  ;;  %v1294_v61 = vadd.s32 %v1293_v21, %v1289_v58  ;;  %v2080_v1 = vand.u32 31, %v2078_v32  ;;  %v707_v37 = vxor.u32 2147483648, %v4351_v35 }
 0x244   : > { %v2242_v12 = vsub.s32 32, %v2241_v15  ;;  %v2243_v7 = vshll.u32 %v5047_v49, %v2241_v15  ;;  %v2246_v39 = vsub.s32 4294967266, %v2241_v15  ;;  %v2079_v63 = vshrl.u32 %v2078_v32, 5 }
 0x245   : > { %v1295_v8 = vadd.s32 536870912, %v1294_v61  ;;  %v2081_v25 = vsub.s32 32, %v2080_v1  ;;  %v2083_v18 = vshll.u32 %v5525_v0, %v2080_v1  ;;  %v2086_v40 = vshll.u32 %v5526_v29, %v2080_v1 }
 0x246   : > { %v2244_v42 = vshrl.u32 %v2226_v62, %v2242_v12  ;;  %v2247_v53 = vadd.s32 127, %v2246_v39  ;;  %v2089_v51 = vshll.u32 %v5527_v33, %v2080_v1  ;;  %v2092_v49 = vshll.u32 %v5528_v36, %v2080_v1 }
 0x247   : > { %v1296_v38 = vshrl.u32 %v1295_v8, 30  ;;  %v2084_v4 = vshrl.u32 %v5526_v29, %v2081_v25  ;;  %v2087_v54 = vshrl.u32 %v5527_v33, %v2081_v25  ;;  %v5111_v52 = vpop.eup %3527  ;;  %v2090_v41 = vshrl.u32 %v5528_v36, %v2081_v25 }
 0x248   : > { %v2245_v48 = vor.u32 %v2244_v42, %v2243_v7  ;;  %v2248_v30 = vshll.u32 %v2247_v53, 23  ;;  %v2093_v27 = vshrl.u32 %v5516_v9, %v2081_v25  ;;  %v5115_v62 = vpop.eup %3529  ;;  %v2082_v58 = vshrl.u32 %v5525_v0, %v2081_v25 }
 0x249   : > { %v1297_v28 = vshll.u32 %v1296_v38, 30  ;;  %v2085_v21 = vor.u32 %v2084_v4, %v2083_v18  ;;  %v710_v29 = vxor.u32 2147483648, %v4340_v14  ;;  %v5119_v32 = vpop.eup %3531  ;;  %v2088_v12 = vor.u32 %v2087_v54, %v2086_v40 }
 0x24a   : > { %v2249_v33 = vor.u32 4788187, %v2248_v30  ;;  %v2252_v15 = vcvt.s32.f32 %v2245_v48  ;;  %v2091_v39 = vor.u32 %v2090_v41, %v2089_v51  ;;  %v5121_v7 = vpop.eup %3533  ;;  %vm1236_vm8 = vcmp.lt.s32.totalorder %v4914_v43, 0 }
 0x24b   : > { %v5124_v36 = vsub.s32 %v1294_v61, %v1297_v28  ;;  %v2094_v8 = vor.u32 %v2093_v27, %v2092_v49  ;;  %v2095_v42 = vshll.u32 %v5516_v9, %v2080_v1  ;;  %v2096_v0 = vshrl.u32 %v5517_v45, %v2081_v25 }
 0x24c   : > { %v2250_v18 = vand.u32 2147483647, %v2249_v33  ;;  %v1290_v53 = vadd.s32 %v5062_v60, %v5083_v59  ;;  %v1320_v4 = vsub.s32 4, %v1296_v38  ;;  %vm2098_vm0 = vcmp.lt.s32.totalorder %v2079_v63, 1 }
 0x24d   : > { %v1300_v40 = vsub.s32 0, %v5124_v36  ;;  %v2097_v51 = vor.u32 %v2096_v0, %v2095_v42  ;;  %vm2099_vm4 = vcmp.lt.s32.totalorder %v2079_v63, 2  ;;  %vm2100_vm5 = vcmp.lt.s32.totalorder %v2079_v63, 3 }
 0x24e   : > { %v2253_v54 = vmul.f32 %v2252_v15, %v2250_v18  ;;  %v5565_v61 = vand.u32 2147483647, %v4914_v43  ;;  %vm2101_vm2 = vcmp.lt.s32.totalorder %v2079_v63, 4  ;;  %v2102_v9 = vsel %vm2098_vm0, %v2082_v58, %v2085_v21 }
 0x24f   : > { %v2106_v45 = vsel %vm2098_vm0, %v2085_v21, %v2088_v12  ;;  %v3112_v1 = vmin.u32 %v1300_v40, %v5124_v36  ;;  %v2103_v60 = vsel %vm2101_vm2, %v2091_v39, 2102212464  ;;  %v2107_v59 = vsel %vm2101_vm2, %v2094_v8, 920167782 }
 0x250   : > { %vm5133_vm6 = vcmp.le.f32.partialorder %v5565_v61, 0.7853982  ;;  %v2110_v25 = vsel %vm2098_vm0, %v2088_v12, %v2091_v39  ;;  %vm702_vm11 = vweird.f32 %v3771_v24  ;;  %v2254_v48 = vxor.u32 2147483648, %v2253_v54 }
 0x251   : > { %v2104_v30 = vsel %vm2100_vm5, %v2088_v12, %v2103_v60  ;;  %v2108_v41 = vsel %vm2100_vm5, %v2091_v39, %v2107_v59  ;;  %v2111_v27 = vsel %vm2101_vm2, %v2097_v51, 1326507024  ;;  %v1302_v28 = vclz %v3112_v1 }
 0x252   : > { %v2109_v33 = vsel %vm2099_vm4, %v2106_v45, %v2108_v41  ;;  %v2112_v15 = vsel %vm2100_vm5, %v2094_v8, %v2111_v27  ;;  %vm706_vm14 = vcmp.eq.s32.totalorder %v5099_v56, 0  ;;  %v2105_v58 = vsel %vm2099_vm4, %v2102_v9, %v2104_v30 }
 0x253   : > { %v2113_v21 = vsel %vm2099_vm4, %v2110_v25, %v2112_v15  ;;  %v5147_v42 = vmul.u32.u64.low %v5101_v3, %v2109_v33  ;;  %v5148_v0 = vmul.u32.u64.high %v5101_v3, %v2109_v33, %v5147_v42  ;;  %v3113_v12 = vadd.s32 4294967294, %v1302_v28 }
 0x254   : > { %v5152_v39 = vmul.u32.u64.low %v5101_v3, %v2113_v21  ;;  %v5153_v18 = vmul.u32.u64.high %v5101_v3, %v2113_v21, %v5152_v39  ;;  %v708_v8 = vsel %vm706_vm14, %v4340_v14, %v707_v37  ;;  %v2255_v40 = vsel %vm2172_vm10, %v2254_v48, %v2253_v54 }
 0x255   : > { %v1321_v63 = vsel %vm1236_vm8, %v1320_v4, %v1296_v38  ;;  %vm705_vm15 = vcmp.lt.s32.totalorder %v5099_v56, 2  ;;  %vm709_vm3 = vcmp.eq.s32.totalorder %v5099_v56, 2  ;;  %vm3114_vm1 = vcmp.lt.s32.totalorder %v3113_v12, 0 }
 0x256   : > { %v2121_v51 = vmul.u32 %v5101_v3, %v2105_v58  ;;  %v711_v61 = vsel %vm709_vm3, %v710_v29, %v4351_v35  ;;  %v808_v9 = vand.u32 3, %v4093_v5  ;;  %v1305_v45 = vsel %vm3114_vm1, 0, %v3113_v12 }
 0x257   : > { %v2124_v14 = vadd.s32 1, %v5148_v0  ;;  %v712_v37 = vsel %vm705_vm15, %v708_v8, %v711_v61  ;;  %v811_v54 = vxor.u32 2147483648, %v4157_v13  ;;  %v5172_v38 = vsel %vm5037_vm13, %v4803_v19, %v2255_v40 }
 0x258   : > { %v1306_v4 = vsub.s32 32, %v1305_v45  ;;  %v1310_v56 = vsub.s32 4294967266, %v1305_v45  ;;  %v1323_v3 = vsel %vm5133_vm6, 0, %v1321_v63  ;;  %vm2068_vm10 = vcmp.lt.s32.totalorder %v4917_v50, 0 }
 0x259   : > { %v1307_v5 = vshll.u32 %v5124_v36, %v1305_v45  ;;  %vm2123_vm9 = vc.u32 %v5153_v18, %v5147_v42  ;;  %v713_v35 = vsel %vm702_vm11, nan, %v712_v37  ;;  %vm806_vm7 = vweird.f32 %v3765_v20 }
 0x25a   : > { %v1308_v29 = vshrl.u32 %v1290_v53, %v1306_v4  ;;  %v1311_v1 = vadd.s32 127, %v1310_v56  ;;  %v2125_v60 = vsel %vm2123_vm9, %v2124_v14, %v5148_v0  ;;  %vm810_vm0 = vcmp.eq.s32.totalorder %v808_v9, 0  ;;  %v5572_v4 = vld [vmem:[#allocation18_spill] sm:$0xff] }
 0x25b   : > { %v5568_v59 = vand.u32 2147483647, %v4917_v50  ;;  %v2126_v36 = vadd.s32 %v2125_v60, %v2121_v51  ;;  %vm809_vm5 = vcmp.lt.s32.totalorder %v808_v9, 2  ;;  %v812_v48 = vsel %vm810_vm0, %v4142_v34, %v811_v54 }
 0x25c   : > { %v814_v24 = vxor.u32 2147483648, %v4142_v34  ;;  %v1309_v30 = vor.u32 %v1308_v29, %v1307_v5  ;;  %v1312_v41 = vshll.u32 %v1311_v1, 23  ;;  %vm813_vm2 = vcmp.eq.s32.totalorder %v808_v9, 2 }
 0x25d   : > { %vm5186_vm4 = vcmp.le.f32.partialorder %v5568_v59, 0.7853982  ;;  %v1120_v53 = vand.u32 3, %v4826_v26  ;;  %v2127_v27 = vadd.s32 536870912, %v2126_v36  ;;  %v1123_v33 = vxor.u32 2147483648, %v5018_v17 }
 0x25e   : > { %v815_v28 = vsel %vm813_vm2, %v814_v24, %v4157_v13  ;;  %v1126_v15 = vxor.u32 2147483648, %v4973_v6  ;;  %v1313_v58 = vor.u32 4788187, %v1312_v41  ;;  %v1316_v21 = vcvt.s32.f32 %v1309_v30 }
 0x25f   : > { %v816_v0 = vsel %vm809_vm5, %v812_v48, %v815_v28  ;;  %vm2301_vm11 = vcmask 195584   ;;  %v2128_v12 = vshrl.u32 %v2127_v27, 30  ;;  %vm1122_vm14 = vcmp.eq.s32.totalorder %v1120_v53, 0 }
 0x260   : > { %v817_v34 = vsel %vm806_vm7, nan, %v816_v0  ;;  %vm1125_vm15 = vcmp.eq.s32.totalorder %v1120_v53, 2  ;;  %v1314_v39 = vand.u32 2147483647, %v1313_v58  ;;  %v1124_v26 = vsel %vm1122_vm14, %v4973_v6, %v1123_v33  ;;  %v5578_v33 = vld [vmem:[#allocation15_spill] sm:$0xff]  ;;  %v5579_v58 = vld [vmem:[#allocation6_spill] sm:$0xff] }
 0x261   : > { %v2274_v8 = vpack.c.bf16 %v817_v34, %v713_v35  ;;  %v1127_v13 = vsel %vm1125_vm15, %v1126_v15, %v5018_v17  ;;  %v1327_v40 = vadd.s32 3, %v1323_v3  ;;  %v2129_v63 = vshll.u32 %v2128_v12, 30  ;;  %v5580_v34 = vld [vmem:[#allocation5_spill] sm:$0xff] }
 0x262   : > { %v2152_v51 = vsub.s32 4, %v2128_v12  ;;  %vm1121_vm3 = vcmp.lt.s32.totalorder %v1120_v53, 2  ;;  %v1317_v61 = vmul.f32 %v1316_v21, %v1314_v39  ;;  %v1224_v45 = vand.u32 3, %v4651_v11  ;;  %v5573_v11 = vld [vmem:[#allocation13_spill] sm:$0xff] }
 0x263   : > { %3287 = vmatprep.mubr.msk.bf16.mxu1 %vm2301_vm11, %v2274_v8  ;;  %v1128_v9 = vsel %vm1121_vm3, %v1124_v26, %v1127_v13  ;;  %v1227_v20 = vxor.u32 2147483648, %v4852_v57  ;;  %3535 = vcosq.f32 %v5172_v38  ;;  %v5204_v14 = vsub.s32 %v2126_v36, %v2129_v63  ;;  %v5581_v13 = vld [vmem:[#allocation8_spill] sm:$0xff]  ;;  %v5582_v63 = vld [vmem:[#allocation11_spill] sm:$0xff] }
 0x264   : > { %v2153_v6 = vsel %vm2068_vm10, %v2152_v51, %v2128_v12  ;;  %v5571_v17 = vpack.c.bf16 %v4621_v10, %v4631_v22  ;;  %v1230_v37 = vxor.u32 2147483648, %v4850_v46  ;;  %v1318_v54 = vxor.u32 2147483648, %v1317_v61 }
 0x265   : > { %vm1118_vm1 = vweird.f32 %v5572_v4  ;;  %vm1222_vm9 = vweird.f32 %v5573_v11  ;;  %vm1226_vm7 = vcmp.eq.s32.totalorder %v1224_v45, 0  ;;  %v2132_v56 = vsub.s32 0, %v5204_v14 }
 0x266   : > { %3288 = vmatmul.mubr.msk.bf16.vlgmr.msra.gmra.mrb[8].mxu1 %vm2301_vm11, %v5571_v17  ;;  %v1129_v3 = vsel %vm1118_vm1, nan, %v1128_v9  ;;  %v1228_v5 = vsel %vm1226_vm7, %v4850_v46, %v1227_v20  ;;  %vm1229_vm0 = vcmp.eq.s32.totalorder %v1224_v45, 2  ;;  %v1319_v35 = vsel %vm1236_vm8, %v1318_v54, %v1317_v61  ;;  %v5574_v46 = vld [vmem:[#allocation27_spill] sm:$0xff]  ;;  %v5583_v61 = vld [vmem:[#allocation10_spill] sm:$0xff] }
 0x267   : > { %v2155_v10 = vsel %vm5186_vm4, 0, %v2153_v6  ;;  %vm1225_vm5 = vcmp.lt.s32.totalorder %v1224_v45, 2  ;;  %v1231_v22 = vsel %vm1229_vm0, %v1230_v37, %v4852_v57  ;;  %v1322_v29 = vsel %vm5133_vm6, %v4914_v43, %v1319_v35  ;;  %v5584_v35 = vld [vmem:[#allocation20_spill] sm:$0xff] }
 0x268   : > { %v3144_v1 = vmin.u32 %v2132_v56, %v5204_v14  ;;  %v1232_v60 = vsel %vm1225_vm5, %v1228_v5, %v1231_v22  ;;  %v1432_v59 = vand.u32 3, %v5070_v47  ;;  %v5575_v36 = vsel %vm4873_vm12, 0, %v5574_v46  ;;  %v5585_v22 = vld [vmem:[#allocation24_spill] sm:$0xff] }
 0x269   : > { %v5231_v48 = vadd.s32 3, %v5575_v36  ;;  %3537 = vcosq.f32 %v1322_v29  ;;  %v1233_v24 = vsel %vm1222_vm9, nan, %v1232_v60  ;;  %v5235_v57 = vand.u32 3, %v1327_v40 }
 0x26a   : > { %v5241_v49 = vadd.s32 3, %v2259_v31  ;;  %3539 = vsinq.f32 %v1322_v29  ;;  %v2134_v47 = vclz %v3144_v1  ;;  %v2276_v30 = vpack.c.bf16 %v1233_v24, %v1129_v3 }
 0x26b   : > { %3541 = vsinq.f32 %v5172_v38  ;;  %v2122_v16 = vadd.s32 %v5147_v42, %v5153_v18  ;;  %v5246_v41 = vadd.s32 3, %v2155_v10  ;;  %v1435_v53 = vxor.u32 2147483648, %v5121_v7  ;;  %v5577_v38 = vld [vmem:[#allocation16_spill] sm:$0xff] }
 0x26c   : > { %v3145_v27 = vadd.s32 4294967294, %v2134_v47  ;;  %3291 = vmatprep.mubr.msk.bf16.mxu1 %vm2301_vm11, %v2276_v30  ;;  %vm1433_vm12 = vcmp.lt.s32.totalorder %v1432_v59, 2  ;;  %v1438_v23 = vxor.u32 2147483648, %v5119_v32  ;;  %v1536_v31 = vand.u32 3, %v5576_v55 }
 0x26d   : > { %vm1333_vm13 = vcmp.eq.s32.totalorder %v5235_v57, 2  ;;  %vm1434_vm8 = vcmp.eq.s32.totalorder %v1432_v59, 0  ;;  %vm1437_vm6 = vcmp.eq.s32.totalorder %v1432_v59, 2  ;;  %v1539_v28 = vxor.u32 2147483648, %v5577_v38  ;;  %v5255_v18 = vpop.eup %3535 }
 0x26e   : > { %v1542_v42 = vxor.u32 2147483648, %v5578_v33  ;;  %vm3146_vm2 = vcmp.lt.s32.totalorder %v3145_v27, 0  ;;  %vm1330_vm14 = vcmp.eq.s32.totalorder %v5235_v57, 0  ;;  %vm1430_vm15 = vweird.f32 %v4659_v44 }
 0x26f   : > { %v1436_v15 = vsel %vm1434_vm8, %v5119_v32, %v1435_v53  ;;  %vm1534_vm3 = vweird.f32 %v5579_v58  ;;  %vm1538_vm1 = vcmp.eq.s32.totalorder %v1536_v31, 0  ;;  %v2137_v21 = vsel %vm3146_vm2, 0, %v3145_v27 }
 0x270   : > { %vm1329_vm9 = vcmp.lt.s32.totalorder %v5235_v57, 2  ;;  %v1439_v0 = vsel %vm1437_vm6, %v1438_v23, %v5121_v7  ;;  %v1540_v12 = vsel %vm1538_vm1, %v5578_v33, %v1539_v28  ;;  %vm1638_vm7 = vweird.f32 %v5580_v34  ;;  %v5586_v23 = vld [vmem:[#allocation23_spill] sm:$0xff]  ;;  %v5587_v28 = vld [vmem:[#allocation14_spill] sm:$0xff]  ;;  %v5590_v34 = vld [vmem:[#allocation9_spill] sm:$0xff] }
 0x271   : > { %v2138_v39 = vsub.s32 32, %v2137_v21  ;;  %v2139_v8 = vshll.u32 %v5204_v14, %v2137_v21  ;;  %v2142_v26 = vsub.s32 4294967266, %v2137_v21  ;;  %vm1326_vm0 = vweird.f32 %v4914_v43  ;;  %v5589_v21 = vld [vmem:[#allocation19_spill] sm:$0xff] }
 0x272   : > { %vm1541_vm5 = vcmp.eq.s32.totalorder %v1536_v31, 2  ;;  %v1640_v40 = vand.u32 3, %v5581_v13  ;;  %v1643_v51 = vxor.u32 2147483648, %v5582_v63  ;;  %v1646_v9 = vxor.u32 2147483648, %v5583_v61 }
 0x273   : > { %v1543_v32 = vsel %vm1541_vm5, %v1542_v42, %v5577_v38  ;;  %v2140_v7 = vshrl.u32 %v2122_v16, %v2138_v39  ;;  %v2143_v45 = vadd.s32 127, %v2142_v26  ;;  %v1440_v20 = vsel %vm1433_vm12, %v1436_v15, %v1439_v0  ;;  %v3538_v6 = vpop.eup %3537  ;;  %v5588_v42 = vld [vmem:[#allocation21_spill] sm:$0xff] }
 0x274   : > { %vm1537_vm8 = vcmp.lt.s32.totalorder %v1536_v31, 2  ;;  %vm1641_vm6 = vcmp.lt.s32.totalorder %v1640_v40, 2  ;;  %vm1642_vm2 = vcmp.eq.s32.totalorder %v1640_v40, 0  ;;  %vm1645_vm1 = vcmp.eq.s32.totalorder %v1640_v40, 2  ;;  %v3540_v14 = vpop.eup %3539 }
 0x275   : > { %v1544_v17 = vsel %vm1537_vm8, %v1540_v12, %v1543_v32  ;;  %v2141_v37 = vor.u32 %v2140_v7, %v2139_v8  ;;  %v2144_v54 = vshll.u32 %v2143_v45, 23  ;;  %v1334_v4 = vxor.u32 2147483648, %v3538_v6  ;;  %v5273_v56 = vpop.eup %3541  ;;  %v5591_v8 = vld [vmem:[#allocation7_spill] sm:$0xff] }
 0x276   : > { %v1644_v11 = vsel %vm1642_vm2, %v5583_v61, %v1643_v51  ;;  %v1331_v3 = vxor.u32 2147483648, %v3540_v14  ;;  %v1647_v5 = vsel %vm1645_vm1, %v1646_v9, %v5582_v63  ;;  %v1744_v10 = vand.u32 3, %v5584_v35 }
 0x277   : > { %v1747_v29 = vxor.u32 2147483648, %v5585_v22  ;;  %v2145_v1 = vor.u32 4788187, %v2144_v54  ;;  %v2148_v60 = vcvt.s32.f32 %v2141_v37  ;;  %v1335_v59 = vsel %vm1333_vm13, %v1334_v4, %v3540_v14  ;;  %v5593_v37 = vld [vmem:[#allocation26_spill] sm:$0xff]  ;;  %v5594_v54 = vld [vmem:[#allocation25_spill] sm:$0xff] }
 0x278   : > { %v1648_v46 = vsel %vm1641_vm6, %v1644_v11, %v1647_v5  ;;  %v1332_v36 = vsel %vm1330_vm14, %v3538_v6, %v1331_v3  ;;  %v1441_v24 = vsel %vm1430_vm15, nan, %v1440_v20  ;;  %v1545_v47 = vsel %vm1534_vm3, nan, %v1544_v17  ;;  %v5592_v20 = vld [vmem:[#allocation22_spill] sm:$0xff]  ;;  %v5595_v11 = vld [vmem:[#allocation17_spill] sm:$0xff] }
 0x279   : > { %v1649_v30 = vsel %vm1638_vm7, nan, %v1648_v46  ;;  %v2146_v16 = vand.u32 2147483647, %v2145_v1  ;;  %v1336_v53 = vsel %vm1329_vm9, %v1332_v36, %v1335_v59  ;;  %vm1745_vm12 = vcmp.lt.s32.totalorder %v1744_v10, 2 }
 0x27a   : > { %vm1746_vm13 = vcmp.eq.s32.totalorder %v1744_v10, 0  ;;  %v1337_v27 = vsel %vm1326_vm0, nan, %v1336_v53  ;;  %vm1749_vm14 = vcmp.eq.s32.totalorder %v1744_v10, 2  ;;  %v1750_v44 = vxor.u32 2147483648, %v5586_v23 }
 0x27b   : > { %v1748_v55 = vsel %vm1746_vm13, %v5586_v23, %v1747_v29  ;;  %v2149_v31 = vmul.f32 %v2148_v60, %v2146_v16  ;;  %v2277_v38 = vpack.c.bf16 %v1441_v24, %v1337_v27  ;;  %v1848_v33 = vand.u32 3, %v5587_v28  ;;  %v3478_v27 = vld [vmem:[%s5437_s5 + $0x8] sm:$0xff]  }
 0x27c   : > { %v1851_v15 = vxor.u32 2147483648, %v5588_v42  ;;  %v2278_v58 = vpack.c.bf16 %v1649_v30, %v1545_v47  ;;  %v1751_v57 = vsel %vm1749_vm14, %v1750_v44, %v5585_v22  ;;  %v1854_v0 = vxor.u32 2147483648, %v5589_v21  ;;  %3305 = vmatprep.subr.bf16.mxu0 %v3478_v27  ;;  %v3480_v23 = vld [vmem:[%s5439_s7 + $0x8] sm:$0xff]  }
 0x27d   : > { %v1952_v12 = vand.u32 3, %v5231_v48  ;;  %v2150_v43 = vxor.u32 2147483648, %v2149_v31  ;;  %3292 = vmatmul.mubr.msk.bf16.gmra.mrb[12].mxu1 %vm2301_vm11, %v2277_v38  ;;  %vm1742_vm15 = vweird.f32 %v5590_v34  ;;  %v1752_v39 = vsel %vm1745_vm12, %v1748_v55, %v1751_v57  ;;  %3306 = vmatpush3.bf16.msra.mxu0 %v3478_v27 }
 0x27e   : > { %vm1850_vm3 = vcmp.eq.s32.totalorder %v1848_v33, 0  ;;  %3295 = vmatprep.mubr.msk.bf16.mxu1 %vm2301_vm11, %v2278_v58  ;;  %vm1846_vm9 = vweird.f32 %v5591_v8  ;;  %vm1849_vm7 = vcmp.lt.s32.totalorder %v1848_v33, 2  ;;  %vm1853_vm0 = vcmp.eq.s32.totalorder %v1848_v33, 2 }
 0x27f   : > { %v1852_v26 = vsel %vm1850_vm3, %v5589_v21, %v1851_v15  ;;  %v2151_v32 = vsel %vm2068_vm10, %v2150_v43, %v2149_v31  ;;  %v1753_v48 = vsel %vm1742_vm15, nan, %v1752_v39  ;;  %v1855_v13 = vsel %vm1853_vm0, %v1854_v0, %v5588_v42 }
 0x280   : > { %v1955_v40 = vxor.u32 2147483648, %v5115_v62  ;;  %v2154_v63 = vsel %vm5186_vm4, %v4917_v50, %v2151_v32  ;;  %v1856_v51 = vsel %vm1849_vm7, %v1852_v26, %v1855_v13  ;;  %vm1954_vm5 = vcmp.eq.s32.totalorder %v1952_v12, 0 }
 0x281   : > { %v1958_v61 = vxor.u32 2147483648, %v5111_v52  ;;  %3543 = vcosq.f32 %v2154_v63  ;;  %v1857_v9 = vsel %vm1846_vm9, nan, %v1856_v51  ;;  %vm1957_vm8 = vcmp.eq.s32.totalorder %v1952_v12, 2 }
 0x282   : > { %v1956_v7 = vsel %vm1954_vm5, %v5111_v52, %v1955_v40  ;;  %3545 = vsinq.f32 %v2154_v63  ;;  %vm1953_vm10 = vcmp.lt.s32.totalorder %v1952_v12, 2  ;;  %v2056_v6 = vand.u32 3, %v5592_v20 }
 0x283   : > { %v1959_v45 = vsel %vm1957_vm8, %v1958_v61, %v5115_v62  ;;  %v2279_v17 = vpack.c.bf16 %v1857_v9, %v1753_v48  ;;  %v2059_v25 = vxor.u32 2147483648, %v5593_v37  ;;  %v2062_v4 = vxor.u32 2147483648, %v5594_v54 }
 0x284   : > { %v1960_v14 = vsel %vm1953_vm10, %v1956_v7, %v1959_v45  ;;  %vm1950_vm4 = vweird.f32 %v4527_v2  ;;  %vm2054_vm6 = vweird.f32 %v5595_v11  ;;  %vm2058_vm2 = vcmp.eq.s32.totalorder %v2056_v6, 0 }
 0x285   : > { %vm2061_vm1 = vcmp.eq.s32.totalorder %v2056_v6, 2  ;;  %3296 = vmatmul.mubr.msk.bf16.gmra.mrb[16].mxu1 %vm2301_vm11, %v2279_v17  ;;  %v1961_v52 = vsel %vm1950_vm4, nan, %v1960_v14  ;;  %vm2057_vm12 = vcmp.lt.s32.totalorder %v2056_v6, 2  ;;  %v2060_v62 = vsel %vm2058_vm2, %v5594_v54, %v2059_v25 }
 0x286   : > { %v2063_v3 = vsel %vm2061_vm1, %v2062_v4, %v5593_v37  ;;  %v2264_v35 = vand.u32 3, %v5241_v49  ;;  %v2267_v10 = vxor.u32 2147483648, %v5273_v56  ;;  %v2270_v22 = vxor.u32 2147483648, %v5255_v18 }
 0x287   : > { %v2064_v5 = vsel %vm2057_vm12, %v2060_v62, %v2063_v3  ;;  %v2160_v1 = vand.u32 3, %v5246_v41  ;;  %vm2262_vm7 = vweird.f32 %v4803_v19  ;;  %vm2158_vm5 = vweird.f32 %v4917_v50  ;;  %v3479_v19 = vld [vmem:[%s5439_s7] sm:$0xff]  }
 0x288   : > { %v2065_v2 = vsel %vm2054_vm6, nan, %v2064_v5  ;;  %vm2266_vm13 = vcmp.eq.s32.totalorder %v2264_v35, 0  ;;  %vm2269_vm14 = vcmp.eq.s32.totalorder %v2264_v35, 2  ;;  %vm2265_vm15 = vcmp.lt.s32.totalorder %v2264_v35, 2  ;;  %3323 = vmatprep.subr.bf16.mxu1 %v3479_v19  ;;  %v3151_v50 = vld [vmem:[%s5436_s4] ss:$0 sm:$0xff] }
 0x289   : > { %v2280_v29 = vpack.c.bf16 %v2065_v2, %v1961_v52  ;;  %v2268_v60 = vsel %vm2266_vm13, %v5255_v18, %v2267_v10  ;;  %v2271_v59 = vsel %vm2269_vm14, %v2270_v22, %v5273_v56  ;;  %vm2165_vm3 = vcmp.eq.s32.totalorder %v2160_v1, 2  ;;  %3324 = vmatpush3.bf16.msra.mxu1 %v3479_v19 }
 0x28a   : > { %v2272_v24 = vsel %vm2265_vm15, %v2268_v60, %v2271_v59  ;;  %vm2162_vm9 = vcmp.eq.s32.totalorder %v2160_v1, 0  ;;  %vm2161_vm0 = vcmp.lt.s32.totalorder %v2160_v1, 2  ;;  %3325 = vmatprep.subr.bf16.mxu1 %v3480_v23 }
 0x28b   : > { %3299 = vmatprep.mubr.msk.bf16.mxu1 %vm2301_vm11, %v2280_v29  ;;  %v3544_v46 = vpop.eup %3543  ;;  %v2273_v41 = vsel %vm2262_vm7, nan, %v2272_v24 }
 0x28c   : > { %v3546_v36 = vpop.eup %3545  ;;  %v2166_v49 = vxor.u32 2147483648, %v3544_v46 }
 0x28d   : > { %v2163_v47 = vxor.u32 2147483648, %v3546_v36  ;;  %3326 = vmatpush3.bf16.msra.mxu1 %v3480_v23 }
 0x28e   : > { %v2167_v30 = vsel %vm2165_vm3, %v2166_v49, %v3546_v36 }
 0x28f   : > { %v2164_v16 = vsel %vm2162_vm9, %v3544_v46, %v2163_v47 }
 0x290   : > { %v2168_v18 = vsel %vm2161_vm0, %v2164_v16, %v2167_v30 }
 0x291   : > { %v2169_v56 = vsel %vm2158_vm5, nan, %v2168_v18  ;;  %v3482_v18 = vld [vmem:[%s5441_s9 + $0x8] sm:$0xff]  }
 0x292   : > { %v2281_v53 = vpack.c.bf16 %v2273_v41, %v2169_v56  ;;  %v3481_v41 = vld [vmem:[%s5441_s9] sm:$0xff]  }
 0x293   : > { %3343 = vmatprep.subr.bf16.mxu0 %v3481_v41  ;;  %v3162_v56 = vld [vmem:[%s5438_s6] ss:$0 sm:$0xff] }
 0x294   : > { %3300 = vmatmul.mubr.msk.bf16.gmra.mrb[20].mxu1 %vm2301_vm11, %v2281_v53  ;;  %vm2474_vm11 = vcmask 261120  }
 0x339   : > { %v3289_v55 = vpop.f32.mrb[8].mxu1 }
 0x33a   : > { %v2373_v44 = vadd.f32 %v3289_v55, %v3151_v50  ;;  %v2364_v31 = vpop.f32.mrb[9].mxu1 }
 0x33b   : > { %v2365_v38 = vadd.f32 %v3151_v50, %v2364_v31  ;;  %v3290_v28 = vpop.f32.mrb[10].mxu1 }
 0x33c   : > { %v2376_v33 = vadd.f32 %v3290_v28, %v3151_v50  ;;  %v2367_v42 = vpop.f32.mrb[11].mxu1  ;;  %v2429_v58 = vmax.f32 %v2373_v44, 0.0 }
 0x33d   : > { %v2368_v15 = vadd.f32 %v3151_v50, %v2367_v42  ;;  %v2427_v21 = vmax.f32 %v2365_v38, 0.0 }
 0x33e   : > { %v2430_v57 = vmax.f32 %v2376_v33, 0.0 }
 0x33f   : > { %v2428_v0 = vmax.f32 %v2368_v15, 0.0 }
 0x340   : > { %v2444_v12 = vpack.c.bf16 %v2430_v57, %v2429_v58 }
 0x341   : > { %v2443_v43 = vpack.c.bf16 %v2428_v0, %v2427_v21 }
 0x343   : > { %3307 = vmatprep.mubr.msk.bf16.mxu0 %vm2474_vm11, %v2443_v43 }
 0x344   : > { %3308 = vmatmul.mubr.msk.bf16.vlgmr.msra.gmra.mrb[8].mxu0 %vm2474_vm11, %v2444_v12 }
 0x345   : > { %3344 = vmatpush3.bf16.msra.mxu0 %v3481_v41 }
 0x346   : > { %3345 = vmatprep.subr.bf16.mxu0 %v3482_v18 }
 0x349   : > { %3346 = vmatpush3.bf16.msra.mxu0 %v3482_v18 }
 0x350   : > { %v3293_v34 = vpop.f32.mrb[12].mxu1 }
 0x351   : > { %v2389_v39 = vadd.f32 %v3293_v34, %v3151_v50  ;;  %v2380_v8 = vpop.f32.mrb[13].mxu1 }
 0x352   : > { %v2381_v26 = vadd.f32 %v3151_v50, %v2380_v8  ;;  %v3294_v32 = vpop.f32.mrb[14].mxu1 }
 0x353   : > { %v2392_v48 = vadd.f32 %v3294_v32, %v3151_v50  ;;  %v2383_v13 = vpop.f32.mrb[15].mxu1  ;;  %v2433_v63 = vmax.f32 %v2389_v39, 0.0 }
 0x354   : > { %v2384_v40 = vadd.f32 %v3151_v50, %v2383_v13  ;;  %v2431_v61 = vmax.f32 %v2381_v26, 0.0 }
 0x355   : > { %v2434_v51 = vmax.f32 %v2392_v48, 0.0 }
 0x356   : > { %v2432_v9 = vmax.f32 %v2384_v40, 0.0 }
 0x357   : > { %v2446_v7 = vpack.c.bf16 %v2434_v51, %v2433_v63 }
 0x358   : > { %v2445_v45 = vpack.c.bf16 %v2432_v9, %v2431_v61  ;;  %v3297_v20 = vpop.f32.mrb[16].mxu1 }
 0x359   : > { %v2405_v6 = vadd.f32 %v3297_v20, %v3151_v50  ;;  %v2396_v17 = vpop.f32.mrb[17].mxu1 }
 0x35a   : > { %v2397_v14 = vadd.f32 %v3151_v50, %v2396_v17  ;;  %v3298_v37 = vpop.f32.mrb[18].mxu1  ;;  %3311 = vmatprep.mubr.msk.bf16.mxu0 %vm2474_vm11, %v2445_v45 }
 0x35b   : > { %v2408_v25 = vadd.f32 %v3298_v37, %v3151_v50  ;;  %v2399_v54 = vpop.f32.mrb[19].mxu1  ;;  %3312 = vmatmul.mubr.msk.bf16.gmra.mrb[12].mxu0 %vm2474_vm11, %v2446_v7  ;;  %v2437_v11 = vmax.f32 %v2405_v6, 0.0 }
 0x35c   : > { %v2400_v4 = vadd.f32 %v3151_v50, %v2399_v54  ;;  %v2435_v62 = vmax.f32 %v2397_v14, 0.0 }
 0x35d   : > { %v2438_v52 = vmax.f32 %v2408_v25, 0.0 }
 0x35e   : > { %v2436_v3 = vmax.f32 %v2400_v4, 0.0 }
 0x35f   : > { %v2448_v5 = vpack.c.bf16 %v2438_v52, %v2437_v11 }
 0x360   : > { %v2447_v35 = vpack.c.bf16 %v2436_v3, %v2435_v62 }
 0x362   : > { %3315 = vmatprep.mubr.msk.bf16.mxu0 %vm2474_vm11, %v2447_v35 }
 0x363   : > { %3316 = vmatmul.mubr.msk.bf16.gmra.mrb[16].mxu0 %vm2474_vm11, %v2448_v5 }
 0x367   : > { %v3301_v10 = vpop.f32.mrb[20].mxu1 }
 0x368   : > { %v2421_v22 = vadd.f32 %v3301_v10, %v3151_v50  ;;  %v2412_v2 = vpop.f32.mrb[21].mxu1 }
 0x369   : > { %v2413_v29 = vadd.f32 %v3151_v50, %v2412_v2  ;;  %v3302_v1 = vpop.f32.mrb[22].mxu1 }
 0x36a   : > { %v2424_v60 = vadd.f32 %v3302_v1, %v3151_v50  ;;  %v2415_v59 = vpop.f32.mrb[23].mxu1  ;;  %v2441_v36 = vmax.f32 %v2421_v22, 0.0 }
 0x36b   : > { %v2416_v46 = vadd.f32 %v3151_v50, %v2415_v59  ;;  %v2439_v24 = vmax.f32 %v2413_v29, 0.0 }
 0x36c   : > { %v2442_v49 = vmax.f32 %v2424_v60, 0.0 }
 0x36d   : > { %v2440_v47 = vmax.f32 %v2416_v46, 0.0 }
 0x36e   : > { %v2450_v30 = vpack.c.bf16 %v2442_v49, %v2441_v36  ;;  %v3173_v49 = vld [vmem:[%s5440_s8] ss:$0 sm:$0xff] }
 0x36f   : > { %v2449_v16 = vpack.c.bf16 %v2440_v47, %v2439_v24 }
 0x371   : > { %3319 = vmatprep.mubr.msk.bf16.mxu0 %vm2474_vm11, %v2449_v16 }
 0x372   : > { %3320 = vmatmul.mubr.msk.bf16.gmra.mrb[20].mxu0 %vm2474_vm11, %v2450_v30 }
 0x417   : > { %v3309_v53 = vpop.f32.mrb[8].mxu0 }
 0x418   : > { %v2542_v27 = vadd.f32 %v3309_v53, %v3162_v56  ;;  %v2533_v19 = vpop.f32.mrb[9].mxu0 }
 0x419   : > { %v2534_v23 = vadd.f32 %v3162_v56, %v2533_v19  ;;  %v3310_v50 = vpop.f32.mrb[10].mxu0 }
 0x41a   : > { %v2545_v55 = vadd.f32 %v3310_v50, %v3162_v56  ;;  %v2536_v44 = vpop.f32.mrb[11].mxu0  ;;  %v2598_v38 = vmax.f32 %v2542_v27, 0.0 }
 0x41b   : > { %v2537_v31 = vadd.f32 %v3162_v56, %v2536_v44  ;;  %v2596_v33 = vmax.f32 %v2534_v23, 0.0 }
 0x41c   : > { %v2599_v28 = vmax.f32 %v2545_v55, 0.0 }
 0x41d   : > { %v2597_v42 = vmax.f32 %v2537_v31, 0.0 }
 0x41e   : > { %v2613_v15 = vpack.c.bf16 %v2599_v28, %v2598_v38 }
 0x41f   : > { %v2612_v58 = vpack.c.bf16 %v2597_v42, %v2596_v33 }
 0x421   : > { %3327 = vmatprep.mubr.msk.bf16.mxu1 %vm2474_vm11, %v2612_v58 }
 0x422   : > { %3328 = vmatmul.mubr.msk.bf16.vlgmr.msra.gmra.mrb[24].mxu1 %vm2474_vm11, %v2613_v15 }
 0x42e   : > { %v3313_v57 = vpop.f32.mrb[12].mxu0 }
 0x42f   : > { %v2558_v21 = vadd.f32 %v3313_v57, %v3162_v56  ;;  %v2549_v0 = vpop.f32.mrb[13].mxu0 }
 0x430   : > { %v2550_v12 = vadd.f32 %v3162_v56, %v2549_v0  ;;  %v3314_v43 = vpop.f32.mrb[14].mxu0 }
 0x431   : > { %v2561_v34 = vadd.f32 %v3314_v43, %v3162_v56  ;;  %v2552_v39 = vpop.f32.mrb[15].mxu0  ;;  %v2602_v26 = vmax.f32 %v2558_v21, 0.0 }
 0x432   : > { %v2553_v8 = vadd.f32 %v3162_v56, %v2552_v39  ;;  %v2600_v48 = vmax.f32 %v2550_v12, 0.0 }
 0x433   : > { %v2603_v32 = vmax.f32 %v2561_v34, 0.0 }
 0x434   : > { %v2601_v13 = vmax.f32 %v2553_v8, 0.0 }
 0x435   : > { %v2615_v40 = vpack.c.bf16 %v2603_v32, %v2602_v26 }
 0x436   : > { %v2614_v63 = vpack.c.bf16 %v2601_v13, %v2600_v48  ;;  %v3317_v51 = vpop.f32.mrb[16].mxu0 }
 0x437   : > { %v2574_v61 = vadd.f32 %v3317_v51, %v3162_v56  ;;  %v2565_v9 = vpop.f32.mrb[17].mxu0 }
 0x438   : > { %v2566_v7 = vadd.f32 %v3162_v56, %v2565_v9  ;;  %v3318_v45 = vpop.f32.mrb[18].mxu0  ;;  %3331 = vmatprep.mubr.msk.bf16.mxu1 %vm2474_vm11, %v2614_v63 }
 0x439   : > { %v2577_v20 = vadd.f32 %v3318_v45, %v3162_v56  ;;  %v2568_v6 = vpop.f32.mrb[19].mxu0  ;;  %3332 = vmatmul.mubr.msk.bf16.gmra.mrb[28].mxu1 %vm2474_vm11, %v2615_v40  ;;  %v2606_v14 = vmax.f32 %v2574_v61, 0.0 }
 0x43a   : > { %v2569_v17 = vadd.f32 %v3162_v56, %v2568_v6  ;;  %v2604_v25 = vmax.f32 %v2566_v7, 0.0 }
 0x43b   : > { %v2607_v37 = vmax.f32 %v2577_v20, 0.0 }
 0x43c   : > { %v2605_v54 = vmax.f32 %v2569_v17, 0.0 }
 0x43d   : > { %v2617_v4 = vpack.c.bf16 %v2607_v37, %v2606_v14 }
 0x43e   : > { %v2616_v11 = vpack.c.bf16 %v2605_v54, %v2604_v25 }
 0x440   : > { %3335 = vmatprep.mubr.msk.bf16.mxu1 %vm2474_vm11, %v2616_v11 }
 0x441   : > { %3336 = vmatmul.mubr.msk.bf16.gmra.mrb[32].mxu1 %vm2474_vm11, %v2617_v4 }
 0x445   : > { %v3321_v52 = vpop.f32.mrb[20].mxu0 }
 0x446   : > { %v2590_v62 = vadd.f32 %v3321_v52, %v3162_v56  ;;  %v2581_v3 = vpop.f32.mrb[21].mxu0 }
 0x447   : > { %v2582_v5 = vadd.f32 %v3162_v56, %v2581_v3  ;;  %v3322_v35 = vpop.f32.mrb[22].mxu0 }
 0x448   : > { %v2593_v10 = vadd.f32 %v3322_v35, %v3162_v56  ;;  %v2584_v22 = vpop.f32.mrb[23].mxu0  ;;  %v2610_v29 = vmax.f32 %v2590_v62, 0.0 }
 0x449   : > { %v2585_v2 = vadd.f32 %v3162_v56, %v2584_v22  ;;  %v2608_v60 = vmax.f32 %v2582_v5, 0.0 }
 0x44a   : > { %v2611_v1 = vmax.f32 %v2593_v10, 0.0 }
 0x44b   : > { %v2609_v59 = vmax.f32 %v2585_v2, 0.0  ;;  %v3184_v2 = vld [vmem:[%s5442_s10] ss:$0 sm:$0xff] }
 0x44c   : > { %v2619_v46 = vpack.c.bf16 %v2611_v1, %v2610_v29 }
 0x44d   : > { %v2618_v36 = vpack.c.bf16 %v2609_v59, %v2608_v60 }
 0x44f   : > { %3339 = vmatprep.mubr.msk.bf16.mxu1 %vm2474_vm11, %v2618_v36 }
 0x450   : > { %3340 = vmatmul.mubr.msk.bf16.gmra.mrb[36].mxu1 %vm2474_vm11, %v2619_v46 }
 0x4f5   : > { %v3329_v24 = vpop.f32.mrb[24].mxu1 }
 0x4f6   : > { %v2710_v47 = vadd.f32 %v3329_v24, %v3173_v49  ;;  %v2701_v30 = vpop.f32.mrb[25].mxu1 }
 0x4f7   : > { %v2702_v16 = vadd.f32 %v3173_v49, %v2701_v30  ;;  %v3330_v41 = vpop.f32.mrb[26].mxu1 }
 0x4f8   : > { %v2713_v18 = vadd.f32 %v3330_v41, %v3173_v49  ;;  %v2704_v56 = vpop.f32.mrb[27].mxu1  ;;  %v2766_v27 = vmax.f32 %v2710_v47, 0.0 }
 0x4f9   : > { %v2705_v53 = vadd.f32 %v3173_v49, %v2704_v56  ;;  %v2764_v23 = vmax.f32 %v2702_v16, 0.0 }
 0x4fa   : > { %v2767_v19 = vmax.f32 %v2713_v18, 0.0 }
 0x4fb   : > { %v2765_v50 = vmax.f32 %v2705_v53, 0.0 }
 0x4fc   : > { %v2781_v55 = vpack.c.bf16 %v2767_v19, %v2766_v27 }
 0x4fd   : > { %v2780_v44 = vpack.c.bf16 %v2765_v50, %v2764_v23 }
 0x4ff   : > { %3347 = vmatprep.mubr.msk.bf16.mxu0 %vm2474_vm11, %v2780_v44 }
 0x500   : > { %3348 = vmatmul.mubr.msk.bf16.vlgmr.msra.gmra.mrb[24].mxu0 %vm2474_vm11, %v2781_v55 }
 0x50c   : > { %v3333_v31 = vpop.f32.mrb[28].mxu1 }
 0x50d   : > { %v2726_v38 = vadd.f32 %v3333_v31, %v3173_v49  ;;  %v2717_v28 = vpop.f32.mrb[29].mxu1 }
 0x50e   : > { %v2718_v33 = vadd.f32 %v3173_v49, %v2717_v28  ;;  %v3334_v42 = vpop.f32.mrb[30].mxu1 }
 0x50f   : > { %v2729_v15 = vadd.f32 %v3334_v42, %v3173_v49  ;;  %v2720_v58 = vpop.f32.mrb[31].mxu1  ;;  %v2770_v21 = vmax.f32 %v2726_v38, 0.0 }
 0x510   : > { %v2721_v57 = vadd.f32 %v3173_v49, %v2720_v58  ;;  %v2768_v12 = vmax.f32 %v2718_v33, 0.0 }
 0x511   : > { %v2771_v0 = vmax.f32 %v2729_v15, 0.0 }
 0x512   : > { %v2769_v43 = vmax.f32 %v2721_v57, 0.0 }
 0x513   : > { %v2783_v34 = vpack.c.bf16 %v2771_v0, %v2770_v21 }
 0x514   : > { %v2782_v39 = vpack.c.bf16 %v2769_v43, %v2768_v12  ;;  %v3337_v8 = vpop.f32.mrb[32].mxu1 }
 0x515   : > { %v2742_v26 = vadd.f32 %v3337_v8, %v3173_v49  ;;  %v2733_v32 = vpop.f32.mrb[33].mxu1 }
 0x516   : > { %v2734_v48 = vadd.f32 %v3173_v49, %v2733_v32  ;;  %v3338_v13 = vpop.f32.mrb[34].mxu1  ;;  %3351 = vmatprep.mubr.msk.bf16.mxu0 %vm2474_vm11, %v2782_v39 }
 0x517   : > { %v2745_v40 = vadd.f32 %v3338_v13, %v3173_v49  ;;  %v2736_v63 = vpop.f32.mrb[35].mxu1  ;;  %3352 = vmatmul.mubr.msk.bf16.gmra.mrb[28].mxu0 %vm2474_vm11, %v2783_v34  ;;  %v2774_v61 = vmax.f32 %v2742_v26, 0.0 }
 0x518   : > { %v2737_v51 = vadd.f32 %v3173_v49, %v2736_v63  ;;  %v2772_v7 = vmax.f32 %v2734_v48, 0.0  ;;  %v2964_v63 = vlaneseq }
 0x519   : > { %v2775_v9 = vmax.f32 %v2745_v40, 0.0 }
 0x51a   : > { %v2773_v45 = vmax.f32 %v2737_v51, 0.0 }
 0x51b   : > { %v2785_v20 = vpack.c.bf16 %v2775_v9, %v2774_v61  ;;  %v2965_v9 = vshrl.u32 %v2964_v63, 7 }
 0x51c   : > { %v2784_v6 = vpack.c.bf16 %v2773_v45, %v2772_v7 }
 0x51d   : > { %vm2966_vm10 = vcmp.eq.s32.totalorder %v2965_v9, 3 }
 0x51e   : > { %3355 = vmatprep.mubr.msk.bf16.mxu0 %vm2474_vm11, %v2784_v6 }
 0x51f   : > { %3356 = vmatmul.mubr.msk.bf16.gmra.mrb[32].mxu0 %vm2474_vm11, %v2785_v20 }
 0x523   : > { %v3341_v17 = vpop.f32.mrb[36].mxu1 }
 0x524   : > { %v2758_v14 = vadd.f32 %v3341_v17, %v3173_v49  ;;  %v2749_v37 = vpop.f32.mrb[37].mxu1 }
 0x525   : > { %v2750_v25 = vadd.f32 %v3173_v49, %v2749_v37  ;;  %v3342_v54 = vpop.f32.mrb[38].mxu1 }
 0x526   : > { %v2761_v4 = vadd.f32 %v3342_v54, %v3173_v49  ;;  %v2752_v11 = vpop.f32.mrb[39].mxu1  ;;  %v2778_v62 = vmax.f32 %v2758_v14, 0.0 }
 0x527   : > { %v2753_v52 = vadd.f32 %v3173_v49, %v2752_v11  ;;  %v2776_v5 = vmax.f32 %v2750_v25, 0.0 }
 0x528   : > { %v2779_v3 = vmax.f32 %v2761_v4, 0.0 }
 0x529   : > { %v2777_v35 = vmax.f32 %v2753_v52, 0.0 }
 0x52a   : > { %v2787_v10 = vpack.c.bf16 %v2779_v3, %v2778_v62 }
 0x52b   : > { %v2786_v22 = vpack.c.bf16 %v2777_v35, %v2776_v5 }
 0x52d   : > { %3359 = vmatprep.mubr.msk.bf16.mxu0 %vm2474_vm11, %v2786_v22 }
 0x52e   : > { %3360 = vmatmul.mubr.msk.bf16.gmra.mrb[36].mxu0 %vm2474_vm11, %v2787_v10 }
 0x5d3   : > { %v3349_v29 = vpop.f32.mrb[24].mxu0 }
 0x5d4   : > { %v2869_v1 = vpop.f32.mrb[25].mxu0  ;;  %v2878_v49 = vadd.f32 %v3349_v29, %v3184_v2 }
 0x5d5   : > { %v3350_v60 = vpop.f32.mrb[26].mxu0  ;;  %v2870_v59 = vadd.f32 %v3184_v2, %v2869_v1 }
 0x5d6   : > { %v2872_v46 = vpop.f32.mrb[27].mxu0  ;;  %v2881_v24 = vadd.f32 %v3350_v60, %v3184_v2 }
 0x5d7   : > { %2932 = vxpose.xlu0.b32.start [1/16] (narrow) %v2870_v59, 8  ;;  %v2873_v36 = vadd.f32 %v3184_v2, %v2872_v46 }
 0x5db   : > { %2933 = vxpose.xlu0.b32.cont [2/16] (narrow) %v2873_v36, 8 }
 0x5df   : > { %2934 = vxpose.xlu0.b32.cont [3/16] (narrow) %v2878_v49, 8 }
 0x5e3   : > { %2935 = vxpose.xlu0.b32.cont [4/16] (narrow) %v2881_v24, 8 }
 0x5ea   : > { %v3353_v47 = vpop.f32.mrb[28].mxu0 }
 0x5eb   : > { %v2885_v30 = vpop.f32.mrb[29].mxu0  ;;  %v2894_v19 = vadd.f32 %v3353_v47, %v3184_v2 }
 0x5ec   : > { %v2886_v16 = vadd.f32 %v3184_v2, %v2885_v30  ;;  %v3354_v41 = vpop.f32.mrb[30].mxu0 }
 0x5ed   : > { %v2888_v18 = vpop.f32.mrb[31].mxu0  ;;  %v2897_v55 = vadd.f32 %v3354_v41, %v3184_v2 }
 0x5ee   : > { %2936 = vxpose.xlu0.b32.cont [5/16] (narrow) %v2886_v16, 8  ;;  %v2889_v56 = vadd.f32 %v3184_v2, %v2888_v18 }
 0x5f2   : > { %v3357_v53 = vpop.f32.mrb[32].mxu0  ;;  %2937 = vxpose.xlu0.b32.cont [6/16] (narrow) %v2889_v56, 8 }
 0x5f3   : > { %v2901_v27 = vpop.f32.mrb[33].mxu0  ;;  %v2910_v15 = vadd.f32 %v3357_v53, %v3184_v2 }
 0x5f4   : > { %v3358_v23 = vpop.f32.mrb[34].mxu0  ;;  %v2902_v44 = vadd.f32 %v3184_v2, %v2901_v27 }
 0x5f5   : > { %v2904_v50 = vpop.f32.mrb[35].mxu0  ;;  %v2913_v21 = vadd.f32 %v3358_v23, %v3184_v2 }
 0x5f6   : > { %2938 = vxpose.xlu0.b32.cont [7/16] (narrow) %v2894_v19, 8  ;;  %v2905_v31 = vadd.f32 %v3184_v2, %v2904_v50 }
 0x5fa   : > { %2939 = vxpose.xlu0.b32.cont [8/16] (narrow) %v2897_v55, 8 }
 0x5fe   : > { %2940 = vxpose.xlu0.b32.cont [9/16] (narrow) %v2902_v44, 8 }
 0x601   : > { %v3361_v38 = vpop.f32.mrb[36].mxu0 }
 0x602   : > { %v2926_v28 = vadd.f32 %v3361_v38, %v3184_v2  ;;  %v2917_v33 = vpop.f32.mrb[37].mxu0  ;;  %2941 = vxpose.xlu0.b32.cont [10/16] (narrow) %v2905_v31, 8 }
 0x603   : > { %v3362_v42 = vpop.f32.mrb[38].mxu0  ;;  %v2918_v0 = vadd.f32 %v3184_v2, %v2917_v33 }
 0x604   : > { %v2929_v58 = vadd.f32 %v3362_v42, %v3184_v2  ;;  %v2920_v57 = vpop.f32.mrb[39].mxu0 }
 0x605   : > { %v2921_v12 = vadd.f32 %v3184_v2, %v2920_v57 }
 0x606   : > { %2942 = vxpose.xlu0.b32.cont [11/16] (narrow) %v2910_v15, 8 }
 0x60a   : > { %2943 = vxpose.xlu0.b32.cont [12/16] (narrow) %v2913_v21, 8 }
 0x60e   : > { %2944 = vxpose.xlu0.b32.cont [13/16] (narrow) %v2918_v0, 8 }
 0x612   : > { %2945 = vxpose.xlu0.b32.cont [14/16] (narrow) %v2921_v12, 8 }
 0x616   : > { %2946 = vxpose.xlu0.b32.cont [15/16] (narrow) %v2926_v28, 8 }
 0x61a   : > { %2947 = vxpose.xlu0.b32.end [16/16] (narrow) %v2929_v58, 8 }
 0x65e   : > { %v2948_v43 = vpop.trf.xlu0 }
 0x65f   : > { %v2968_v34 = vmin.f32 %v2948_v43, 20.0  ;;  %v3195_v39 = vmul.f32 -1.442695, %v2948_v43  ;;  %vm2967_vm4 = vcmp.gt.f32.partialorder %v2948_v43, 20.0 }
 0x661   : > { %v2969_v8 = vmul.f32 1.442695, %v2968_v34  ;;  %3547 = vpow2.f32 %v3195_v39 }
 0x663   : > { %3549 = vpow2.f32 %v2969_v8 }
 0x66b   : > { %v3548_v26 = vpop.eup %3547 }
 0x66c   : > { %v2984_v13 = vadd.f32 1.0, %v3548_v26 }
 0x66d   : > { %v3550_v32 = vpop.eup %3549 }
 0x66e   : > { %v2971_v48 = vadd.f32 1.0, %v3550_v32  ;;  %v2974_v40 = vmul.f32 -0.5, %v3550_v32  ;;  %v2977_v61 = vand.u32 2147483647, %v3550_v32 }
 0x670   : > { %3551 = vlog2.f32 %v2971_v48  ;;  %v2975_v51 = vadd.f32 1.0, %v2974_v40  ;;  %vm2978_vm8 = vcmp.lt.f32.partialorder %v2977_v61, 0.0004427343 }
 0x671   : > { %3553 = vrcp.f32 %v2984_v13 }
 0x672   : > { %v2976_v20 = vmul.f32 %v3550_v32, %v2975_v51 }
 0x67a   : > { %v3552_v7 = vpop.eup %3551 }
 0x67b   : > { %v2973_v45 = vmul.f32 0.6931472, %v3552_v7  ;;  %v3554_v17 = vpop.eup %3553 }
 0x67d   : > { %v2979_v6 = vsel %vm2978_vm8, %v2976_v20, %v2973_v45 }
 0x67e   : > { %v2980_v14 = vsel %vm2967_vm4, %v2948_v43, %v2979_v6 }
 0x67f   : > { %v2987_v37 = vsel %vm2966_vm10, %v2980_v14, %v3554_v17 }
 0x680   : > { %2988 = vst [vmem:[%s380_s29] sm:$0xff] %v2987_v37 }
 0x681   : > { %3570 = shalt.err (!%p3567_p3)
}
 0x682   : > { %s3571_s22 = scalar_lea.hbm %s5390_s14, 128  ;;  %s3575_s12 = scalar_lea.hbm %s5443_s11, 256 }
 0x683   : > { %p3572_p4 = scmp.ne.s32.totalorder %s5390_s14, %s3571_s22  ;;  %p3576_p9 = scmp.lt.u32.totalorder %s5390_s14, %s5443_s11 }
 0x684   : > { %p3577_p10 = scmp.lt.u32.totalorder %s3575_s12, %s3571_s22  ;;  %p3579_p12 = scmp.lt.u32.totalorder %s3571_s22, %s5390_s14 }
 0x685   : > { %p3573_p7 = pnand %p3572_p4, %p3726_p5 }
 0x686   : > { %p3578_p11 = por %p3577_p10, %p3576_p9 }
 0x687   : > { %p3574_p8 = pneg %p3573_p7 }
 0x688   : > { %p3580_p13 = por %p3579_p12, %p3578_p11 }
 0x68a   : > { %p3581_p0 = pnand %p3580_p13, %p3574_p8 }
 0x68c   : > { %3584 = shalt.err (!%p3581_p0)
}
 0x68d   : > { %3430 = dma.vmem_to_hbm [thread:$0]  (%p3726_p5), %s5392_s30, 128, %s5390_s14, %s2990_s21  }
 0x68e PF: > { %p3436_p1 = scmp.ge.s32.totalorder %s3619_s20, 2  ;;  %s3015_s0 = sand.u32 1, %s3607_s17  }
 0x68f   : > { %s3016_s15 = scalar_lea.sflag [#allocation3], %s3015_s0 }
 0x690   : > { %p3433_p2 = pnand %p3436_p1, %p3730_p6 }
 0x692   : > { %3602 = dma.done.wait (!%p3433_p2), %s3016_s15, 128  }
 0x693   : > { %3604 = vsyncadd (!%p3433_p2), %s3016_s15, 4294967168  ;;  %p21_p3 = scmp.ge.s32.totalorder %s3713_s23, 4   ;;  %s5596_s17 = smov %s3611_s18 }
 0x694   : > { %s5597_s18 = smov %s3615_s19  ;;  %s5598_s19 = smov %s3724_s26 }
 0x695   : > { %s5599_s20 = smov %s3713_s23  ;;  %23 = sbr.rel (!%p21_p3) target bundleno = 5 (0x5), region = 99 }
 0x69c   :  { %3021 = vsyncpa [#allocation3], 1 }
 0x69d   :  { %3023 = vsyncpa [#allocation3 + $0x1], 1 }

</bundles_post_ra>
